<compile_context>
chip_gen: v7x
topology: tpu7x:2x2x1
jax: 0.10.0
libtpu: 0.0.40
codegen_flags: <defaults>
</compile_context>

<pallas_src>
import jax
import jax.numpy as jnp
from jax import lax
from jax.experimental import pallas as pl
from jax.experimental.pallas import tpu as pltpu

_COL0 = 8  # sublane-aligned column offset of the interior inside the scratch


# ---------------------------------------------------------------------------
# Fused kernel (one grid step == `nb` batch images)
# ---------------------------------------------------------------------------
def _bottleneck_kernel(x_ref, w1_ref, b1_ref, w2_ref, b2_ref, w3_ref, b3_ref,
                       o_ref, o1p_ref):
    """x_ref:(nb,H,W,cinp)  w1:(cinp,wp) b1:(1,wp)  w2:(9,wp,wp) b2:(1,wp)
    w3:(wp,coutp) b3:(1,coutp)  o_ref:(nb,H,W,coutp)
    o1p_ref:(nb,H+2,Wp2,wp) zero-padded conv1 activation scratch."""
    nb, H, W, cinp = x_ref.shape
    Wp2 = o1p_ref.shape[2]
    wp = o1p_ref.shape[3]
    coutp = o_ref.shape[3]
    cdt = w1_ref.dtype                      # matmul operand dtype (bf16/f32)
    M = nb * H * W
    Mp = nb * H * Wp2

    # ---- conv1 (1x1) + bn1 + relu ---------------------------------------
    o1 = jnp.dot(x_ref[...].reshape(M, cinp).astype(cdt), w1_ref[...],
                 preferred_element_type=jnp.float32)
    o1 = jnp.maximum(o1 + b1_ref[...], 0.0)

    # Sublane-aligned interior write (_COL0 is a multiple of 8).
    o1p_ref[:, 1:H + 1, _COL0:_COL0 + W, :] = (
        o1.reshape(nb, H, W, wp).astype(o1p_ref.dtype))

    # Zero only the halo border.  The interior was fully overwritten above;
    # any garbage in never-zeroed pad columns only reaches accumulator rows
    # that are discarded by the final column windowing.
    zdt = o1p_ref.dtype
    zrow = jnp.zeros((nb, 1, Wp2, wp), zdt)
    o1p_ref[:, 0:1, :, :] = zrow
    o1p_ref[:, H + 1:H + 2, :, :] = zrow
    o1p_ref[:, 1:H + 1, 0:_COL0, :] = jnp.zeros((nb, H, _COL0, wp), zdt)
    o1p_ref[:, 1:H + 1, _COL0 + W:Wp2, :] = (
        jnp.zeros((nb, H, Wp2 - _COL0 - W, wp), zdt))

    # ---- conv2 (3x3, pad=1) + bn2 + relu --------------------------------
    # Per-ky row slabs (free slices, no compaction); 9 matmuls grouped by kx
    # into three f32 accumulators; kx shift applied once at the end.
    def slab(ky):
        return o1p_ref[:, pl.ds(ky, H), :, :].reshape(Mp, wp)

    def tap_body(ky, carry):
        s = slab(ky)
        return tuple(acc + jnp.dot(s, w2_ref[3 * ky + kx],
                                   preferred_element_type=jnp.float32)
                     for kx, acc in enumerate(carry))

    s0 = slab(0)
    init = tuple(jnp.dot(s0, w2_ref[kx], preferred_element_type=jnp.float32)
                 for kx in range(3))
    a0, a1, a2 = lax.fori_loop(1, 3, tap_body, init, unroll=True)

    def win(a, c0):
        return a.reshape(nb, H, Wp2, wp)[:, :, c0:c0 + W, :]

    o2 = jnp.maximum(win(a0, _COL0 - 1) + win(a1, _COL0) + win(a2, _COL0 + 1)
                     + b2_ref[...], 0.0)
    o2 = o2.reshape(M, wp)

    # ---- conv3 (1x1) + bn3 + residual + relu ----------------------------
    o3 = jnp.dot(o2.astype(cdt), w3_ref[...],
                 preferred_element_type=jnp.float32)
    identity = x_ref[...].reshape(M, coutp).astype(jnp.float32)  # short-lived
    o3 = jnp.maximum(o3 + b3_ref[...] + identity, 0.0)
    o_ref[...] = o3.reshape(nb, H, W, coutp).astype(o_ref.dtype)


# ---------------------------------------------------------------------------
# Wrapper
# ---------------------------------------------------------------------------
def _round_up(v, m):
    return -(-v // m) * m


def _vmem_cap_bytes():
    try:
        return int(pltpu.get_tpu_info().vmem_capacity_bytes)
    except Exception:
        return 64 * 1024 * 1024          # conservative: v7x per-TC VMEM


def _const_spec(a):
    nd = a.ndim
    return pl.BlockSpec(a.shape, lambda n, _nd=nd: (0,) * _nd)


def bottleneck_forward(x_nhwc, w1, w2, w3, bn1, bn2, bn3, *, eps=1e-5,
                       compute_dtype=jnp.bfloat16, out_dtype=None,
                       images_per_step=None):
    """Bottleneck forward (stride=1, downsample=None), fused Pallas kernel.

    x_nhwc : (N, H, W, inplanes)
    w1     : (inplanes, width)      conv1 1x1
    w2     : (3, 3, width, width)   conv2 3x3 (HWIO)
    w3     : (width, 4*planes)      conv3 1x1
    bn*    : (gamma, beta, running_mean, running_var)  -- eval-mode BN
    """
    N, H, W, cin = x_nhwc.shape
    width = w1.shape[1]
    cout = w3.shape[1]
    assert cin == cout, "downsample=None requires inplanes == planes*4"
    assert w2.shape == (3, 3, width, width)
    out_dtype = x_nhwc.dtype if out_dtype is None else out_dtype
    cdt = jnp.dtype(compute_dtype)

    # ---- fold eval-mode BN into per-layer scale + bias -------------------
    def fold(p):
        g, b, m, v = p
        s = g / jnp.sqrt(v + eps)
        return s, b - m * s

    s1, b1 = fold(bn1)
    s2, b2 = fold(bn2)
    s3, b3 = fold(bn3)

    # ---- lane-dense padding (zero-padded channels are exact no-ops) ------
    wp = max(_round_up(width, 128), 128)      # internal width
    cp = max(_round_up(cin, 128), 128)        # cin == cout
    Wp2 = _COL0 + _round_up(W + 1, 8)         # padded scratch columns

    w1f = jnp.pad(w1 * s1[None, :], ((0, cp - cin), (0, wp - width))).astype(cdt)
    b1f = jnp.pad(b1, (0, wp - width)).reshape(1, wp).astype(jnp.float32)
    w2f = jnp.pad((w2 * s2[None, None, None, :]).reshape(9, width, width),
                  ((0, 0), (0, wp - width), (0, wp - width))).astype(cdt)
    b2f = jnp.pad(b2, (0, wp - width)).reshape(1, wp).astype(jnp.float32)
    w3f = jnp.pad(w3 * s3[None, :], ((0, wp - width), (0, cp - cout))).astype(cdt)
    b3f = jnp.pad(b3, (0, cp - cout)).reshape(1, cp).astype(jnp.float32)

    x_in = x_nhwc
    if cp != cin:
        x_in = jnp.pad(x_in, ((0, 0), (0, 0), (0, 0), (0, cp - cin)))
    x_in = x_in.astype(cdt)

    # ---- per-step VMEM footprint & generation-aware budget ---------------
    cb = cdt.itemsize
    ob = jnp.dtype(out_dtype).itemsize

    def step_bytes(nb):
        m, mp = nb * H * W, nb * H * Wp2
        io = 2 * (m * cp * cb + m * cp * ob)                       # x/out (x2 buf)
        wts = 2 * ((cp * wp + 9 * wp * wp + wp * cp) * cb + (2 * wp + cp) * 4)
        scr = nb * (H + 2) * Wp2 * wp * cb
        tmp = 4 * mp * wp * 4 + 3 * m * wp * 4 + 2 * m * cp * 4    # f32 temps
        return io + wts + scr + tmp

    cap = _vmem_cap_bytes()
    budget = max(32 * 1024 * 1024, int(cap * 0.8))

    if images_per_step is None:
        nb = 1
        if N >= 2:
            # Batch small images per step (bigger matmul M), but keep >= 2
            # grid steps so both v7x TensorCores get work.
            target_m = 1024
            for cand in range(1, N // 2 + 1):
                if N % cand:
                    continue
                if step_bytes(cand) > budget * 0.75:
                    continue
                nb = cand
                if cand * H * W >= target_m:
                    break
    else:
        nb = int(images_per_step)
    assert N % nb == 0

    vmem_limit = int(min(max(int(step_bytes(nb) * 1.5), 32 * 1024 * 1024),
                         budget))

    out_p = pl.pallas_call(
        _bottleneck_kernel,
        out_shape=jax.ShapeDtypeStruct((N, H, W, cp), out_dtype),
        grid_spec=pltpu.PrefetchScalarGridSpec(
            num_scalar_prefetch=0,
            grid=(N // nb,),
            in_specs=[pl.BlockSpec((nb, H, W, cp), lambda n: (n, 0, 0, 0)),
                      _const_spec(w1f), _const_spec(b1f),
                      _const_spec(w2f), _const_spec(b2f),
                      _const_spec(w3f), _const_spec(b3f)],
            out_specs=pl.BlockSpec((nb, H, W, cp), lambda n: (n, 0, 0, 0)),
            scratch_shapes=[pltpu.VMEM((nb, H + 2, Wp2, wp), cdt)]),
        compiler_params=pltpu.CompilerParams(
            dimension_semantics=("parallel",),
            vmem_limit_bytes=vmem_limit),
    )(x_in, w1f, b1f, w2f, b2f, w3f, b3f)

    return out_p[..., :cout] if cp != cout else out_p


# ---------------------------------------------------------------------------
# Pure-JAX reference (correctness check only)
# ---------------------------------------------------------------------------
def reference_forward(x_nhwc, w1, w2, w3, bn1, bn2, bn3, eps=1e-5):
    def bn(y, p):
        g, b, m, v = p
        return (y - m) * (g / jnp.sqrt(v + eps)) + b

    dn = ('NHWC', 'HWIO', 'NHWC')
    o = jax.lax.conv_general_dilated(x_nhwc, w1[None, None], (1, 1), 'VALID',
                                     dimension_numbers=dn)
    o = jax.nn.relu(bn(o, bn1))
    o = jax.lax.conv_general_dilated(o, w2, (1, 1), ((1, 1), (1, 1)),
                                     dimension_numbers=dn)
    o = jax.nn.relu(bn(o, bn2))
    o = jax.lax.conv_general_dilated(o, w3[None, None], (1, 1), 'VALID',
                                     dimension_numbers=dn)
    o = bn(o, bn3)
    return jax.nn.relu(o + x_nhwc)


# ---------------------------------------------------------------------------
if __name__ == "__main__":
    key = jax.random.PRNGKey(0)
    N, H, W = 2, 16, 16
    inplanes, planes, base_width = 32, 8, 64
    width = int(planes * (base_width / 64.0))    # 8
    cout = planes * 4                            # 32 == inplanes
    eps = 1e-5

    keys = jax.random.split(key, 8)
    # PyTorch-convention NCHW input, transposed to NHWC for the kernel.
    x_nchw = jax.random.normal(keys[0], (N, inplanes, H, W), jnp.float32)
    x = jnp.transpose(x_nchw, (0, 2, 3, 1))

    w1 = 0.2 * jax.random.normal(keys[1], (inplanes, width), jnp.float32)
    w2 = 0.2 * jax.random.normal(keys[2], (3, 3, width, width), jnp.float32)
    w3 = 0.2 * jax.random.normal(keys[3], (width, cout), jnp.float32)

    def make_bn(k, c):
        k1, k2, k3, k4 = jax.random.split(k, 4)
        gamma = 1.0 + 0.1 * jax.random.normal(k1, (c,), jnp.float32)
        beta = 0.1 * jax.random.normal(k2, (c,), jnp.float32)
        mean = 0.1 * jax.random.normal(k3, (c,), jnp.float32)
        var = 0.5 + jnp.abs(jax.random.normal(k4, (c,), jnp.float32))
        return gamma, beta, mean, var

    bn1 = make_bn(keys[4], width)
    bn2 = make_bn(keys[5], width)
    bn3 = make_bn(keys[6], cout)

    ref = reference_forward(x, w1, w2, w3, bn1, bn2, bn3, eps=eps)

    # f32-operand path (tight tolerance).
    out_f32 = bottleneck_forward(x, w1, w2, w3, bn1, bn2, bn3, eps=eps,
                                 compute_dtype=jnp.float32)
    out_f32 = jax.block_until_ready(out_f32)
    assert out_f32.shape == (N, H, W, cout)
    err = float(jnp.max(jnp.abs(out_f32 - ref)))
    assert err < 1e-3, f"f32 max err {err}"

    # Default path: bf16 operands, f32 accumulation (loose tolerance).
    out_bf = bottleneck_forward(x, w1, w2, w3, bn1, bn2, bn3, eps=eps)
    out_bf = jax.block_until_ready(out_bf).astype(jnp.float32)
    assert out_bf.shape == (N, H, W, cout)
    err_bf = float(jnp.max(jnp.abs(out_bf - ref)))
    assert err_bf < 0.5, f"bf16 max err {err_bf}"

    print("KERNEL_OK")
</pallas_src>

<mosaic_0001>
module attributes {stable_mosaic.version = 11 : i64} {
  func.func @_bottleneck_kernel(%arg0: i32, %arg1: memref<1x16x16x128xf32, #tpu.memory_space<vmem>>, %arg2: memref<128x128xf32, #tpu.memory_space<vmem>>, %arg3: memref<1x128xf32, #tpu.memory_space<vmem>>, %arg4: memref<9x128x128xf32, #tpu.memory_space<vmem>>, %arg5: memref<1x128xf32, #tpu.memory_space<vmem>>, %arg6: memref<128x128xf32, #tpu.memory_space<vmem>>, %arg7: memref<1x128xf32, #tpu.memory_space<vmem>>, %arg8: memref<1x16x16x128xf32, #tpu.memory_space<vmem>>, %arg9: memref<1x18x32x128xf32, #tpu.memory_space<vmem>>) attributes {dimension_semantics = [#tpu.dimension_semantics<parallel>], iteration_bounds = array<i64: 2>, scalar_prefetch = 0 : i64, scratch_operands = 1 : i64, tpu.core_type = #tpu.core_type<tc>, window_params = [{transform_indices = @transform_0, window_bounds = array<i64: 1, 16, 16, 128>}, {pipeline_mode = #tpu.pipeline_mode<synchronous>, transform_indices = @transform_1, window_bounds = array<i64: 128, 128>}, {pipeline_mode = #tpu.pipeline_mode<synchronous>, transform_indices = @transform_2, window_bounds = array<i64: 1, 128>}, {pipeline_mode = #tpu.pipeline_mode<synchronous>, transform_indices = @transform_3, window_bounds = array<i64: 9, 128, 128>}, {pipeline_mode = #tpu.pipeline_mode<synchronous>, transform_indices = @transform_4, window_bounds = array<i64: 1, 128>}, {pipeline_mode = #tpu.pipeline_mode<synchronous>, transform_indices = @transform_5, window_bounds = array<i64: 128, 128>}, {pipeline_mode = #tpu.pipeline_mode<synchronous>, transform_indices = @transform_6, window_bounds = array<i64: 1, 128>}, {transform_indices = @transform_7, window_bounds = array<i64: 1, 16, 16, 128>}]} {
    %c0 = arith.constant 0 : index
    %c0_0 = arith.constant 0 : index
    %c0_1 = arith.constant 0 : index
    %c0_2 = arith.constant 0 : index
    %0 = vector.load %arg1[%c0, %c0_0, %c0_1, %c0_2] : memref<1x16x16x128xf32, #tpu.memory_space<vmem>>, vector<1x16x16x128xf32>
    %1 = vector.shape_cast %0 : vector<1x16x16x128xf32> to vector<256x128xf32>
    %c0_3 = arith.constant 0 : index
    %c0_4 = arith.constant 0 : index
    %2 = vector.load %arg2[%c0_3, %c0_4] : memref<128x128xf32, #tpu.memory_space<vmem>>, vector<128x128xf32>
    %cst = arith.constant dense<0.000000e+00> : vector<256x128xf32>
    %3 = tpu.matmul %1, %2, %cst {dimension_numbers = #tpu.dot_dimension_numbers<[1], [0], [0], [1], [0, 0, 1, 1], [], []>} : vector<256x128xf32>, vector<128x128xf32>, vector<256x128xf32> -> vector<256x128xf32>
    %c0_5 = arith.constant 0 : index
    %c0_6 = arith.constant 0 : index
    %4 = vector.load %arg3[%c0_5, %c0_6] : memref<1x128xf32, #tpu.memory_space<vmem>>, vector<1x128xf32>
    %5 = vector.broadcast %4 : vector<1x128xf32> to vector<256x128xf32>
    %6 = arith.addf %3, %5 : vector<256x128xf32>
    %cst_7 = arith.constant 0.000000e+00 : f32
    %7 = vector.broadcast %cst_7 : f32 to vector<256x128xf32>
    %8 = arith.maximumf %6, %7 : vector<256x128xf32>
    %9 = vector.shape_cast %8 : vector<256x128xf32> to vector<1x16x16x128xf32>
    %c0_8 = arith.constant 0 : index
    %c1 = arith.constant 1 : index
    %c8 = arith.constant 8 : index
    %c0_9 = arith.constant 0 : index
    %10 = vector.load %arg9[%c0_8, %c1, %c8, %c0_9] : memref<1x18x32x128xf32, #tpu.memory_space<vmem>>, vector<1x16x16x128xf32>
    tpu.vector_store %arg9[%c0_8, %c1, %c8, %c0_9], %9 {strides = array<i32>} : memref<1x18x32x128xf32, #tpu.memory_space<vmem>>, vector<1x16x16x128xf32>,
    %cst_10 = arith.constant 0.000000e+00 : f32
    %11 = vector.broadcast %cst_10 : f32 to vector<1x1x32x128xf32>
    %c0_11 = arith.constant 0 : index
    %c0_12 = arith.constant 0 : index
    %c0_13 = arith.constant 0 : index
    %c0_14 = arith.constant 0 : index
    %12 = vector.load %arg9[%c0_11, %c0_12, %c0_13, %c0_14] : memref<1x18x32x128xf32, #tpu.memory_space<vmem>>, vector<1x1x32x128xf32>
    tpu.vector_store %arg9[%c0_11, %c0_12, %c0_13, %c0_14], %11 {strides = array<i32>} : memref<1x18x32x128xf32, #tpu.memory_space<vmem>>, vector<1x1x32x128xf32>,
    %c0_15 = arith.constant 0 : index
    %c17 = arith.constant 17 : index
    %c0_16 = arith.constant 0 : index
    %c0_17 = arith.constant 0 : index
    %13 = vector.load %arg9[%c0_15, %c17, %c0_16, %c0_17] : memref<1x18x32x128xf32, #tpu.memory_space<vmem>>, vector<1x1x32x128xf32>
    tpu.vector_store %arg9[%c0_15, %c17, %c0_16, %c0_17], %11 {strides = array<i32>} : memref<1x18x32x128xf32, #tpu.memory_space<vmem>>, vector<1x1x32x128xf32>,
    %cst_18 = arith.constant 0.000000e+00 : f32
    %14 = vector.broadcast %cst_18 : f32 to vector<1x16x8x128xf32>
    %c0_19 = arith.constant 0 : index
    %c1_20 = arith.constant 1 : index
    %c0_21 = arith.constant 0 : index
    %c0_22 = arith.constant 0 : index
    %15 = vector.load %arg9[%c0_19, %c1_20, %c0_21, %c0_22] : memref<1x18x32x128xf32, #tpu.memory_space<vmem>>, vector<1x16x8x128xf32>
    tpu.vector_store %arg9[%c0_19, %c1_20, %c0_21, %c0_22], %14 {strides = array<i32>} : memref<1x18x32x128xf32, #tpu.memory_space<vmem>>, vector<1x16x8x128xf32>,
    %cst_23 = arith.constant 0.000000e+00 : f32
    %16 = vector.broadcast %cst_23 : f32 to vector<1x16x8x128xf32>
    %c0_24 = arith.constant 0 : index
    %c1_25 = arith.constant 1 : index
    %c24 = arith.constant 24 : index
    %c0_26 = arith.constant 0 : index
    %17 = vector.load %arg9[%c0_24, %c1_25, %c24, %c0_26] : memref<1x18x32x128xf32, #tpu.memory_space<vmem>>, vector<1x16x8x128xf32>
    tpu.vector_store %arg9[%c0_24, %c1_25, %c24, %c0_26], %16 {strides = array<i32>} : memref<1x18x32x128xf32, #tpu.memory_space<vmem>>, vector<1x16x8x128xf32>,
    %c0_27 = arith.constant 0 : index
    %c0_28 = arith.constant 0 : index
    %c0_29 = arith.constant 0 : index
    %c0_30 = arith.constant 0 : index
    %18 = vector.load %arg9[%c0_27, %c0_28, %c0_29, %c0_30] : memref<1x18x32x128xf32, #tpu.memory_space<vmem>>, vector<1x16x32x128xf32>
    %19 = vector.shape_cast %18 : vector<1x16x32x128xf32> to vector<512x128xf32>
    %c0_31 = arith.constant 0 : index
    %c0_32 = arith.constant 0 : index
    %c0_33 = arith.constant 0 : index
    %20 = vector.load %arg4[%c0_31, %c0_32, %c0_33] : memref<9x128x128xf32, #tpu.memory_space<vmem>>, vector<1x128x128xf32>
    %21 = vector.shape_cast %20 : vector<1x128x128xf32> to vector<128x128xf32>
    %cst_34 = arith.constant dense<0.000000e+00> : vector<512x128xf32>
    %22 = tpu.matmul %19, %21, %cst_34 {dimension_numbers = #tpu.dot_dimension_numbers<[1], [0], [0], [1], [0, 0, 1, 1], [], []>} : vector<512x128xf32>, vector<128x128xf32>, vector<512x128xf32> -> vector<512x128xf32>
    %c1_35 = arith.constant 1 : index
    %c0_36 = arith.constant 0 : index
    %c0_37 = arith.constant 0 : index
    %23 = vector.load %arg4[%c1_35, %c0_36, %c0_37] : memref<9x128x128xf32, #tpu.memory_space<vmem>>, vector<1x128x128xf32>
    %24 = vector.shape_cast %23 : vector<1x128x128xf32> to vector<128x128xf32>
    %cst_38 = arith.constant dense<0.000000e+00> : vector<512x128xf32>
    %25 = tpu.matmul %19, %24, %cst_38 {dimension_numbers = #tpu.dot_dimension_numbers<[1], [0], [0], [1], [0, 0, 1, 1], [], []>} : vector<512x128xf32>, vector<128x128xf32>, vector<512x128xf32> -> vector<512x128xf32>
    %c2 = arith.constant 2 : index
    %c0_39 = arith.constant 0 : index
    %c0_40 = arith.constant 0 : index
    %26 = vector.load %arg4[%c2, %c0_39, %c0_40] : memref<9x128x128xf32, #tpu.memory_space<vmem>>, vector<1x128x128xf32>
    %27 = vector.shape_cast %26 : vector<1x128x128xf32> to vector<128x128xf32>
    %cst_41 = arith.constant dense<0.000000e+00> : vector<512x128xf32>
    %28 = tpu.matmul %19, %27, %cst_41 {dimension_numbers = #tpu.dot_dimension_numbers<[1], [0], [0], [1], [0, 0, 1, 1], [], []>} : vector<512x128xf32>, vector<128x128xf32>, vector<512x128xf32> -> vector<512x128xf32>
    %c1_i32 = arith.constant 1 : i32
    %c0_42 = arith.constant 0 : index
    %29 = arith.index_cast %c1_i32 : i32 to index
    %c0_43 = arith.constant 0 : index
    %c0_44 = arith.constant 0 : index
    %30 = vector.load %arg9[%c0_42, %29, %c0_43, %c0_44] : memref<1x18x32x128xf32, #tpu.memory_space<vmem>>, vector<1x16x32x128xf32>
    %31 = vector.shape_cast %30 : vector<1x16x32x128xf32> to vector<512x128xf32>
    %c3_i32 = arith.constant 3 : i32
    %32 = arith.muli %c3_i32, %c1_i32 : i32
    %c0_i32 = arith.constant 0 : i32
    %33 = arith.addi %32, %c0_i32 : i32
    %34 = arith.index_cast %33 : i32 to index
    %c0_45 = arith.constant 0 : index
    %c0_46 = arith.constant 0 : index
    %35 = vector.load %arg4[%34, %c0_45, %c0_46] : memref<9x128x128xf32, #tpu.memory_space<vmem>>, vector<1x128x128xf32>
    %36 = vector.shape_cast %35 : vector<1x128x128xf32> to vector<128x128xf32>
    %cst_47 = arith.constant dense<0.000000e+00> : vector<512x128xf32>
    %37 = tpu.matmul %31, %36, %cst_47 {dimension_numbers = #tpu.dot_dimension_numbers<[1], [0], [0], [1], [0, 0, 1, 1], [], []>} : vector<512x128xf32>, vector<128x128xf32>, vector<512x128xf32> -> vector<512x128xf32>
    %38 = arith.addf %22, %37 : vector<512x128xf32>
    %c3_i32_48 = arith.constant 3 : i32
    %39 = arith.muli %c3_i32_48, %c1_i32 : i32
    %c1_i32_49 = arith.constant 1 : i32
    %40 = arith.addi %39, %c1_i32_49 : i32
    %41 = arith.index_cast %40 : i32 to index
    %c0_50 = arith.constant 0 : index
    %c0_51 = arith.constant 0 : index
    %42 = vector.load %arg4[%41, %c0_50, %c0_51] : memref<9x128x128xf32, #tpu.memory_space<vmem>>, vector<1x128x128xf32>
    %43 = vector.shape_cast %42 : vector<1x128x128xf32> to vector<128x128xf32>
    %cst_52 = arith.constant dense<0.000000e+00> : vector<512x128xf32>
    %44 = tpu.matmul %31, %43, %cst_52 {dimension_numbers = #tpu.dot_dimension_numbers<[1], [0], [0], [1], [0, 0, 1, 1], [], []>} : vector<512x128xf32>, vector<128x128xf32>, vector<512x128xf32> -> vector<512x128xf32>
    %45 = arith.addf %25, %44 : vector<512x128xf32>
    %c3_i32_53 = arith.constant 3 : i32
    %46 = arith.muli %c3_i32_53, %c1_i32 : i32
    %c2_i32 = arith.constant 2 : i32
    %47 = arith.addi %46, %c2_i32 : i32
    %48 = arith.index_cast %47 : i32 to index
    %c0_54 = arith.constant 0 : index
    %c0_55 = arith.constant 0 : index
    %49 = vector.load %arg4[%48, %c0_54, %c0_55] : memref<9x128x128xf32, #tpu.memory_space<vmem>>, vector<1x128x128xf32>
    %50 = vector.shape_cast %49 : vector<1x128x128xf32> to vector<128x128xf32>
    %cst_56 = arith.constant dense<0.000000e+00> : vector<512x128xf32>
    %51 = tpu.matmul %31, %50, %cst_56 {dimension_numbers = #tpu.dot_dimension_numbers<[1], [0], [0], [1], [0, 0, 1, 1], [], []>} : vector<512x128xf32>, vector<128x128xf32>, vector<512x128xf32> -> vector<512x128xf32>
    %52 = arith.addf %28, %51 : vector<512x128xf32>
    %c2_i32_57 = arith.constant 2 : i32
    %c0_58 = arith.constant 0 : index
    %53 = arith.index_cast %c2_i32_57 : i32 to index
    %c0_59 = arith.constant 0 : index
    %c0_60 = arith.constant 0 : index
    %54 = vector.load %arg9[%c0_58, %53, %c0_59, %c0_60] : memref<1x18x32x128xf32, #tpu.memory_space<vmem>>, vector<1x16x32x128xf32>
    %55 = vector.shape_cast %54 : vector<1x16x32x128xf32> to vector<512x128xf32>
    %c3_i32_61 = arith.constant 3 : i32
    %56 = arith.muli %c3_i32_61, %c2_i32_57 : i32
    %c0_i32_62 = arith.constant 0 : i32
    %57 = arith.addi %56, %c0_i32_62 : i32
    %58 = arith.index_cast %57 : i32 to index
    %c0_63 = arith.constant 0 : index
    %c0_64 = arith.constant 0 : index
    %59 = vector.load %arg4[%58, %c0_63, %c0_64] : memref<9x128x128xf32, #tpu.memory_space<vmem>>, vector<1x128x128xf32>
    %60 = vector.shape_cast %59 : vector<1x128x128xf32> to vector<128x128xf32>
    %cst_65 = arith.constant dense<0.000000e+00> : vector<512x128xf32>
    %61 = tpu.matmul %55, %60, %cst_65 {dimension_numbers = #tpu.dot_dimension_numbers<[1], [0], [0], [1], [0, 0, 1, 1], [], []>} : vector<512x128xf32>, vector<128x128xf32>, vector<512x128xf32> -> vector<512x128xf32>
    %62 = arith.addf %38, %61 : vector<512x128xf32>
    %c3_i32_66 = arith.constant 3 : i32
    %63 = arith.muli %c3_i32_66, %c2_i32_57 : i32
    %c1_i32_67 = arith.constant 1 : i32
    %64 = arith.addi %63, %c1_i32_67 : i32
    %65 = arith.index_cast %64 : i32 to index
    %c0_68 = arith.constant 0 : index
    %c0_69 = arith.constant 0 : index
    %66 = vector.load %arg4[%65, %c0_68, %c0_69] : memref<9x128x128xf32, #tpu.memory_space<vmem>>, vector<1x128x128xf32>
    %67 = vector.shape_cast %66 : vector<1x128x128xf32> to vector<128x128xf32>
    %cst_70 = arith.constant dense<0.000000e+00> : vector<512x128xf32>
    %68 = tpu.matmul %55, %67, %cst_70 {dimension_numbers = #tpu.dot_dimension_numbers<[1], [0], [0], [1], [0, 0, 1, 1], [], []>} : vector<512x128xf32>, vector<128x128xf32>, vector<512x128xf32> -> vector<512x128xf32>
    %69 = arith.addf %45, %68 : vector<512x128xf32>
    %c3_i32_71 = arith.constant 3 : i32
    %70 = arith.muli %c3_i32_71, %c2_i32_57 : i32
    %c2_i32_72 = arith.constant 2 : i32
    %71 = arith.addi %70, %c2_i32_72 : i32
    %72 = arith.index_cast %71 : i32 to index
    %c0_73 = arith.constant 0 : index
    %c0_74 = arith.constant 0 : index
    %73 = vector.load %arg4[%72, %c0_73, %c0_74] : memref<9x128x128xf32, #tpu.memory_space<vmem>>, vector<1x128x128xf32>
    %74 = vector.shape_cast %73 : vector<1x128x128xf32> to vector<128x128xf32>
    %cst_75 = arith.constant dense<0.000000e+00> : vector<512x128xf32>
    %75 = tpu.matmul %55, %74, %cst_75 {dimension_numbers = #tpu.dot_dimension_numbers<[1], [0], [0], [1], [0, 0, 1, 1], [], []>} : vector<512x128xf32>, vector<128x128xf32>, vector<512x128xf32> -> vector<512x128xf32>
    %76 = arith.addf %52, %75 : vector<512x128xf32>
    %c2_i32_76 = arith.constant 2 : i32
    %77 = vector.shape_cast %62 : vector<512x128xf32> to vector<1x16x32x128xf32>
    %78 = vector.extract_strided_slice %77 {offsets = [0, 0, 7, 0], sizes = [1, 16, 16, 128], strides = [1, 1, 1, 1]} : vector<1x16x32x128xf32> to vector<1x16x16x128xf32>
    %79 = vector.shape_cast %69 : vector<512x128xf32> to vector<1x16x32x128xf32>
    %80 = vector.extract_strided_slice %79 {offsets = [0, 0, 8, 0], sizes = [1, 16, 16, 128], strides = [1, 1, 1, 1]} : vector<1x16x32x128xf32> to vector<1x16x16x128xf32>
    %81 = arith.addf %78, %80 : vector<1x16x16x128xf32>
    %82 = vector.shape_cast %76 : vector<512x128xf32> to vector<1x16x32x128xf32>
    %83 = vector.extract_strided_slice %82 {offsets = [0, 0, 9, 0], sizes = [1, 16, 16, 128], strides = [1, 1, 1, 1]} : vector<1x16x32x128xf32> to vector<1x16x16x128xf32>
    %84 = arith.addf %81, %83 : vector<1x16x16x128xf32>
    %c0_77 = arith.constant 0 : index
    %c0_78 = arith.constant 0 : index
    %85 = vector.load %arg5[%c0_77, %c0_78] : memref<1x128xf32, #tpu.memory_space<vmem>>, vector<1x128xf32>
    %86 = vector.shape_cast %85 : vector<1x128xf32> to vector<1x1x1x128xf32>
    %87 = vector.broadcast %86 : vector<1x1x1x128xf32> to vector<1x16x16x128xf32>
    %88 = arith.addf %84, %87 : vector<1x16x16x128xf32>
    %cst_79 = arith.constant 0.000000e+00 : f32
    %89 = vector.broadcast %cst_79 : f32 to vector<1x16x16x128xf32>
    %90 = arith.maximumf %88, %89 : vector<1x16x16x128xf32>
    %91 = vector.shape_cast %90 : vector<1x16x16x128xf32> to vector<256x128xf32>
    %c0_80 = arith.constant 0 : index
    %c0_81 = arith.constant 0 : index
    %92 = vector.load %arg6[%c0_80, %c0_81] : memref<128x128xf32, #tpu.memory_space<vmem>>, vector<128x128xf32>
    %cst_82 = arith.constant dense<0.000000e+00> : vector<256x128xf32>
    %93 = tpu.matmul %91, %92, %cst_82 {dimension_numbers = #tpu.dot_dimension_numbers<[1], [0], [0], [1], [0, 0, 1, 1], [], []>} : vector<256x128xf32>, vector<128x128xf32>, vector<256x128xf32> -> vector<256x128xf32>
    %c0_83 = arith.constant 0 : index
    %c0_84 = arith.constant 0 : index
    %c0_85 = arith.constant 0 : index
    %c0_86 = arith.constant 0 : index
    %94 = vector.load %arg1[%c0_83, %c0_84, %c0_85, %c0_86] : memref<1x16x16x128xf32, #tpu.memory_space<vmem>>, vector<1x16x16x128xf32>
    %95 = vector.shape_cast %94 : vector<1x16x16x128xf32> to vector<256x128xf32>
    %c0_87 = arith.constant 0 : index
    %c0_88 = arith.constant 0 : index
    %96 = vector.load %arg7[%c0_87, %c0_88] : memref<1x128xf32, #tpu.memory_space<vmem>>, vector<1x128xf32>
    %97 = vector.broadcast %96 : vector<1x128xf32> to vector<256x128xf32>
    %98 = arith.addf %93, %97 : vector<256x128xf32>
    %99 = arith.addf %98, %95 : vector<256x128xf32>
    %cst_89 = arith.constant 0.000000e+00 : f32
    %100 = vector.broadcast %cst_89 : f32 to vector<256x128xf32>
    %101 = arith.maximumf %99, %100 : vector<256x128xf32>
    %102 = vector.shape_cast %101 : vector<256x128xf32> to vector<1x16x16x128xf32>
    %c0_90 = arith.constant 0 : index
    %c0_91 = arith.constant 0 : index
    %c0_92 = arith.constant 0 : index
    %c0_93 = arith.constant 0 : index
    %103 = vector.load %arg8[%c0_90, %c0_91, %c0_92, %c0_93] : memref<1x16x16x128xf32, #tpu.memory_space<vmem>>, vector<1x16x16x128xf32>
    tpu.vector_store %arg8[%c0_90, %c0_91, %c0_92, %c0_93], %102 {strides = array<i32>} : memref<1x16x16x128xf32, #tpu.memory_space<vmem>>, vector<1x16x16x128xf32>,
    return
  }
  func.func @transform_0(%arg0: i32) -> (i32, i32, i32, i32) {
    %c0_i32 = arith.constant 0 : i32
    %c0_i32_0 = arith.constant 0 : i32
    %c0_i32_1 = arith.constant 0 : i32
    %c0_i32_2 = arith.constant 0 : i32
    return %arg0, %c0_i32, %c0_i32_0, %c0_i32_1 : i32, i32, i32, i32
  }
  func.func @transform_1(%arg0: i32) -> (i32, i32) {
    %c0_i32 = arith.constant 0 : i32
    %c0_i32_0 = arith.constant 0 : i32
    %c0_i32_1 = arith.constant 0 : i32
    return %c0_i32, %c0_i32_0 : i32, i32
  }
  func.func @transform_2(%arg0: i32) -> (i32, i32) {
    %c0_i32 = arith.constant 0 : i32
    %c0_i32_0 = arith.constant 0 : i32
    %c0_i32_1 = arith.constant 0 : i32
    return %c0_i32, %c0_i32_0 : i32, i32
  }
  func.func @transform_3(%arg0: i32) -> (i32, i32, i32) {
    %c0_i32 = arith.constant 0 : i32
    %c0_i32_0 = arith.constant 0 : i32
    %c0_i32_1 = arith.constant 0 : i32
    %c0_i32_2 = arith.constant 0 : i32
    return %c0_i32, %c0_i32_0, %c0_i32_1 : i32, i32, i32
  }
  func.func @transform_4(%arg0: i32) -> (i32, i32) {
    %c0_i32 = arith.constant 0 : i32
    %c0_i32_0 = arith.constant 0 : i32
    %c0_i32_1 = arith.constant 0 : i32
    return %c0_i32, %c0_i32_0 : i32, i32
  }
  func.func @transform_5(%arg0: i32) -> (i32, i32) {
    %c0_i32 = arith.constant 0 : i32
    %c0_i32_0 = arith.constant 0 : i32
    %c0_i32_1 = arith.constant 0 : i32
    return %c0_i32, %c0_i32_0 : i32, i32
  }
  func.func @transform_6(%arg0: i32) -> (i32, i32) {
    %c0_i32 = arith.constant 0 : i32
    %c0_i32_0 = arith.constant 0 : i32
    %c0_i32_1 = arith.constant 0 : i32
    return %c0_i32, %c0_i32_0 : i32, i32
  }
  func.func @transform_7(%arg0: i32) -> (i32, i32, i32, i32) {
    %c0_i32 = arith.constant 0 : i32
    %c0_i32_0 = arith.constant 0 : i32
    %c0_i32_1 = arith.constant 0 : i32
    %c0_i32_2 = arith.constant 0 : i32
    return %arg0, %c0_i32, %c0_i32_0, %c0_i32_1 : i32, i32, i32, i32
  }
}

</mosaic_0001>

<bundles_post_ra>
// kernel: tpu_custom_call.1
= control target key start
LH: loop header
LB: loop body
LE: loop exit
PB: predicated region body
PF: predicated region fallthrough
CT: control target
= control target key end

     0   :  { %12 = vsyncpa [#allocation4], 0  ;;  %s10369_s0 = inlined_call_operand.hbm [shape: f32[2,16,16,128], index: 0, kind: input, shape index: {}]   ;;  %s10370_s1 = inlined_call_operand.hbm [shape: f32[128,128], index: 1, kind: input, shape index: {}]   ;;  %s10371_s2 = inlined_call_operand.vmem [shape: f32[1,128], index: 2, kind: input, shape index: {}]   ;;  %s10372_s3 = inlined_call_operand.hbm [shape: f32[9,128,128], index: 3, kind: input, shape index: {}]   ;;  %s10373_s4 = inlined_call_operand.vmem [shape: f32[1,128], index: 4, kind: input, shape index: {}]   ;;  %s10374_s5 = inlined_call_operand.hbm [shape: f32[128,128], index: 5, kind: input, shape index: {}]   ;;  %s10375_s6 = inlined_call_operand.vmem [shape: f32[1,128], index: 6, kind: input, shape index: {}]   ;;  %s10376_s7 = inlined_call_operand.hbm [shape: f32[2,16,16,128], index: 7, kind: output, shape index: {}]  }
   0x1   :  { %14 = vsyncpa [#allocation4 + $0x1], 0 }
   0x2   :  { %15 = vsyncpa [#allocation7], 0 }
   0x3   :  { %16 = vsyncpa [#allocation10], 0 }
   0x4   :  { %17 = vsyncpa [#allocation5], 0 }
   0x5   :  { %19 = vsyncpa [#allocation5 + $0x1], 0  ;;  %s8778_s24 = smov 0   ;;  %s8780_s25 = smov 0  }
   0x6   :  { %s8782_s26 = smov 0   ;;  %s8784_s27 = smov 0  }
   0x7 LB: > { %s8799_s28 = sadd.s32 4294967295, %s8726_s27   ;;  %s5631_s29 = sadd.s32 4294967294, %s8726_s27   ;;  %s8726_s27 = sphi %s8784_s27, %s10456_s27   ;;  %s8722_s26 = sphi %s8782_s26, %s10455_s26   ;;  %s8718_s25 = sphi %s8780_s25, %s10454_s25   ;;  %s8714_s24 = sphi %s8778_s24, %s10453_s24  }
   0x8   : > { %p45_p0 = scmp.ne.s32.totalorder %s8718_s25, %s8714_s24  ;;  %p10377_p1 = scmp.eq.s32.totalorder %s8799_s28, 0 }
   0x9   : > { %p201_p3 = scmp.eq.s32.totalorder %s5631_s29, 1  ;;  %p5632_p5 = scmp.ge.s32.totalorder %s8726_s27, 1 }
   0xa   : > { %p8808_p4 = por %p10377_p1, %p45_p0  ;;  %p208_p7 = scmp.lt.s32.totalorder %s8726_s27, 3 }
   0xb   : > { %p8813_p6 = por %p201_p3, %p45_p0  ;;  %s8728_s10 = smov [#allocation6]  }
   0xc   : > { %s10381_s30 = scalar_select %p8808_p4, 1, 0 }
   0xd   : > { %s10382_s8 = scalar_select %p8813_p6, 1, 0 }
   0xe   : > { %p8818_p8 = pnand %p5632_p5, %p208_p7  ;;  %s220_s11 = sshll.u32 %s8728_s10, 4  ;;  %s8822_s11 = int_to_ptr.vmem [resolvable:$true] %s220_s11 }
   0xf   : > { %10383 = sst [smem:[#allocation16_spill]] %s10382_s8  ;;  %s8729_s13 = smov [#allocation8]  }
  0x10   : > { %s10384_s9 = scalar_select %p8818_p8, 1, 0 }
  0x11   : > { %p8472_p9 = pneg %p8818_p8  ;;  %s236_s14 = sshll.u32 %s8729_s13, 4  ;;  %s8833_s14 = int_to_ptr.vmem [resolvable:$true] %s236_s14 }
  0x12   : > { %s8730_s15 = smov [#allocation9]   ;;  %s8538_s19 = scalar_lea.hbm %s10370_s1, 2048 }
  0x13   : > { %p8829_p11 = pnand %p8472_p9, %p10377_p1  ;;  %s8835_s16 = sshll.u32 %s8730_s15, 4  ;;  %s253_s16 = int_to_ptr.vmem [resolvable:$true] %s8835_s16 }
  0x14   : > { %p8539_p12 = scmp.ne.s32.totalorder %s10370_s1, %s8538_s19  ;;  %p8545_p5 = scmp.lt.u32.totalorder %s8538_s19, %s10370_s1 }
  0x15   : > { %p8845_p13 = pneg %p8829_p11 }
  0x17   : > { %p8541_p0 = pnand %p8845_p13, %p8539_p12 }
  0x19   : > { %p8542_p3 = pneg %p8541_p0 }
  0x1b   : > { %p8547_p7 = pnand %p8545_p5, %p8542_p3 }
  0x1d   : > { %8550 = shalt.err (!%p8547_p7)
}
  0x1e   : > { %s8551_s10 = scalar_lea.vmem %s8822_s11, 2048  ;;  %p8559_p2 = scmp.lt.s32.totalorder %s8822_s11, %s8822_s11 }
  0x1f   : > { %p8552_p9 = scmp.ne.s32.totalorder %s8822_s11, %s8551_s10  ;;  %p8560_p6 = scmp.lt.s32.totalorder %s8551_s10, %s8551_s10 }
  0x21   : > { %p8554_p10 = pnand %p8552_p9, %p8845_p13  ;;  %p8561_p12 = por %p8560_p6, %p8559_p2 }
  0x23   : > { %p8555_p1 = pneg %p8554_p10 }
  0x25   : > { %p8562_p0 = pnand %p8561_p12, %p8555_p1 }
  0x27   : > { %8565 = shalt.err (!%p8562_p0)
}
  0x28   : > { %s8731_s13 = smov 128   ;;  %s8732_s15 = smov 8  }
  0x29   : > { %8475 = dma.hbm_to_vmem [thread:$0]  (!%p8829_p11), %s10370_s1, 2048, %s8822_s11, [#allocation7], %s8731_s13, %s8731_s13, %s8732_s15  }
  0x2a   : > { %s8566_s21 = scalar_lea.hbm %s10372_s3, 18432 }
  0x2b   : > { %p8567_p1 = scmp.ne.s32.totalorder %s10372_s3, %s8566_s21  ;;  %p8573_p10 = scmp.lt.u32.totalorder %s8566_s21, %s10372_s3 }
  0x2d   : > { %p8569_p2 = pnand %p8567_p1, %p8845_p13 }
  0x2f   : > { %p8570_p6 = pneg %p8569_p2 }
  0x31   : > { %p8575_p3 = pnand %p8573_p10, %p8570_p6 }
  0x33   : > { %8578 = shalt.err (!%p8575_p3)
}
  0x34   : > { %s8579_s11 = scalar_lea.vmem %s8833_s14, 18432  ;;  %p8587_p12 = scmp.lt.s32.totalorder %s8833_s14, %s8833_s14 }
  0x35   : > { %p8580_p5 = scmp.ne.s32.totalorder %s8833_s14, %s8579_s11  ;;  %p8588_p0 = scmp.lt.s32.totalorder %s8579_s11, %s8579_s11 }
  0x37   : > { %p8582_p7 = pnand %p8580_p5, %p8845_p13  ;;  %p8589_p1 = por %p8588_p0, %p8587_p12 }
  0x39   : > { %p8583_p9 = pneg %p8582_p7 }
  0x3b   : > { %p8590_p2 = pnand %p8589_p1, %p8583_p9 }
  0x3d   : > { %8593 = shalt.err (!%p8590_p2)
}
  0x3e   : > { %8478 = dma.hbm_to_vmem [thread:$0]  (!%p8829_p11), %s10372_s3, 18432, %s8833_s14, [#allocation7], %s8731_s13, %s8731_s13, %s8732_s15  }
  0x3f   : > { %s8594_s20 = scalar_lea.hbm %s10374_s5, 2048 }
  0x40   : > { %p8595_p6 = scmp.ne.s32.totalorder %s10374_s5, %s8594_s20  ;;  %p8601_p5 = scmp.lt.u32.totalorder %s8594_s20, %s10374_s5 }
  0x42   : > { %p8597_p10 = pnand %p8595_p6, %p8845_p13 }
  0x44   : > { %p8598_p3 = pneg %p8597_p10 }
  0x46   : > { %p8603_p7 = pnand %p8601_p5, %p8598_p3 }
  0x48   : > { %8606 = shalt.err (!%p8603_p7)
}
  0x49   : > { %s8607_s11 = scalar_lea.vmem %s253_s16, 2048  ;;  %p8615_p1 = scmp.lt.s32.totalorder %s253_s16, %s253_s16 }
  0x4a   : > { %p8608_p9 = scmp.ne.s32.totalorder %s253_s16, %s8607_s11  ;;  %p8616_p2 = scmp.lt.s32.totalorder %s8607_s11, %s8607_s11 }
  0x4c   : > { %p8610_p12 = pnand %p8608_p9, %p8845_p13  ;;  %p8617_p4 = por %p8616_p2, %p8615_p1 }
  0x4e   : > { %p8611_p0 = pneg %p8610_p12 }
  0x50   : > { %p8618_p8 = pnand %p8617_p4, %p8611_p0 }
  0x52   : > { %8621 = shalt.err (!%p8618_p8)
}
  0x53   : > { %8481 = dma.hbm_to_vmem [thread:$0]  (!%p8829_p11), %s10374_s5, 2048, %s253_s16, [#allocation10], %s8731_s13, %s8731_s13, %s8732_s15  }
  0x54   : > { %s8918_s22 = sadd.s32 1, %s8726_s27   ;;  %s32_s17 = sadd.s32 1, %s8722_s26 }
  0x55   : > { %s29_s12 = ssub.s32 %s8726_s27, %s8918_s22  ;;  %p39_p8 = scmp.ne.s32.totalorder %s8722_s26, %s8718_s25 }
  0x56   : > { %p30_p4 = scmp.eq.s32.totalorder %s29_s12, 0  ;;  %p40_p13 = scmp.eq.s32.totalorder %s8726_s27, 0 }
  0x57   : > { %p8493_p6 = scmp.lt.s32.totalorder %s8726_s27, 2  ;;  %p10387_p3 = scmp.eq.s32.totalorder %s8799_s28, 1 }
  0x58   : > { %s8928_s18 = scalar_select %p30_p4, %s8722_s26, %s32_s17  }
  0x59   : > { %p41_p10 = por %p40_p13, %p39_p8  ;;  %p8932_p5 = por %p10387_p3, %p39_p8 }
  0x5a   : > { %s269_s20 = sand.u32 1, %s8722_s26   ;;  %s5654_s21 = sshll.u32 %s8726_s27, 12 }
  0x5b   : > { %s5637_s16 = sshll.u32 %s269_s20, 8  ;;  %s8941_s10 = scalar_lea.hbm %s10369_s0, %s5654_s21 }
  0x5c   : > { %s273_s11 = scalar_lea.vmem [#allocation3], %s5637_s16  ;;  %p8943_p11 = pnand %p8493_p6, %p41_p10 }
  0x5d   : > { %s280_s14 = sshll.u32 %s273_s11, 4  ;;  %s8949_s12 = scalar_lea.sflag [#allocation4], %s269_s20  ;;  %s8947_s14 = int_to_ptr.vmem [resolvable:$true] %s280_s14 }
  0x5e   : > { %s8622_s17 = scalar_lea.hbm %s8941_s10, 4096  ;;  %p8624_p9 = pneg %p8943_p11 }
  0x5f   : > { %p8623_p7 = scmp.ne.s32.totalorder %s8941_s10, %s8622_s17  ;;  %s8627_s23 = scalar_lea.hbm %s10369_s0, 8192 }
  0x60   : > { %p8628_p1 = scmp.lt.u32.totalorder %s8941_s10, %s10369_s0  ;;  %p8629_p2 = scmp.lt.u32.totalorder %s8627_s23, %s8622_s17 }
  0x61   : > { %p8625_p12 = pnand %p8624_p9, %p8623_p7  ;;  %p8631_p8 = scmp.lt.u32.totalorder %s8622_s17, %s8941_s10 }
  0x62   : > { %p8630_p4 = por %p8629_p2, %p8628_p1 }
  0x63   : > { %p8626_p0 = pneg %p8625_p12 }
  0x64   : > { %p8632_p13 = por %p8631_p8, %p8630_p4 }
  0x66   : > { %p8633_p6 = pnand %p8632_p13, %p8626_p0 }
  0x68   : > { %8636 = shalt.err (!%p8633_p6)
}
  0x69   : > { %s8637_s20 = scalar_lea.vmem %s8947_s14, 4096  ;;  %s8733_s21 = smov [#allocation3]  }
  0x6a   : > { %p8638_p10 = scmp.ne.s32.totalorder %s8947_s14, %s8637_s20  ;;  %s8642_s16 = sshll.u32 %s8733_s21, 4  ;;  %s8643_s16 = int_to_ptr.vmem [resolvable:$false] %s8642_s16 }
  0x6b   : > { %s8644_s29 = scalar_lea.vmem %s8643_s16, 8192  ;;  %p8645_p12 = scmp.lt.s32.totalorder %s8947_s14, %s8643_s16 }
  0x6c   : > { %p8640_p3 = pnand %p8638_p10, %p8624_p9  ;;  %p8646_p1 = scmp.lt.s32.totalorder %s8644_s29, %s8637_s20 }
  0x6e   : > { %p8641_p7 = pneg %p8640_p3  ;;  %p8647_p2 = por %p8646_p1, %p8645_p12 }
  0x70   : > { %p8648_p4 = pnand %p8647_p2, %p8641_p7 }
  0x72   : > { %8651 = shalt.err (!%p8648_p4)
}
  0x73   : > { %8485 = dma.hbm_to_vmem [thread:$0]  (!%p8943_p11), %s8941_s10, 4096, %s8947_s14, %s8949_s12, %s8731_s13, %s8731_s13, %s8732_s15  }
  0x74   : > { %p10390_p9 = scmp.ne.s32.totalorder %s10384_s9, 0 }
  0x76   : > { %292 = sbr.rel (%p10390_p9) target bundleno = 1476 (0x5c4), region = 48 }
  0x7d   : > { %s8983_s17 = sand.u32 1, %s8718_s25   ;;  %p10391_p0 = scmp.ne.s32.totalorder %s10381_s30, 0 }
  0x7e   : > { %s5641_s23 = sshll.u32 %s8983_s17, 8  ;;  %s295_s11 = scalar_lea.sflag [#allocation4], %s8983_s17 }
  0x7f   : > { %s8989_s8 = scalar_lea.vmem [#allocation3], %s5641_s23 }
  0x80   : > { %8697 = dma.done.wait (%p10391_p0), %s295_s11, 4096  }
  0x81   : > { %8699 = vsyncadd (%p10391_p0), %s295_s11, 4294963200  ;;  %p10392_p11 = scmp.eq.s32.totalorder %s8799_s28, 0 }
  0x83   : > { %8701 = dma.done.wait (%p10392_p11), [#allocation7], 20480   ;;  %p10393_p8 = pmov %p10392_p11 }
  0x85   : > { %8703 = vsyncadd (%p10393_p8), [#allocation7], 4294946816  ;;  %p10394_p13 = pmov %p10393_p8 }
  0x86   : > { %p10395_p6 = pmov %p10393_p8 }
  0x87   : > { %8705 = dma.done.wait (%p10394_p13), [#allocation10], 2048  }
  0x88   : > { %8707 = vsyncadd (%p10395_p6), [#allocation10], 4294965248  ;;  %v8734_v0 = vmov 0.0   ;;  %v373_v1 = vld [vmem:[#allocation6] sm:$0xff]  ;;  %v374_v2 = vld [vmem:[#allocation6 + $0x8] sm:$0xff]  ;;  %vm4505_vm0 = vcmask 1046528  }
  0x89   : > { %6712 = vmatprep.mubr.f32.mxu1 %v8734_v0  ;;  %v375_v3 = vld [vmem:[#allocation6 + $0x10] sm:$0xff]  ;;  %v7784_v4 = vpack.c.bf16 %v374_v2, %v373_v1  ;;  %v376_v5 = vld [vmem:[#allocation6 + $0x18] sm:$0xff]  ;;  %v377_v7 = vld [vmem:[#allocation6 + $0x20] sm:$0xff]  ;;  %vm4698_vm1 = vcmask 1045504   ;;  %vm5026_vm2 = vcmask 1040384   ;;  %s10224_s12 = scalar_lea.vmem [#allocation11], %s5641_s23 }
  0x8a   : > { %v7788_v6 = vpack.c.bf16 %v376_v5, %v375_v3  ;;  %v378_v8 = vld [vmem:[#allocation6 + $0x28] sm:$0xff]  ;;  %v341_v10 = vld [vmem:[%s8989_s8] sm:$0xff]  ;;  %v379_v11 = vld [vmem:[#allocation6 + $0x30] sm:$0xff]  ;;  %s5655_s20 = sshll.u32 %s8799_s28, 12  ;;  %s5529_s21 = sshll.u32 %s10224_s12, 4  ;;  %s10323_s21 = int_to_ptr.vmem [resolvable:$true] %s5529_s21 }
  0x8b   : > { %7785 = vmatprep.subr.bf16.mxu0 %v7784_v4  ;;  %v7792_v9 = vpack.c.bf16 %v378_v8, %v377_v7  ;;  %v380_v12 = vld [vmem:[#allocation6 + $0x38] sm:$0xff]  ;;  %6504 = vmatprep.mubr.f32.mxu0 %v341_v10  ;;  %v381_v14 = vld [vmem:[#allocation6 + $0x40] sm:$0xff]  ;;  %v382_v15 = vld [vmem:[#allocation6 + $0x48] sm:$0xff]  ;;  %s10321_s23 = scalar_lea.hbm %s10376_s7, %s5655_s20  ;;  %s5516_s11 = scalar_lea.sflag [#allocation5], %s8983_s17 }
  0x8c   : > { %7787 = vmatpush3.bf16.msra.mxu0 %v7784_v4  ;;  %v7796_v13 = vpack.c.bf16 %v380_v12, %v379_v11  ;;  %v7800_v16 = vpack.c.bf16 %v382_v15, %v381_v14  ;;  %v383_v17 = vld [vmem:[#allocation6 + $0x50] sm:$0xff]  ;;  %v384_v18 = vld [vmem:[#allocation6 + $0x58] sm:$0xff]  ;;  %v791_v19 = vld [vmem:[#allocation8] sm:$0xff]  ;;  %s8735_s28 = smov [#allocation11]  }
  0x8d   : > { %7789 = vmatprep.subr.bf16.mxu0 %v7788_v6  ;;  %v792_v20 = vld [vmem:[#allocation8 + $0x8] sm:$0xff]  ;;  %v793_v21 = vld [vmem:[#allocation8 + $0x10] sm:$0xff]  ;;  %v7804_v22 = vpack.c.bf16 %v384_v18, %v383_v17  ;;  %v385_v23 = vld [vmem:[#allocation6 + $0x60] sm:$0xff]  ;;  %s8656_s30 = sshll.u32 %s8735_s28, 4  ;;  %s8657_s30 = int_to_ptr.vmem [resolvable:$false] %s8656_s30 }
  0x8e   : > { %v7848_v24 = vpack.c.bf16 %v792_v20, %v791_v19  ;;  %v794_v25 = vld [vmem:[#allocation8 + $0x18] sm:$0xff]  ;;  %v386_v26 = vld [vmem:[#allocation6 + $0x68] sm:$0xff]  ;;  %v795_v28 = vld [vmem:[#allocation8 + $0x20] sm:$0xff]  ;;  %s8658_s9 = scalar_lea.vmem %s8657_s30, 8192  ;;  %p8659_p12 = scmp.lt.s32.totalorder %s10323_s21, %s8657_s30 }
  0x8f   : > { %v7852_v27 = vpack.c.bf16 %v794_v25, %v793_v21  ;;  %v796_v29 = vld [vmem:[#allocation8 + $0x28] sm:$0xff]  ;;  %v7808_v30 = vpack.c.bf16 %v386_v26, %v385_v23  ;;  %v387_v31 = vld [vmem:[#allocation6 + $0x70] sm:$0xff]  ;;  %v388_v33 = vld [vmem:[#allocation6 + $0x78] sm:$0xff] }
  0x90   : > { %7791 = vmatpush3.bf16.msra.mxu0 %v7788_v6  ;;  %7849 = vmatprep.subr.bf16.mxu1 %v7848_v24  ;;  %v7856_v32 = vpack.c.bf16 %v796_v29, %v795_v28  ;;  %v797_v34 = vld [vmem:[#allocation8 + $0x30] sm:$0xff]  ;;  %v798_v35 = vld [vmem:[#allocation8 + $0x38] sm:$0xff]  ;;  %v7812_v36 = vpack.c.bf16 %v388_v33, %v387_v31  ;;  %v906_v37 = vld [vmem:[#allocation8 + $0x180] sm:$0xff] }
  0x91   : > { %7793 = vmatprep.subr.bf16.mxu0 %v7792_v9  ;;  %7851 = vmatpush3.bf16.msra.mxu1 %v7848_v24  ;;  %v7860_v38 = vpack.c.bf16 %v798_v35, %v797_v34  ;;  %v907_v39 = vld [vmem:[#allocation8 + $0x188] sm:$0xff]  ;;  %v799_v40 = vld [vmem:[#allocation8 + $0x40] sm:$0xff]  ;;  %v908_v44 = vld [vmem:[#allocation8 + $0x190] sm:$0xff] }
  0x92   : > { %7853 = vmatprep.subr.bf16.mxu1 %v7852_v27  ;;  %v800_v41 = vld [vmem:[#allocation8 + $0x48] sm:$0xff]  ;;  %v7816_v42 = vpack.c.bf16 %v907_v39, %v906_v37  ;;  %v909_v45 = vld [vmem:[#allocation8 + $0x198] sm:$0xff]  ;;  %v801_v46 = vld [vmem:[#allocation8 + $0x50] sm:$0xff] }
  0x93   : > { %v7864_v43 = vpack.c.bf16 %v800_v41, %v799_v40  ;;  %v802_v47 = vld [vmem:[#allocation8 + $0x58] sm:$0xff]  ;;  %v342_v48 = vld [vmem:[%s8989_s8 + $0x8] sm:$0xff]  ;;  %v343_v49 = vld [vmem:[%s8989_s8 + $0x10] sm:$0xff]  ;;  %v7820_v50 = vpack.c.bf16 %v909_v45, %v908_v44 }
  0x94   : > { %7795 = vmatpush3.bf16.msra.mxu0 %v7792_v9  ;;  %v910_v51 = vld [vmem:[#allocation8 + $0x1a0] sm:$0xff]  ;;  %v911_v52 = vld [vmem:[#allocation8 + $0x1a8] sm:$0xff]  ;;  %v7868_v53 = vpack.c.bf16 %v802_v47, %v801_v46  ;;  %v344_v56 = vld [vmem:[%s8989_s8 + $0x18] sm:$0xff] }
  0x95   : > { %7797 = vmatprep.subr.bf16.mxu0 %v7796_v13  ;;  %7855 = vmatpush3.bf16.msra.mxu1 %v7852_v27  ;;  %v803_v54 = vld [vmem:[#allocation8 + $0x60] sm:$0xff]  ;;  %v804_v55 = vld [vmem:[#allocation8 + $0x68] sm:$0xff]  ;;  %v7824_v58 = vpack.c.bf16 %v911_v52, %v910_v51  ;;  %v912_v59 = vld [vmem:[#allocation8 + $0x1b0] sm:$0xff] }
  0x96   : > { %7857 = vmatprep.subr.bf16.mxu1 %v7856_v32  ;;  %v345_v57 = vld [vmem:[%s8989_s8 + $0x20] sm:$0xff]  ;;  %v913_v60 = vld [vmem:[#allocation8 + $0x1b8] sm:$0xff]  ;;  %v7872_v61 = vpack.c.bf16 %v804_v55, %v803_v54  ;;  %v805_v62 = vld [vmem:[#allocation8 + $0x70] sm:$0xff] }
  0x97   : > { %v806_v63 = vld [vmem:[#allocation8 + $0x78] sm:$0xff]  ;;  %v346_v1 = vld [vmem:[%s8989_s8 + $0x28] sm:$0xff]  ;;  %v347_v2 = vld [vmem:[%s8989_s8 + $0x30] sm:$0xff]  ;;  %v7828_v3 = vpack.c.bf16 %v913_v60, %v912_v59 }
  0x98   : > { %7799 = vmatpush3.bf16.msra.mxu0 %v7796_v13  ;;  %v914_v4 = vld [vmem:[#allocation8 + $0x1c0] sm:$0xff]  ;;  %v915_v5 = vld [vmem:[#allocation8 + $0x1c8] sm:$0xff]  ;;  %v7876_v6 = vpack.c.bf16 %v806_v63, %v805_v62  ;;  %v348_v9 = vld [vmem:[%s8989_s8 + $0x38] sm:$0xff] }
  0x99   : > { %7801 = vmatprep.subr.bf16.mxu0 %v7800_v16  ;;  %7859 = vmatpush3.bf16.msra.mxu1 %v7856_v32  ;;  %v2384_v7 = vld [vmem:[#allocation8 + $0x280] sm:$0xff]  ;;  %v2385_v8 = vld [vmem:[#allocation8 + $0x288] sm:$0xff]  ;;  %v7832_v11 = vpack.c.bf16 %v915_v5, %v914_v4  ;;  %v916_v12 = vld [vmem:[#allocation8 + $0x1d0] sm:$0xff] }
  0x9a   : > { %7861 = vmatprep.subr.bf16.mxu1 %v7860_v38  ;;  %v349_v10 = vld [vmem:[%s8989_s8 + $0x40] sm:$0xff]  ;;  %v917_v13 = vld [vmem:[#allocation8 + $0x1d8] sm:$0xff]  ;;  %v7944_v14 = vpack.c.bf16 %v2385_v8, %v2384_v7  ;;  %v350_v15 = vld [vmem:[%s8989_s8 + $0x48] sm:$0xff] }
  0x9b   : > { %v7836_v17 = vpack.c.bf16 %v917_v13, %v916_v12  ;;  %v918_v18 = vld [vmem:[#allocation8 + $0x1e0] sm:$0xff]  ;;  %v919_v19 = vld [vmem:[#allocation8 + $0x1e8] sm:$0xff]  ;;  %v352_v20 = vld [vmem:[%s8989_s8 + $0x58] sm:$0xff] }
  0x9c   : > { %7803 = vmatpush3.bf16.msra.mxu0 %v7800_v16  ;;  %v351_v16 = vld [vmem:[%s8989_s8 + $0x50] sm:$0xff]  ;;  %v353_v21 = vld [vmem:[%s8989_s8 + $0x60] sm:$0xff]  ;;  %v354_v23 = vld [vmem:[%s8989_s8 + $0x68] sm:$0xff] }
  0x9d   : > { %7805 = vmatprep.subr.bf16.mxu0 %v7804_v22  ;;  %7863 = vmatpush3.bf16.msra.mxu1 %v7860_v38  ;;  %v355_v24 = vld [vmem:[%s8989_s8 + $0x70] sm:$0xff]  ;;  %v356_v25 = vld [vmem:[%s8989_s8 + $0x78] sm:$0xff]  ;;  %v357_v26 = vld [vmem:[%s8989_s8 + $0x80] sm:$0xff] }
  0x9e   : > { %7865 = vmatprep.subr.bf16.mxu1 %v7864_v43  ;;  %v358_v27 = vld [vmem:[%s8989_s8 + $0x88] sm:$0xff]  ;;  %v359_v28 = vld [vmem:[%s8989_s8 + $0x90] sm:$0xff]  ;;  %v360_v29 = vld [vmem:[%s8989_s8 + $0x98] sm:$0xff] }
  0x9f   : > { %v362_v31 = vld [vmem:[%s8989_s8 + $0xa8] sm:$0xff]  ;;  %v363_v32 = vld [vmem:[%s8989_s8 + $0xb0] sm:$0xff]  ;;  %v364_v33 = vld [vmem:[%s8989_s8 + $0xb8] sm:$0xff] }
  0xa0   : > { %7807 = vmatpush3.bf16.msra.mxu0 %v7804_v22  ;;  %v7840_v22 = vpack.c.bf16 %v919_v19, %v918_v18  ;;  %v365_v34 = vld [vmem:[%s8989_s8 + $0xc0] sm:$0xff]  ;;  %v366_v35 = vld [vmem:[%s8989_s8 + $0xc8] sm:$0xff]  ;;  %v368_v37 = vld [vmem:[%s8989_s8 + $0xd8] sm:$0xff] }
  0xa1   : > { %7809 = vmatprep.subr.bf16.mxu0 %v7808_v30  ;;  %7867 = vmatpush3.bf16.msra.mxu1 %v7864_v43  ;;  %v369_v38 = vld [vmem:[%s8989_s8 + $0xe0] sm:$0xff]  ;;  %v370_v39 = vld [vmem:[%s8989_s8 + $0xe8] sm:$0xff]  ;;  %v371_v40 = vld [vmem:[%s8989_s8 + $0xf0] sm:$0xff] }
  0xa2   : > { %7869 = vmatprep.subr.bf16.mxu1 %v7868_v53  ;;  %v372_v41 = vld [vmem:[%s8989_s8 + $0xf8] sm:$0xff]  ;;  %v2386_v45 = vld [vmem:[#allocation8 + $0x290] sm:$0xff]  ;;  %v2392_v54 = vld [vmem:[#allocation8 + $0x2c0] sm:$0xff] }
  0xa3   : > { %v921_v43 = vld [vmem:[#allocation8 + $0x1f8] sm:$0xff]  ;;  %v2390_v51 = vld [vmem:[#allocation8 + $0x2b0] sm:$0xff]  ;;  %v2393_v55 = vld [vmem:[#allocation8 + $0x2c8] sm:$0xff] }
  0xa4   : > { %7811 = vmatpush3.bf16.msra.mxu0 %v7808_v30  ;;  %v361_v30 = vld [vmem:[%s8989_s8 + $0xa0] sm:$0xff]  ;;  %v2387_v46 = vld [vmem:[#allocation8 + $0x298] sm:$0xff]  ;;  %v826_v7 = vld [vmem:[#allocation8 + $0x108] sm:$0xff] }
  0xa5   : > { %7813 = vmatprep.subr.bf16.mxu0 %v7812_v36  ;;  %7871 = vmatpush3.bf16.msra.mxu1 %v7868_v53  ;;  %v7948_v47 = vpack.c.bf16 %v2387_v46, %v2386_v45  ;;  %v2391_v52 = vld [vmem:[#allocation8 + $0x2b8] sm:$0xff]  ;;  %v2396_v60 = vld [vmem:[#allocation8 + $0x2e0] sm:$0xff] }
  0xa6   : > { %7873 = vmatprep.subr.bf16.mxu1 %v7872_v61  ;;  %v7956_v53 = vpack.c.bf16 %v2391_v52, %v2390_v51  ;;  %v1661_v63 = vld [vmem:[#allocation8 + $0x200] sm:$0xff]  ;;  %v2399_v4 = vld [vmem:[#allocation8 + $0x2f8] sm:$0xff]  ;;  %v1674_v51 = vld [vmem:[#allocation8 + $0x268] sm:$0xff] }
  0xa8   : > { %7815 = vmatpush3.bf16.msra.mxu0 %v7812_v36  ;;  %v367_v36 = vld [vmem:[%s8989_s8 + $0xd0] sm:$0xff] }
  0xa9   : > { %7817 = vmatprep.subr.bf16.mxu0 %v7816_v42  ;;  %7875 = vmatpush3.bf16.msra.mxu1 %v7872_v61  ;;  %v2397_v61 = vld [vmem:[#allocation8 + $0x2e8] sm:$0xff] }
  0xaa   : > { %7877 = vmatprep.subr.bf16.mxu1 %v7876_v6  ;;  %v7968_v62 = vpack.c.bf16 %v2397_v61, %v2396_v60 }
  0xab   : > { %6505 = vmatmul.mubr.f32.vlgmr.msra.gmra.mrb[0].mxu0 %v342_v48  ;;  %v2388_v48 = vld [vmem:[#allocation8 + $0x2a0] sm:$0xff] }
  0xac   : > { %6507 = vmatprep.mubr.f32.mxu0 %v343_v49  ;;  %7819 = vmatpush3.bf16.msra.mxu0 %v7816_v42  ;;  %v920_v42 = vld [vmem:[#allocation8 + $0x1f0] sm:$0xff]  ;;  %v2389_v49 = vld [vmem:[#allocation8 + $0x2a8] sm:$0xff] }
  0xad   : > { %7821 = vmatprep.subr.bf16.mxu0 %v7820_v50  ;;  %7879 = vmatpush3.bf16.msra.mxu1 %v7876_v6  ;;  %v7844_v44 = vpack.c.bf16 %v921_v43, %v920_v42  ;;  %v825_v6 = vld [vmem:[#allocation8 + $0x100] sm:$0xff]  ;;  %v1671_v43 = vld [vmem:[#allocation8 + $0x250] sm:$0xff] }
  0xae   : > { %7945 = vmatprep.subr.bf16.mxu1 %v7944_v14  ;;  %v9041_v8 = vpack.c.bf16 %v826_v7, %v825_v6 }
  0xaf   : > { %6508 = vmatmul.mubr.f32.gmra.mrb[2].mxu0 %v344_v56  ;;  %v7960_v56 = vpack.c.bf16 %v2393_v55, %v2392_v54 }
  0xb0   : > { %6510 = vmatprep.mubr.f32.mxu0 %v345_v57  ;;  %7823 = vmatpush3.bf16.msra.mxu0 %v7820_v50  ;;  %v7952_v50 = vpack.c.bf16 %v2389_v49, %v2388_v48  ;;  %v2394_v57 = vld [vmem:[#allocation8 + $0x2d0] sm:$0xff] }
  0xb1   : > { %7825 = vmatprep.subr.bf16.mxu0 %v7824_v58  ;;  %6713 = vmatmul.mubr.f32.vlgmr.msra.gmra.mrb[0].mxu1 %v8734_v0 }
  0xb2   : > { %7947 = vmatpush3.bf16.msra.mxu1 %v7944_v14  ;;  %6715 = vmatprep.mubr.f32.mxu1 %v8734_v0  ;;  %v1663_v14 = vld [vmem:[#allocation8 + $0x210] sm:$0xff] }
  0xb3   : > { %6511 = vmatmul.mubr.f32.gmra.mrb[4].mxu0 %v346_v1  ;;  %7949 = vmatprep.subr.bf16.mxu1 %v7948_v47  ;;  %v1662_v1 = vld [vmem:[#allocation8 + $0x208] sm:$0xff] }
  0xb4   : > { %6513 = vmatprep.mubr.f32.mxu0 %v347_v2  ;;  %7827 = vmatpush3.bf16.msra.mxu0 %v7824_v58  ;;  %v2395_v58 = vld [vmem:[#allocation8 + $0x2d8] sm:$0xff]  ;;  %v7880_v2 = vpack.c.bf16 %v1662_v1, %v1661_v63 }
  0xb5   : > { %7829 = vmatprep.subr.bf16.mxu0 %v7828_v3  ;;  %6716 = vmatmul.mubr.f32.gmra.mrb[2].mxu1 %v8734_v0  ;;  %v7964_v59 = vpack.c.bf16 %v2395_v58, %v2394_v57  ;;  %v1675_v58 = vld [vmem:[#allocation8 + $0x270] sm:$0xff] }
  0xb6   : > { %6718 = vmatprep.mubr.f32.mxu1 %v8734_v0  ;;  %7951 = vmatpush3.bf16.msra.mxu1 %v7948_v47 }
  0xb7   : > { %6514 = vmatmul.mubr.f32.gmra.mrb[6].mxu0 %v348_v9  ;;  %7953 = vmatprep.subr.bf16.mxu1 %v7952_v50  ;;  %v9046_v9 = vld [vmem:[%s10371_s2] ss:$0 sm:$0xff] }
  0xb8   : > { %6516 = vmatprep.mubr.f32.mxu0 %v349_v10  ;;  %7831 = vmatpush3.bf16.msra.mxu0 %v7828_v3  ;;  %v2398_v3 = vld [vmem:[#allocation8 + $0x2f0] sm:$0xff] }
  0xb9   : > { %7833 = vmatprep.subr.bf16.mxu0 %v7832_v11  ;;  %v7972_v5 = vpack.c.bf16 %v2399_v4, %v2398_v3 }
  0xba   : > { %7955 = vmatpush3.bf16.msra.mxu1 %v7952_v50  ;;  %v1673_v50 = vld [vmem:[#allocation8 + $0x260] sm:$0xff] }
  0xbb   : > { %6517 = vmatmul.mubr.f32.gmra.mrb[8].mxu0 %v350_v15  ;;  %7957 = vmatprep.subr.bf16.mxu1 %v7956_v53  ;;  %v1664_v15 = vld [vmem:[#allocation8 + $0x218] sm:$0xff] }
  0xbc   : > { %6519 = vmatprep.mubr.f32.mxu0 %v351_v16  ;;  %7835 = vmatpush3.bf16.msra.mxu0 %v7832_v11 }
  0xbd   : > { %7837 = vmatprep.subr.bf16.mxu0 %v7836_v17 }
  0xbe   : > { %7959 = vmatpush3.bf16.msra.mxu1 %v7956_v53 }
  0xbf   : > { %6520 = vmatmul.mubr.f32.gmra.mrb[10].mxu0 %v352_v20  ;;  %7961 = vmatprep.subr.bf16.mxu1 %v7960_v56  ;;  %v7884_v20 = vpack.c.bf16 %v1664_v15, %v1663_v14 }
  0xc0   : > { %6522 = vmatprep.mubr.f32.mxu0 %v353_v21  ;;  %7839 = vmatpush3.bf16.msra.mxu0 %v7836_v17 }
  0xc1   : > { %7841 = vmatprep.subr.bf16.mxu0 %v7840_v22 }
  0xc2   : > { %7963 = vmatpush3.bf16.msra.mxu1 %v7960_v56  ;;  %v7904_v56 = vpack.c.bf16 %v1674_v51, %v1673_v50 }
  0xc3   : > { %6523 = vmatmul.mubr.f32.gmra.mrb[12].mxu0 %v354_v23  ;;  %7965 = vmatprep.subr.bf16.mxu1 %v7964_v59  ;;  %v1666_v23 = vld [vmem:[#allocation8 + $0x228] sm:$0xff] }
  0xc4   : > { %6525 = vmatprep.mubr.f32.mxu0 %v355_v24  ;;  %7843 = vmatpush3.bf16.msra.mxu0 %v7840_v22  ;;  %v1665_v22 = vld [vmem:[#allocation8 + $0x220] sm:$0xff] }
  0xc5   : > { %7845 = vmatprep.subr.bf16.mxu0 %v7844_v44 }
  0xc6   : > { %7967 = vmatpush3.bf16.msra.mxu1 %v7964_v59  ;;  %v1676_v59 = vld [vmem:[#allocation8 + $0x278] sm:$0xff] }
  0xc7   : > { %6526 = vmatmul.mubr.f32.gmra.mrb[14].mxu0 %v356_v25  ;;  %7969 = vmatprep.subr.bf16.mxu1 %v7968_v62  ;;  %v7908_v63 = vpack.c.bf16 %v1676_v59, %v1675_v58 }
  0xc8   : > { %6528 = vmatprep.mubr.f32.mxu0 %v357_v26  ;;  %7847 = vmatpush3.bf16.msra.mxu0 %v7844_v44  ;;  %v1672_v44 = vld [vmem:[#allocation8 + $0x258] sm:$0xff] }
  0xc9   : > { %7881 = vmatprep.subr.bf16.mxu0 %v7880_v2  ;;  %v7900_v48 = vpack.c.bf16 %v1672_v44, %v1671_v43 }
  0xca   : > { %7971 = vmatpush3.bf16.msra.mxu1 %v7968_v62 }
  0xcb   : > { %6529 = vmatmul.mubr.f32.gmra.mrb[16].mxu0 %v358_v27  ;;  %7973 = vmatprep.subr.bf16.mxu1 %v7972_v5  ;;  %v7888_v27 = vpack.c.bf16 %v1666_v23, %v1665_v22 }
  0xcc   : > { %6531 = vmatprep.mubr.f32.mxu0 %v359_v28 }
  0xce   : > { %7975 = vmatpush3.bf16.msra.mxu1 %v7972_v5 }
  0xcf   : > { %6532 = vmatmul.mubr.f32.gmra.mrb[18].mxu0 %v360_v29  ;;  %7977 = vmatprep.subr.bf16.mxu1 %v9041_v8  ;;  %v1667_v29 = vld [vmem:[#allocation8 + $0x230] sm:$0xff] }
  0xd0   : > { %6534 = vmatprep.mubr.f32.mxu0 %v361_v30  ;;  %v1668_v30 = vld [vmem:[#allocation8 + $0x238] sm:$0xff] }
  0xd3   : > { %6535 = vmatmul.mubr.f32.gmra.mrb[20].mxu0 %v362_v31 }
  0xd4   : > { %6537 = vmatprep.mubr.f32.mxu0 %v363_v32 }
  0xd7   : > { %6538 = vmatmul.mubr.f32.gmra.mrb[22].mxu0 %v364_v33 }
  0xd8   : > { %6540 = vmatprep.mubr.f32.mxu0 %v365_v34  ;;  %v7892_v34 = vpack.c.bf16 %v1668_v30, %v1667_v29 }
  0xdb   : > { %6541 = vmatmul.mubr.f32.gmra.mrb[24].mxu0 %v366_v35 }
  0xdc   : > { %6543 = vmatprep.mubr.f32.mxu0 %v367_v36  ;;  %v1669_v36 = vld [vmem:[#allocation8 + $0x240] sm:$0xff] }
  0xdf   : > { %6544 = vmatmul.mubr.f32.gmra.mrb[26].mxu0 %v368_v37  ;;  %v1670_v37 = vld [vmem:[#allocation8 + $0x248] sm:$0xff] }
  0xe0   : > { %6546 = vmatprep.mubr.f32.mxu0 %v369_v38 }
  0xe3   : > { %6547 = vmatmul.mubr.f32.gmra.mrb[28].mxu0 %v370_v39 }
  0xe4   : > { %6549 = vmatprep.mubr.f32.mxu0 %v371_v40 }
  0xe7   : > { %6550 = vmatmul.mubr.f32.gmra.mrb[30].mxu0 %v372_v41  ;;  %v7896_v41 = vpack.c.bf16 %v1670_v37, %v1669_v36 }
  0xe8   : > { %6584 = vmatprep.mubr.f32.mxu0 %v8734_v0 }
 0x17e   : > { %v6506_v10 = vpop.f32.mrb[0].mxu0 }
 0x17f   : > { %v468_v11 = vadd.f32 %v6506_v10, %v9046_v9  ;;  %v462_v12 = vpop.f32.mrb[1].mxu0 }
 0x180   : > { %v463_v13 = vadd.f32 %v9046_v9, %v462_v12 }
 0x181   : > { %v9053_v18 = vmax.f32 %v468_v11, 0.0 }
 0x182   : > { %v9051_v16 = vmax.f32 %v463_v13, 0.0  ;;  %v6509_v17 = vpop.f32.mrb[2].mxu0 }
 0x183   : > { %v472_v19 = vpop.f32.mrb[3].mxu0  ;;  %v478_v25 = vadd.f32 %v6509_v17, %v9046_v9 }
 0x184   : > { %6585 = vmatmul.mubr.f32.vlgmr.msra.gmra.mrb[32].mxu0 %v9051_v16  ;;  %6719 = vmatmul.mubr.f32.gmra.mrb[4].mxu1 %v9051_v16  ;;  %v473_v21 = vadd.f32 %v9046_v9, %v472_v19 }
 0x185   : > { %6587 = vmatprep.mubr.f32.mxu0 %v9053_v18  ;;  %6721 = vmatprep.mubr.f32.mxu1 %v9053_v18  ;;  %v9067_v32 = vmax.f32 %v478_v25, 0.0 }
 0x186   : > { %v6512_v24 = vpop.f32.mrb[4].mxu0  ;;  %7883 = vmatpush3.bf16.msra.mxu0 %v7880_v2  ;;  %v9061_v28 = vmax.f32 %v473_v21, 0.0 }
 0x187   : > { %v482_v26 = vpop.f32.mrb[5].mxu0  ;;  %7885 = vmatprep.subr.bf16.mxu0 %v7884_v20  ;;  %v488_v39 = vadd.f32 %v6512_v24, %v9046_v9 }
 0x188   : > { %6588 = vmatmul.mubr.f32.gmra.mrb[34].mxu0 %v8734_v0  ;;  %6722 = vmatmul.mubr.f32.gmra.mrb[6].mxu1 %v8734_v0  ;;  %v483_v35 = vadd.f32 %v9046_v9, %v482_v26  ;;  %v6717_v52 = vpop.f32.mrb[2].mxu1 }
 0x189   : > { %6590 = vmatprep.mubr.f32.mxu0 %v8734_v0  ;;  %6724 = vmatprep.mubr.f32.mxu1 %v8734_v0  ;;  %v9081_v46 = vmax.f32 %v488_v39, 0.0 }
 0x18a   : > { %v6515_v31 = vpop.f32.mrb[6].mxu0  ;;  %7887 = vmatpush3.bf16.msra.mxu0 %v7884_v20  ;;  %v9075_v42 = vmax.f32 %v483_v35, 0.0 }
 0x18b   : > { %v492_v33 = vpop.f32.mrb[7].mxu0  ;;  %7889 = vmatprep.subr.bf16.mxu0 %v7888_v27  ;;  %v498_v54 = vadd.f32 %v6515_v31, %v9046_v9 }
 0x18c   : > { %6591 = vmatmul.mubr.f32.gmra.mrb[36].mxu0 %v9061_v28  ;;  %6725 = vmatmul.mubr.f32.gmra.mrb[8].mxu1 %v9061_v28  ;;  %v493_v49 = vadd.f32 %v9046_v9, %v492_v33 }
 0x18d   : > { %6593 = vmatprep.mubr.f32.mxu0 %v9067_v32  ;;  %6727 = vmatprep.mubr.f32.mxu1 %v9067_v32  ;;  %v9099_v61 = vmax.f32 %v498_v54, 0.0 }
 0x18e   : > { %v6518_v38 = vpop.f32.mrb[8].mxu0  ;;  %7891 = vmatpush3.bf16.msra.mxu0 %v7888_v27  ;;  %v9091_v57 = vmax.f32 %v493_v49, 0.0 }
 0x18f   : > { %v502_v40 = vpop.f32.mrb[9].mxu0  ;;  %7893 = vmatprep.subr.bf16.mxu0 %v7892_v34  ;;  %v508_v3 = vadd.f32 %v6518_v38, %v9046_v9 }
 0x190   : > { %6594 = vmatmul.mubr.f32.gmra.mrb[38].mxu0 %v8734_v0  ;;  %6728 = vmatmul.mubr.f32.gmra.mrb[10].mxu1 %v8734_v0  ;;  %v503_v1 = vadd.f32 %v9046_v9, %v502_v40 }
 0x191   : > { %6596 = vmatprep.mubr.f32.mxu0 %v8734_v0  ;;  %6730 = vmatprep.mubr.f32.mxu1 %v8734_v0  ;;  %v9121_v11 = vmax.f32 %v508_v3, 0.0 }
 0x192   : > { %v6521_v45 = vpop.f32.mrb[10].mxu0  ;;  %7895 = vmatpush3.bf16.msra.mxu0 %v7892_v34  ;;  %v9112_v6 = vmax.f32 %v503_v1, 0.0 }
 0x193   : > { %v512_v47 = vpop.f32.mrb[11].mxu0  ;;  %7897 = vmatprep.subr.bf16.mxu0 %v7896_v41  ;;  %v518_v19 = vadd.f32 %v6521_v45, %v9046_v9 }
 0x194   : > { %6597 = vmatmul.mubr.f32.gmra.mrb[40].mxu0 %v9075_v42  ;;  %6731 = vmatmul.mubr.f32.gmra.mrb[12].mxu1 %v9075_v42  ;;  %v513_v14 = vadd.f32 %v9046_v9, %v512_v47 }
 0x195   : > { %6599 = vmatprep.mubr.f32.mxu0 %v9081_v46  ;;  %6733 = vmatprep.mubr.f32.mxu1 %v9081_v46  ;;  %v9147_v25 = vmax.f32 %v518_v19, 0.0  ;;  %v827_v19 = vld [vmem:[#allocation8 + $0x110] sm:$0xff] }
 0x196   : > { %v9088_v53 = vpop.f32.mrb[12].mxu0  ;;  %7899 = vmatpush3.bf16.msra.mxu0 %v7896_v41  ;;  %v9138_v22 = vmax.f32 %v513_v14, 0.0 }
 0x197   : > { %v522_v55 = vpop.f32.mrb[13].mxu0  ;;  %7901 = vmatprep.subr.bf16.mxu0 %v7900_v48  ;;  %v528_v33 = vadd.f32 %v9088_v53, %v9046_v9 }
 0x198   : > { %6600 = vmatmul.mubr.f32.gmra.mrb[42].mxu0 %v8734_v0  ;;  %6734 = vmatmul.mubr.f32.gmra.mrb[14].mxu1 %v8734_v0  ;;  %v523_v29 = vadd.f32 %v9046_v9, %v522_v55 }
 0x199   : > { %6602 = vmatprep.mubr.f32.mxu0 %v8734_v0  ;;  %6736 = vmatprep.mubr.f32.mxu1 %v8734_v0  ;;  %v9174_v39 = vmax.f32 %v528_v33, 0.0  ;;  %v810_v33 = vld [vmem:[#allocation8 + $0x90] sm:$0xff] }
 0x19a   : > { %v9097_v60 = vpop.f32.mrb[14].mxu0  ;;  %7903 = vmatpush3.bf16.msra.mxu0 %v7900_v48  ;;  %v9165_v36 = vmax.f32 %v523_v29, 0.0 }
 0x19b   : > { %v9101_v62 = vpop.f32.mrb[15].mxu0  ;;  %7905 = vmatprep.subr.bf16.mxu0 %v7904_v56  ;;  %v538_v47 = vadd.f32 %v9097_v60, %v9046_v9 }
 0x19c   : > { %6603 = vmatmul.mubr.f32.gmra.mrb[44].mxu0 %v9091_v57  ;;  %6737 = vmatmul.mubr.f32.gmra.mrb[16].mxu1 %v9091_v57  ;;  %v533_v43 = vadd.f32 %v9046_v9, %v9101_v62 }
 0x19d   : > { %6605 = vmatprep.mubr.f32.mxu0 %v9099_v61  ;;  %6739 = vmatprep.mubr.f32.mxu1 %v9099_v61  ;;  %v9202_v53 = vmax.f32 %v538_v47, 0.0  ;;  %v836_v47 = vld [vmem:[#allocation8 + $0x158] sm:$0xff] }
 0x19e   : > { %v6530_v2 = vpop.f32.mrb[16].mxu0  ;;  %7907 = vmatpush3.bf16.msra.mxu0 %v7904_v56  ;;  %v9193_v50 = vmax.f32 %v533_v43, 0.0 }
 0x19f   : > { %v9110_v4 = vadd.f32 %v6530_v2, %v9046_v9  ;;  %v542_v5 = vpop.f32.mrb[17].mxu0  ;;  %7909 = vmatprep.subr.bf16.mxu0 %v7908_v63 }
 0x1a0   : > { %6606 = vmatmul.mubr.f32.gmra.mrb[46].mxu0 %v8734_v0  ;;  %6740 = vmatmul.mubr.f32.gmra.mrb[18].mxu1 %v8734_v0  ;;  %v9117_v7 = vadd.f32 %v9046_v9, %v542_v5  ;;  %v808_v5 = vld [vmem:[#allocation8 + $0x80] sm:$0xff] }
 0x1a1   : > { %6608 = vmatprep.mubr.f32.mxu0 %v8734_v0  ;;  %6742 = vmatprep.mubr.f32.mxu1 %v8734_v0  ;;  %v9222_v59 = vmax.f32 %v9110_v4, 0.0 }
 0x1a2   : > { %v6533_v10 = vpop.f32.mrb[18].mxu0  ;;  %7911 = vmatpush3.bf16.msra.mxu0 %v7908_v63  ;;  %v9215_v58 = vmax.f32 %v9117_v7, 0.0  ;;  %v9247_v63 = vpop.f32.mrb[3].mxu1  ;;  %v809_v7 = vld [vmem:[#allocation8 + $0x88] sm:$0xff] }
 0x1a3   : > { %v9124_v12 = vadd.f32 %v6533_v10, %v9046_v9  ;;  %v552_v13 = vpop.f32.mrb[19].mxu0  ;;  %v9279_v10 = vpack.c.bf16 %v809_v7, %v808_v5  ;;  %v817_v5 = vld [vmem:[#allocation8 + $0xc8] sm:$0xff] }
 0x1a4   : > { %6609 = vmatmul.mubr.f32.gmra.mrb[48].mxu0 %v9112_v6  ;;  %6743 = vmatmul.mubr.f32.gmra.mrb[20].mxu1 %v9112_v6  ;;  %v9130_v15 = vadd.f32 %v9046_v9, %v552_v13 }
 0x1a5   : > { %6611 = vmatprep.mubr.f32.mxu0 %v9121_v11  ;;  %6745 = vmatprep.mubr.f32.mxu1 %v9121_v11  ;;  %v9236_v60 = vmax.f32 %v9124_v12, 0.0 }
 0x1a6   : > { %v6536_v17 = vpop.f32.mrb[20].mxu0  ;;  %7913 = vmatprep.subr.bf16.mxu0 %v9279_v10 }
 0x1a7   : > { %v9136_v20 = vadd.f32 %v6536_v17, %v9046_v9  ;;  %v562_v21 = vpop.f32.mrb[21].mxu0 }
 0x1a8   : > { %6612 = vmatmul.mubr.f32.gmra.mrb[50].mxu0 %v8734_v0  ;;  %6746 = vmatmul.mubr.f32.gmra.mrb[22].mxu1 %v8734_v0  ;;  %v9143_v23 = vadd.f32 %v9046_v9, %v562_v21 }
 0x1a9   : > { %6614 = vmatprep.mubr.f32.mxu0 %v8734_v0  ;;  %6748 = vmatprep.mubr.f32.mxu1 %v8734_v0  ;;  %v9252_v1 = vmax.f32 %v9136_v20, 0.0  ;;  %v828_v20 = vld [vmem:[#allocation8 + $0x118] sm:$0xff] }
 0x1aa   : > { %v6539_v24 = vpop.f32.mrb[22].mxu0  ;;  %v9243_v62 = vmax.f32 %v9143_v23, 0.0 }
 0x1ab   : > { %v9150_v26 = vadd.f32 %v6539_v24, %v9046_v9  ;;  %v572_v27 = vpop.f32.mrb[23].mxu0  ;;  %v7980_v24 = vpack.c.bf16 %v828_v20, %v827_v19  ;;  %v840_v20 = vld [vmem:[#allocation8 + $0x178] sm:$0xff] }
 0x1ac   : > { %6615 = vmatmul.mubr.f32.gmra.mrb[52].mxu0 %v9138_v22  ;;  %6749 = vmatmul.mubr.f32.gmra.mrb[24].mxu1 %v9138_v22  ;;  %v9156_v30 = vadd.f32 %v9046_v9, %v572_v27  ;;  %v830_v27 = vld [vmem:[#allocation8 + $0x128] sm:$0xff] }
 0x1ad   : > { %6617 = vmatprep.mubr.f32.mxu0 %v9147_v25  ;;  %6751 = vmatprep.mubr.f32.mxu1 %v9147_v25  ;;  %v9266_v3 = vmax.f32 %v9150_v26, 0.0  ;;  %v829_v26 = vld [vmem:[#allocation8 + $0x120] sm:$0xff] }
 0x1ae   : > { %v6542_v31 = vpop.f32.mrb[24].mxu0  ;;  %v9259_v2 = vmax.f32 %v9156_v30, 0.0  ;;  %v7984_v29 = vpack.c.bf16 %v830_v27, %v829_v26  ;;  %v831_v30 = vld [vmem:[#allocation8 + $0x130] sm:$0xff]  ;;  %v819_v26 = vld [vmem:[#allocation8 + $0xd8] sm:$0xff] }
 0x1af   : > { %v9163_v34 = vadd.f32 %v6542_v31, %v9046_v9  ;;  %v582_v35 = vpop.f32.mrb[25].mxu0  ;;  %v832_v31 = vld [vmem:[#allocation8 + $0x138] sm:$0xff] }
 0x1b0   : > { %6618 = vmatmul.mubr.f32.gmra.mrb[54].mxu0 %v8734_v0  ;;  %6752 = vmatmul.mubr.f32.gmra.mrb[26].mxu1 %v8734_v0  ;;  %v9170_v37 = vadd.f32 %v9046_v9, %v582_v35  ;;  %v833_v35 = vld [vmem:[#allocation8 + $0x140] sm:$0xff] }
 0x1b1   : > { %6620 = vmatprep.mubr.f32.mxu0 %v8734_v0  ;;  %6754 = vmatprep.mubr.f32.mxu1 %v8734_v0  ;;  %v9282_v12 = vmax.f32 %v9163_v34, 0.0  ;;  %v811_v34 = vld [vmem:[#allocation8 + $0x98] sm:$0xff] }
 0x1b2   : > { %v6545_v38 = vpop.f32.mrb[26].mxu0  ;;  %v9273_v4 = vmax.f32 %v9170_v37, 0.0  ;;  %v7916_v37 = vpack.c.bf16 %v811_v34, %v810_v33  ;;  %v3205_v33 = vld [vmem:[#allocation8 + $0x308] sm:$0xff] }
 0x1b3   : > { %v9177_v40 = vadd.f32 %v6545_v38, %v9046_v9  ;;  %v592_v41 = vpop.f32.mrb[27].mxu0  ;;  %v834_v38 = vld [vmem:[#allocation8 + $0x148] sm:$0xff] }
 0x1b4   : > { %6621 = vmatmul.mubr.f32.gmra.mrb[56].mxu0 %v9165_v36  ;;  %6755 = vmatmul.mubr.f32.gmra.mrb[28].mxu1 %v9165_v36  ;;  %v9184_v44 = vadd.f32 %v9046_v9, %v592_v41  ;;  %v813_v41 = vld [vmem:[#allocation8 + $0xa8] sm:$0xff]  ;;  %v7992_v43 = vpack.c.bf16 %v834_v38, %v833_v35  ;;  %v823_v38 = vld [vmem:[#allocation8 + $0xf8] sm:$0xff] }
 0x1b5   : > { %6623 = vmatprep.mubr.f32.mxu0 %v9174_v39  ;;  %6757 = vmatprep.mubr.f32.mxu1 %v9174_v39  ;;  %v9297_v14 = vmax.f32 %v9177_v40, 0.0  ;;  %v812_v40 = vld [vmem:[#allocation8 + $0xa0] sm:$0xff]  ;;  %v821_v34 = vld [vmem:[#allocation8 + $0xe8] sm:$0xff] }
 0x1b6   : > { %v6548_v45 = vpop.f32.mrb[28].mxu0  ;;  %v9290_v13 = vmax.f32 %v9184_v44, 0.0  ;;  %v835_v44 = vld [vmem:[#allocation8 + $0x150] sm:$0xff] }
 0x1b7   : > { %v9191_v48 = vadd.f32 %v6548_v45, %v9046_v9  ;;  %v602_v49 = vpop.f32.mrb[29].mxu0  ;;  %v7920_v45 = vpack.c.bf16 %v813_v41, %v812_v40 }
 0x1b8   : > { %6624 = vmatmul.mubr.f32.gmra.mrb[58].mxu0 %v8734_v0  ;;  %6758 = vmatmul.mubr.f32.gmra.mrb[30].mxu1 %v8734_v0  ;;  %v9198_v51 = vadd.f32 %v9046_v9, %v602_v49  ;;  %v815_v49 = vld [vmem:[#allocation8 + $0xb8] sm:$0xff] }
 0x1b9   : > { %6626 = vmatprep.mubr.f32.mxu0 %v8734_v0  ;;  %6760 = vmatprep.mubr.f32.mxu1 %v8734_v0  ;;  %v9311_v17 = vmax.f32 %v9191_v48, 0.0  ;;  %v814_v48 = vld [vmem:[#allocation8 + $0xb0] sm:$0xff] }
 0x1ba   : > { %v6551_v52 = vpop.f32.mrb[30].mxu0 }
 0x1bb   : > { %v9205_v54 = vadd.f32 %v6551_v52, %v9046_v9  ;;  %v612_v55 = vpop.f32.mrb[31].mxu0  ;;  %v837_v52 = vld [vmem:[#allocation8 + $0x160] sm:$0xff] }
 0x1bc   : > { %6627 = vmatmul.mubr.f32.gmra.mrb[60].mxu0 %v9193_v50  ;;  %6761 = vmatmul.mubr.f32.gmra.mrb[32].mxu1 %v9193_v50  ;;  %v9210_v56 = vadd.f32 %v9046_v9, %v612_v55  ;;  %v9229_v9 = vmax.f32 %v9130_v15, 0.0  ;;  %v9304_v15 = vmax.f32 %v9198_v51, 0.0  ;;  %v7996_v51 = vpack.c.bf16 %v836_v47, %v835_v44  ;;  %v838_v55 = vld [vmem:[#allocation8 + $0x168] sm:$0xff] }
 0x1bd   : > { %6629 = vmatprep.mubr.f32.mxu0 %v9202_v53  ;;  %6763 = vmatprep.mubr.f32.mxu1 %v9202_v53  ;;  %v9325_v23 = vmax.f32 %v9205_v54, 0.0  ;;  %v7924_v54 = vpack.c.bf16 %v815_v49, %v814_v48  ;;  %v8000_v7 = vpack.c.bf16 %v838_v55, %v837_v52  ;;  %v3639_v55 = vld [vmem:[#allocation8 + $0x388] sm:$0xff] }
 0x1be   : > { %v9318_v21 = vmax.f32 %v9210_v56, 0.0  ;;  %v816_v56 = vld [vmem:[#allocation8 + $0xc0] sm:$0xff] }
 0x1bf   : > { %v7928_v19 = vpack.c.bf16 %v817_v5, %v816_v56 }
 0x1c0   : > { %6630 = vmatmul.mubr.f32.gmra.mrb[62].mxu0 %v8734_v0  ;;  %6764 = vmatmul.mubr.f32.gmra.mrb[34].mxu1 %v8734_v0 }
 0x1c1   : > { %6632 = vmatprep.mubr.f32.mxu0 %v8734_v0  ;;  %6766 = vmatprep.mubr.f32.mxu1 %v8734_v0 }
 0x1c4   : > { %6633 = vmatmul.mubr.f32.gmra.mrb[64].mxu0 %v9215_v58  ;;  %6767 = vmatmul.mubr.f32.gmra.mrb[36].mxu1 %v9215_v58 }
 0x1c5   : > { %6635 = vmatprep.mubr.f32.mxu0 %v9222_v59  ;;  %6769 = vmatprep.mubr.f32.mxu1 %v9222_v59 }
 0x1c8   : > { %6636 = vmatmul.mubr.f32.gmra.mrb[66].mxu0 %v8734_v0  ;;  %6770 = vmatmul.mubr.f32.gmra.mrb[38].mxu1 %v8734_v0 }
 0x1c9   : > { %6638 = vmatprep.mubr.f32.mxu0 %v8734_v0  ;;  %6772 = vmatprep.mubr.f32.mxu1 %v8734_v0 }
 0x1cc   : > { %6639 = vmatmul.mubr.f32.gmra.mrb[68].mxu0 %v9229_v9  ;;  %6773 = vmatmul.mubr.f32.gmra.mrb[40].mxu1 %v9229_v9 }
 0x1cd   : > { %6641 = vmatprep.mubr.f32.mxu0 %v9236_v60  ;;  %6775 = vmatprep.mubr.f32.mxu1 %v9236_v60 }
 0x1d0   : > { %6642 = vmatmul.mubr.f32.gmra.mrb[70].mxu0 %v8734_v0  ;;  %6776 = vmatmul.mubr.f32.gmra.mrb[42].mxu1 %v8734_v0 }
 0x1d1   : > { %6644 = vmatprep.mubr.f32.mxu0 %v8734_v0  ;;  %6778 = vmatprep.mubr.f32.mxu1 %v8734_v0 }
 0x1d4   : > { %6645 = vmatmul.mubr.f32.gmra.mrb[72].mxu0 %v9243_v62  ;;  %6779 = vmatmul.mubr.f32.gmra.mrb[44].mxu1 %v9243_v62 }
 0x1d5   : > { %6647 = vmatprep.mubr.f32.mxu0 %v9252_v1  ;;  %6781 = vmatprep.mubr.f32.mxu1 %v9252_v1 }
 0x1d8   : > { %6648 = vmatmul.mubr.f32.gmra.mrb[74].mxu0 %v8734_v0  ;;  %6782 = vmatmul.mubr.f32.gmra.mrb[46].mxu1 %v8734_v0 }
 0x1d9   : > { %6650 = vmatprep.mubr.f32.mxu0 %v8734_v0  ;;  %6784 = vmatprep.mubr.f32.mxu1 %v8734_v0 }
 0x1dc   : > { %6651 = vmatmul.mubr.f32.gmra.mrb[76].mxu0 %v9259_v2  ;;  %6785 = vmatmul.mubr.f32.gmra.mrb[48].mxu1 %v9259_v2 }
 0x1dd   : > { %6653 = vmatprep.mubr.f32.mxu0 %v9266_v3  ;;  %6787 = vmatprep.mubr.f32.mxu1 %v9266_v3 }
 0x1e0   : > { %6654 = vmatmul.mubr.f32.gmra.mrb[78].mxu0 %v8734_v0  ;;  %6788 = vmatmul.mubr.f32.gmra.mrb[50].mxu1 %v8734_v0 }
 0x1e1   : > { %6656 = vmatprep.mubr.f32.mxu0 %v8734_v0  ;;  %6790 = vmatprep.mubr.f32.mxu1 %v8734_v0 }
 0x1e4   : > { %6657 = vmatmul.mubr.f32.gmra.mrb[80].mxu0 %v9273_v4  ;;  %6791 = vmatmul.mubr.f32.gmra.mrb[52].mxu1 %v9273_v4 }
 0x1e5   : > { %6659 = vmatprep.mubr.f32.mxu0 %v9282_v12  ;;  %6793 = vmatprep.mubr.f32.mxu1 %v9282_v12 }
 0x1e8   : > { %6660 = vmatmul.mubr.f32.gmra.mrb[82].mxu0 %v8734_v0  ;;  %6794 = vmatmul.mubr.f32.gmra.mrb[54].mxu1 %v8734_v0 }
 0x1e9   : > { %6662 = vmatprep.mubr.f32.mxu0 %v8734_v0  ;;  %6796 = vmatprep.mubr.f32.mxu1 %v8734_v0 }
 0x1ec   : > { %6663 = vmatmul.mubr.f32.gmra.mrb[84].mxu0 %v9290_v13  ;;  %6797 = vmatmul.mubr.f32.gmra.mrb[56].mxu1 %v9290_v13 }
 0x1ed   : > { %6665 = vmatprep.mubr.f32.mxu0 %v9297_v14  ;;  %6799 = vmatprep.mubr.f32.mxu1 %v9297_v14 }
 0x1f0   : > { %6666 = vmatmul.mubr.f32.gmra.mrb[86].mxu0 %v8734_v0  ;;  %6800 = vmatmul.mubr.f32.gmra.mrb[58].mxu1 %v8734_v0 }
 0x1f1   : > { %6668 = vmatprep.mubr.f32.mxu0 %v8734_v0  ;;  %6802 = vmatprep.mubr.f32.mxu1 %v8734_v0 }
 0x1f4   : > { %6669 = vmatmul.mubr.f32.gmra.mrb[88].mxu0 %v9304_v15  ;;  %6803 = vmatmul.mubr.f32.gmra.mrb[60].mxu1 %v9304_v15 }
 0x1f5   : > { %6671 = vmatprep.mubr.f32.mxu0 %v9311_v17  ;;  %6805 = vmatprep.mubr.f32.mxu1 %v9311_v17 }
 0x1f8   : > { %6672 = vmatmul.mubr.f32.gmra.mrb[90].mxu0 %v8734_v0  ;;  %6806 = vmatmul.mubr.f32.gmra.mrb[62].mxu1 %v8734_v0 }
 0x1f9   : > { %6674 = vmatprep.mubr.f32.mxu0 %v8734_v0  ;;  %7096 = vmatprep.mubr.f32.mxu1 %v8734_v0 }
 0x1fc   : > { %6675 = vmatmul.mubr.f32.gmra.mrb[92].mxu0 %v9318_v21  ;;  %7097 = vmatmul.mubr.f32.vlgmr.msra.gmra.mrb[64].mxu1 %v9051_v16 }
 0x1fd   : > { %7979 = vmatpush3.bf16.msra.mxu1 %v9041_v8  ;;  %7099 = vmatprep.mubr.f32.mxu1 %v9053_v18  ;;  %v7988_v8 = vpack.c.bf16 %v832_v31, %v831_v30  ;;  %v820_v30 = vld [vmem:[#allocation8 + $0xe0] sm:$0xff] }
 0x1fe   : > { %6677 = vmatprep.mubr.f32.mxu0 %v9325_v23  ;;  %7981 = vmatprep.subr.bf16.mxu1 %v7980_v24  ;;  %v3204_v31 = vld [vmem:[#allocation8 + $0x300] sm:$0xff]  ;;  %v7936_v35 = vpack.c.bf16 %v821_v34, %v820_v30 }
 0x200   : > { %6678 = vmatmul.mubr.f32.gmra.mrb[94].mxu0 %v8734_v0  ;;  %7100 = vmatmul.mubr.f32.gmra.mrb[66].mxu1 %v8734_v0 }
 0x201   : > { %6840 = vmatprep.mubr.f32.mxu0 %v8734_v0  ;;  %7102 = vmatprep.mubr.f32.mxu1 %v8734_v0 }
 0x202   : > { %7983 = vmatpush3.bf16.msra.mxu1 %v7980_v24  ;;  %v818_v24 = vld [vmem:[#allocation8 + $0xd0] sm:$0xff] }
 0x203   : > { %7985 = vmatprep.subr.bf16.mxu1 %v7984_v29 }
 0x204   : > { %6841 = vmatmul.mubr.f32.vlgmr.msra.gmra.mrb[96].mxu0 %v9051_v16  ;;  %7103 = vmatmul.mubr.f32.gmra.mrb[68].mxu1 %v9061_v28 }
 0x205   : > { %6843 = vmatprep.mubr.f32.mxu0 %v9053_v18  ;;  %7105 = vmatprep.mubr.f32.mxu1 %v9067_v32 }
 0x206   : > { %7987 = vmatpush3.bf16.msra.mxu1 %v7984_v29  ;;  %7915 = vmatpush3.bf16.msra.mxu0 %v9279_v10  ;;  %v839_v10 = vld [vmem:[#allocation8 + $0x170] sm:$0xff]  ;;  %v7932_v29 = vpack.c.bf16 %v819_v26, %v818_v24 }
 0x207   : > { %7989 = vmatprep.subr.bf16.mxu1 %v7988_v8  ;;  %7917 = vmatprep.subr.bf16.mxu0 %v7916_v37  ;;  %v8004_v27 = vpack.c.bf16 %v840_v20, %v839_v10 }
 0x208   : > { %6844 = vmatmul.mubr.f32.gmra.mrb[98].mxu0 %v8734_v0  ;;  %7106 = vmatmul.mubr.f32.gmra.mrb[70].mxu1 %v8734_v0 }
 0x209   : > { %6846 = vmatprep.mubr.f32.mxu0 %v8734_v0  ;;  %7108 = vmatprep.mubr.f32.mxu1 %v8734_v0 }
 0x20a   : > { %7991 = vmatpush3.bf16.msra.mxu1 %v7988_v8  ;;  %7919 = vmatpush3.bf16.msra.mxu0 %v7916_v37  ;;  %v9357_v8 = vpack.c.bf16 %v3205_v33, %v3204_v31  ;;  %v822_v37 = vld [vmem:[#allocation8 + $0xf0] sm:$0xff] }
 0x20b   : > { %7993 = vmatprep.subr.bf16.mxu1 %v7992_v43  ;;  %7921 = vmatprep.subr.bf16.mxu0 %v7920_v45  ;;  %v7940_v40 = vpack.c.bf16 %v823_v38, %v822_v37 }
 0x20c   : > { %6847 = vmatmul.mubr.f32.gmra.mrb[100].mxu0 %v9061_v28  ;;  %7109 = vmatmul.mubr.f32.gmra.mrb[72].mxu1 %v9075_v42 }
 0x20d   : > { %6849 = vmatprep.mubr.f32.mxu0 %v9067_v32  ;;  %7111 = vmatprep.mubr.f32.mxu1 %v9081_v46 }
 0x20e   : > { %7995 = vmatpush3.bf16.msra.mxu1 %v7992_v43  ;;  %7923 = vmatpush3.bf16.msra.mxu0 %v7920_v45 }
 0x20f   : > { %7997 = vmatprep.subr.bf16.mxu1 %v7996_v51  ;;  %7925 = vmatprep.subr.bf16.mxu0 %v7924_v54 }
 0x210   : > { %6850 = vmatmul.mubr.f32.gmra.mrb[102].mxu0 %v8734_v0  ;;  %7112 = vmatmul.mubr.f32.gmra.mrb[74].mxu1 %v8734_v0 }
 0x211   : > { %6852 = vmatprep.mubr.f32.mxu0 %v8734_v0  ;;  %7114 = vmatprep.mubr.f32.mxu1 %v8734_v0 }
 0x212   : > { %7999 = vmatpush3.bf16.msra.mxu1 %v7996_v51  ;;  %7927 = vmatpush3.bf16.msra.mxu0 %v7924_v54  ;;  %v3638_v54 = vld [vmem:[#allocation8 + $0x380] sm:$0xff] }
 0x213   : > { %8001 = vmatprep.subr.bf16.mxu1 %v8000_v7  ;;  %7929 = vmatprep.subr.bf16.mxu0 %v7928_v19 }
 0x214   : > { %6853 = vmatmul.mubr.f32.gmra.mrb[104].mxu0 %v9075_v42  ;;  %7115 = vmatmul.mubr.f32.gmra.mrb[76].mxu1 %v9091_v57 }
 0x215   : > { %6855 = vmatprep.mubr.f32.mxu0 %v9081_v46  ;;  %7117 = vmatprep.mubr.f32.mxu1 %v9099_v61 }
 0x216   : > { %8003 = vmatpush3.bf16.msra.mxu1 %v8000_v7  ;;  %7931 = vmatpush3.bf16.msra.mxu0 %v7928_v19 }
 0x217   : > { %8005 = vmatprep.subr.bf16.mxu1 %v8004_v27  ;;  %7933 = vmatprep.subr.bf16.mxu0 %v7932_v29 }
 0x218   : > { %6856 = vmatmul.mubr.f32.gmra.mrb[106].mxu0 %v8734_v0  ;;  %7118 = vmatmul.mubr.f32.gmra.mrb[78].mxu1 %v8734_v0 }
 0x219   : > { %6858 = vmatprep.mubr.f32.mxu0 %v8734_v0  ;;  %7120 = vmatprep.mubr.f32.mxu1 %v8734_v0 }
 0x21a   : > { %8007 = vmatpush3.bf16.msra.mxu1 %v8004_v27  ;;  %7935 = vmatpush3.bf16.msra.mxu0 %v7932_v29 }
 0x21b   : > { %8009 = vmatprep.subr.bf16.mxu1 %v9357_v8  ;;  %7937 = vmatprep.subr.bf16.mxu0 %v7936_v35 }
 0x21c   : > { %6859 = vmatmul.mubr.f32.gmra.mrb[108].mxu0 %v9091_v57  ;;  %7121 = vmatmul.mubr.f32.gmra.mrb[80].mxu1 %v9112_v6 }
 0x21d   : > { %6861 = vmatprep.mubr.f32.mxu0 %v9099_v61  ;;  %7123 = vmatprep.mubr.f32.mxu1 %v9121_v11 }
 0x21e   : > { %7939 = vmatpush3.bf16.msra.mxu0 %v7936_v35 }
 0x21f   : > { %7941 = vmatprep.subr.bf16.mxu0 %v7940_v40 }
 0x220   : > { %6862 = vmatmul.mubr.f32.gmra.mrb[110].mxu0 %v8734_v0  ;;  %7124 = vmatmul.mubr.f32.gmra.mrb[82].mxu1 %v8734_v0 }
 0x221   : > { %6864 = vmatprep.mubr.f32.mxu0 %v8734_v0  ;;  %7126 = vmatprep.mubr.f32.mxu1 %v8734_v0 }
 0x222   : > { %7943 = vmatpush3.bf16.msra.mxu0 %v7940_v40 }
 0x224   : > { %6865 = vmatmul.mubr.f32.gmra.mrb[112].mxu0 %v9112_v6  ;;  %7127 = vmatmul.mubr.f32.gmra.mrb[84].mxu1 %v9138_v22 }
 0x225   : > { %6867 = vmatprep.mubr.f32.mxu0 %v9121_v11  ;;  %7129 = vmatprep.mubr.f32.mxu1 %v9147_v25 }
 0x228   : > { %6868 = vmatmul.mubr.f32.gmra.mrb[114].mxu0 %v8734_v0  ;;  %7130 = vmatmul.mubr.f32.gmra.mrb[86].mxu1 %v8734_v0 }
 0x229   : > { %6870 = vmatprep.mubr.f32.mxu0 %v8734_v0  ;;  %7132 = vmatprep.mubr.f32.mxu1 %v8734_v0 }
 0x22c   : > { %6871 = vmatmul.mubr.f32.gmra.mrb[116].mxu0 %v9138_v22  ;;  %7133 = vmatmul.mubr.f32.gmra.mrb[88].mxu1 %v9165_v36 }
 0x22d   : > { %6873 = vmatprep.mubr.f32.mxu0 %v9147_v25  ;;  %7135 = vmatprep.mubr.f32.mxu1 %v9174_v39 }
 0x230   : > { %6874 = vmatmul.mubr.f32.gmra.mrb[118].mxu0 %v8734_v0  ;;  %7136 = vmatmul.mubr.f32.gmra.mrb[90].mxu1 %v8734_v0 }
 0x231   : > { %6876 = vmatprep.mubr.f32.mxu0 %v8734_v0  ;;  %7138 = vmatprep.mubr.f32.mxu1 %v8734_v0 }
 0x234   : > { %6877 = vmatmul.mubr.f32.gmra.mrb[120].mxu0 %v9165_v36  ;;  %7139 = vmatmul.mubr.f32.gmra.mrb[92].mxu1 %v9193_v50 }
 0x235   : > { %6879 = vmatprep.mubr.f32.mxu0 %v9174_v39  ;;  %7141 = vmatprep.mubr.f32.mxu1 %v9202_v53 }
 0x238   : > { %6880 = vmatmul.mubr.f32.gmra.mrb[122].mxu0 %v8734_v0  ;;  %7142 = vmatmul.mubr.f32.gmra.mrb[94].mxu1 %v8734_v0 }
 0x239   : > { %6882 = vmatprep.mubr.f32.mxu0 %v8734_v0  ;;  %7144 = vmatprep.mubr.f32.mxu1 %v8734_v0 }
 0x23c   : > { %6883 = vmatmul.mubr.f32.gmra.mrb[124].mxu0 %v9193_v50  ;;  %7145 = vmatmul.mubr.f32.gmra.mrb[96].mxu1 %v9215_v58 }
 0x23d   : > { %6885 = vmatprep.mubr.f32.mxu0 %v9202_v53  ;;  %7147 = vmatprep.mubr.f32.mxu1 %v9222_v59 }
 0x240   : > { %6886 = vmatmul.mubr.f32.gmra.mrb[126].mxu0 %v8734_v0  ;;  %7148 = vmatmul.mubr.f32.gmra.mrb[98].mxu1 %v8734_v0 }
 0x241   : > { %6888 = vmatprep.mubr.f32.mxu0 %v8734_v0  ;;  %7150 = vmatprep.mubr.f32.mxu1 %v8734_v0 }
 0x244   : > { %6889 = vmatmul.mubr.f32.gmra.mrb[128].mxu0 %v9215_v58  ;;  %7151 = vmatmul.mubr.f32.gmra.mrb[100].mxu1 %v9229_v9 }
 0x245   : > { %6891 = vmatprep.mubr.f32.mxu0 %v9222_v59  ;;  %7153 = vmatprep.mubr.f32.mxu1 %v9236_v60 }
 0x248   : > { %6892 = vmatmul.mubr.f32.gmra.mrb[130].mxu0 %v8734_v0  ;;  %7154 = vmatmul.mubr.f32.gmra.mrb[102].mxu1 %v8734_v0 }
 0x249   : > { %6894 = vmatprep.mubr.f32.mxu0 %v8734_v0  ;;  %7156 = vmatprep.mubr.f32.mxu1 %v8734_v0 }
 0x24c   : > { %6895 = vmatmul.mubr.f32.gmra.mrb[132].mxu0 %v9229_v9  ;;  %7157 = vmatmul.mubr.f32.gmra.mrb[104].mxu1 %v9243_v62 }
 0x24d   : > { %6897 = vmatprep.mubr.f32.mxu0 %v9236_v60  ;;  %7159 = vmatprep.mubr.f32.mxu1 %v9252_v1 }
 0x250   : > { %6898 = vmatmul.mubr.f32.gmra.mrb[134].mxu0 %v8734_v0  ;;  %7160 = vmatmul.mubr.f32.gmra.mrb[106].mxu1 %v8734_v0 }
 0x251   : > { %6900 = vmatprep.mubr.f32.mxu0 %v8734_v0  ;;  %7162 = vmatprep.mubr.f32.mxu1 %v8734_v0 }
 0x254   : > { %6901 = vmatmul.mubr.f32.gmra.mrb[136].mxu0 %v9243_v62  ;;  %7163 = vmatmul.mubr.f32.gmra.mrb[108].mxu1 %v9259_v2 }
 0x255   : > { %6903 = vmatprep.mubr.f32.mxu0 %v9252_v1  ;;  %7165 = vmatprep.mubr.f32.mxu1 %v9266_v3 }
 0x257   : > { %v9424_v41 = vpop.f32.mrb[32].mxu0 }
 0x258   : > { %v9426_v43 = vpop.f32.mrb[33].mxu0  ;;  %6904 = vmatmul.mubr.f32.gmra.mrb[138].mxu0 %v8734_v0  ;;  %7166 = vmatmul.mubr.f32.gmra.mrb[110].mxu1 %v8734_v0 }
 0x259   : > { %6906 = vmatprep.mubr.f32.mxu0 %v8734_v0  ;;  %7168 = vmatprep.mubr.f32.mxu1 %v8734_v0 }
 0x25b   : > { %v6589_v44 = vpop.f32.mrb[34].mxu0  ;;  %v6723_v45 = vpop.f32.mrb[6].mxu1 }
 0x25c   : > { %v998_v47 = vpop.f32.mrb[35].mxu0  ;;  %v1386_v48 = vpop.f32.mrb[7].mxu1  ;;  %6907 = vmatmul.mubr.f32.gmra.mrb[140].mxu0 %v9259_v2  ;;  %7169 = vmatmul.mubr.f32.gmra.mrb[112].mxu1 %v9273_v4 }
 0x25d   : > { %v9435_v49 = vadd.f32 %v9247_v63, %v998_v47  ;;  %6909 = vmatprep.mubr.f32.mxu0 %v9266_v3  ;;  %7171 = vmatprep.mubr.f32.mxu1 %v9282_v12  ;;  %v9447_v63 = vpack.c.bf16 %v3639_v55, %v3638_v54  ;;  %v3206_v47 = vld [vmem:[#allocation8 + $0x310] sm:$0xff] }
 0x25f   : > { %v9439_v51 = vpop.f32.mrb[36].mxu0  ;;  %8041 = vmatprep.subr.bf16.mxu0 %v9447_v63 }
 0x260   : > { %v9441_v52 = vpop.f32.mrb[37].mxu0  ;;  %6910 = vmatmul.mubr.f32.gmra.mrb[142].mxu0 %v8734_v0  ;;  %7172 = vmatmul.mubr.f32.gmra.mrb[114].mxu1 %v8734_v0 }
 0x261   : > { %6912 = vmatprep.mubr.f32.mxu0 %v8734_v0  ;;  %7174 = vmatprep.mubr.f32.mxu1 %v8734_v0 }
 0x263   : > { %v6595_v56 = vpop.f32.mrb[38].mxu0  ;;  %v6729_v5 = vpop.f32.mrb[10].mxu1 }
 0x264   : > { %v1017_v7 = vpop.f32.mrb[39].mxu0  ;;  %v1405_v10 = vpop.f32.mrb[11].mxu1  ;;  %6913 = vmatmul.mubr.f32.gmra.mrb[144].mxu0 %v9273_v4  ;;  %7175 = vmatmul.mubr.f32.gmra.mrb[116].mxu1 %v9290_v13 }
 0x265   : > { %v9451_v19 = vadd.f32 %v1386_v48, %v1017_v7  ;;  %6915 = vmatprep.mubr.f32.mxu0 %v9282_v12  ;;  %7177 = vmatprep.mubr.f32.mxu1 %v9297_v14  ;;  %v3207_v48 = vld [vmem:[#allocation8 + $0x318] sm:$0xff] }
 0x266   : > { %v8012_v55 = vpack.c.bf16 %v3207_v48, %v3206_v47  ;;  %v3211_v47 = vld [vmem:[#allocation8 + $0x338] sm:$0xff] }
 0x267   : > { %v9456_v20 = vpop.f32.mrb[40].mxu0  ;;  %v3641_v48 = vld [vmem:[#allocation8 + $0x398] sm:$0xff] }
 0x268   : > { %v9458_v24 = vpop.f32.mrb[41].mxu0  ;;  %6916 = vmatmul.mubr.f32.gmra.mrb[146].mxu0 %v8734_v0  ;;  %7178 = vmatmul.mubr.f32.gmra.mrb[118].mxu1 %v8734_v0 }
 0x269   : > { %6918 = vmatprep.mubr.f32.mxu0 %v8734_v0  ;;  %7180 = vmatprep.mubr.f32.mxu1 %v8734_v0 }
 0x26b   : > { %v6601_v26 = vpop.f32.mrb[42].mxu0  ;;  %v6735_v27 = vpop.f32.mrb[14].mxu1 }
 0x26c   : > { %v1036_v29 = vpop.f32.mrb[43].mxu0  ;;  %v1424_v30 = vpop.f32.mrb[15].mxu1  ;;  %6919 = vmatmul.mubr.f32.gmra.mrb[148].mxu0 %v9290_v13  ;;  %7181 = vmatmul.mubr.f32.gmra.mrb[120].mxu1 %v9304_v15  ;;  %v3208_v26 = vld [vmem:[#allocation8 + $0x320] sm:$0xff]  ;;  %v3209_v27 = vld [vmem:[#allocation8 + $0x328] sm:$0xff] }
 0x26d   : > { %v9466_v31 = vadd.f32 %v1405_v10, %v1036_v29  ;;  %6921 = vmatprep.mubr.f32.mxu0 %v9297_v14  ;;  %7183 = vmatprep.mubr.f32.mxu1 %v9311_v17 }
 0x26f   : > { %v9470_v33 = vpop.f32.mrb[44].mxu0 }
 0x270   : > { %v9472_v34 = vpop.f32.mrb[45].mxu0  ;;  %6922 = vmatmul.mubr.f32.gmra.mrb[150].mxu0 %v8734_v0  ;;  %7184 = vmatmul.mubr.f32.gmra.mrb[122].mxu1 %v8734_v0 }
 0x271   : > { %6924 = vmatprep.mubr.f32.mxu0 %v8734_v0  ;;  %7186 = vmatprep.mubr.f32.mxu1 %v8734_v0 }
 0x273   : > { %v6607_v35 = vpop.f32.mrb[46].mxu0  ;;  %v6741_v37 = vpop.f32.mrb[18].mxu1 }
 0x274   : > { %v1055_v38 = vpop.f32.mrb[47].mxu0  ;;  %v1443_v40 = vpop.f32.mrb[19].mxu1  ;;  %6925 = vmatmul.mubr.f32.gmra.mrb[152].mxu0 %v9304_v15  ;;  %7187 = vmatmul.mubr.f32.gmra.mrb[124].mxu1 %v9318_v21  ;;  %v8016_v35 = vpack.c.bf16 %v3209_v27, %v3208_v26  ;;  %v3210_v37 = vld [vmem:[#allocation8 + $0x330] sm:$0xff] }
 0x275   : > { %v9480_v44 = vadd.f32 %v1424_v30, %v1055_v38  ;;  %6927 = vmatprep.mubr.f32.mxu0 %v9311_v17  ;;  %7189 = vmatprep.mubr.f32.mxu1 %v9325_v23 }
 0x277   : > { %10396 = vst [vmem:[#allocation17_spill] sm:$0xff] %v9480_v44  ;;  %v9484_v45 = vpop.f32.mrb[48].mxu0 }
 0x278   : > { %10397 = vst [vmem:[#allocation18_spill] sm:$0xff] %v9484_v45  ;;  %v9486_v54 = vpop.f32.mrb[49].mxu0  ;;  %6928 = vmatmul.mubr.f32.gmra.mrb[154].mxu0 %v8734_v0  ;;  %7190 = vmatmul.mubr.f32.gmra.mrb[126].mxu1 %v8734_v0 }
 0x279   : > { %10398 = vst [vmem:[#allocation19_spill] sm:$0xff] %v9486_v54  ;;  %6930 = vmatprep.mubr.f32.mxu0 %v8734_v0  ;;  %7224 = vmatprep.mubr.f32.mxu1 %v8734_v0  ;;  %v3643_v54 = vld [vmem:[#allocation8 + $0x3a8] sm:$0xff] }
 0x27b   : > { %v6613_v56 = vpop.f32.mrb[50].mxu0  ;;  %v6747_v5 = vpop.f32.mrb[22].mxu1 }
 0x27c   : > { %v1074_v7 = vpop.f32.mrb[51].mxu0  ;;  %v1462_v10 = vpop.f32.mrb[23].mxu1  ;;  %6931 = vmatmul.mubr.f32.gmra.mrb[156].mxu0 %v9318_v21  ;;  %7225 = vmatmul.mubr.f32.vlgmr.msra.gmra.mrb[64].mxu1 %v8734_v0  ;;  %v8020_v5 = vpack.c.bf16 %v3211_v47, %v3210_v37  ;;  %v3214_v47 = vld [vmem:[#allocation8 + $0x350] sm:$0xff] }
 0x27d   : > { %v9494_v29 = vadd.f32 %v1443_v40, %v1074_v7  ;;  %8011 = vmatpush3.bf16.msra.mxu1 %v9357_v8  ;;  %6933 = vmatprep.mubr.f32.mxu0 %v9325_v23  ;;  %v3640_v40 = vld [vmem:[#allocation8 + $0x390] sm:$0xff]  ;;  %v3212_v7 = vld [vmem:[#allocation8 + $0x340] sm:$0xff] }
 0x27e   : > { %7227 = vmatprep.mubr.f32.mxu1 %v8734_v0  ;;  %8013 = vmatprep.subr.bf16.mxu1 %v8012_v55  ;;  %v8044_v26 = vpack.c.bf16 %v3641_v48, %v3640_v40 }
 0x27f   : > { %10399 = vst [vmem:[#allocation20_spill] sm:$0xff] %v9494_v29  ;;  %v9499_v30 = vpop.f32.mrb[52].mxu0  ;;  %v3642_v29 = vld [vmem:[#allocation8 + $0x3a0] sm:$0xff] }
 0x280   : > { %10400 = vst [vmem:[#allocation21_spill] sm:$0xff] %v9499_v30  ;;  %v9501_v38 = vpop.f32.mrb[53].mxu0  ;;  %6934 = vmatmul.mubr.f32.gmra.mrb[158].mxu0 %v8734_v0  ;;  %7228 = vmatmul.mubr.f32.gmra.mrb[66].mxu1 %v8734_v0  ;;  %v3213_v30 = vld [vmem:[#allocation8 + $0x348] sm:$0xff]  ;;  %v8048_v40 = vpack.c.bf16 %v3643_v54, %v3642_v29  ;;  %v3216_v54 = vld [vmem:[#allocation8 + $0x360] sm:$0xff] }
 0x281   : > { %10401 = vst [vmem:[#allocation22_spill] sm:$0xff] %v9501_v38  ;;  %6968 = vmatprep.mubr.f32.mxu0 %v8734_v0  ;;  %7230 = vmatprep.mubr.f32.mxu1 %v8734_v0  ;;  %v8024_v37 = vpack.c.bf16 %v3213_v30, %v3212_v7 }
 0x282   : > { %8015 = vmatpush3.bf16.msra.mxu1 %v8012_v55 }
 0x283   : > { %v6619_v8 = vpop.f32.mrb[54].mxu0  ;;  %v6753_v56 = vpop.f32.mrb[26].mxu1  ;;  %8017 = vmatprep.subr.bf16.mxu1 %v8016_v35 }
 0x284   : > { %v1093_v27 = vpop.f32.mrb[55].mxu0  ;;  %v1481_v38 = vpop.f32.mrb[27].mxu1  ;;  %6969 = vmatmul.mubr.f32.vlgmr.msra.gmra.mrb[96].mxu0 %v8734_v0  ;;  %7231 = vmatmul.mubr.f32.gmra.mrb[68].mxu1 %v9051_v16  ;;  %v3644_v8 = vld [vmem:[#allocation8 + $0x3b0] sm:$0xff]  ;;  %v3645_v56 = vld [vmem:[#allocation8 + $0x3b8] sm:$0xff] }
 0x285   : > { %v9509_v45 = vadd.f32 %v1462_v10, %v1093_v27  ;;  %7233 = vmatprep.mubr.f32.mxu1 %v9053_v18  ;;  %6971 = vmatprep.mubr.f32.mxu0 %v8734_v0  ;;  %v3215_v10 = vld [vmem:[#allocation8 + $0x358] sm:$0xff]  ;;  %v8052_v29 = vpack.c.bf16 %v3645_v56, %v3644_v8  ;;  %v3648_v8 = vld [vmem:[#allocation8 + $0x3d0] sm:$0xff] }
 0x286   : > { %8019 = vmatpush3.bf16.msra.mxu1 %v8016_v35  ;;  %8043 = vmatpush3.bf16.msra.mxu0 %v9447_v63  ;;  %v8028_v35 = vpack.c.bf16 %v3215_v10, %v3214_v47  ;;  %v3218_v47 = vld [vmem:[#allocation8 + $0x370] sm:$0xff] }
 0x287   : > { %10402 = vst [vmem:[#allocation23_spill] sm:$0xff] %v9509_v45  ;;  %v9514_v55 = vpop.f32.mrb[56].mxu0  ;;  %8021 = vmatprep.subr.bf16.mxu1 %v8020_v5  ;;  %8045 = vmatprep.subr.bf16.mxu0 %v8044_v26  ;;  %v3647_v45 = vld [vmem:[#allocation8 + $0x3c8] sm:$0xff] }
 0x288   : > { %10403 = vst [vmem:[#allocation24_spill] sm:$0xff] %v9514_v55  ;;  %v9516_v48 = vpop.f32.mrb[57].mxu0  ;;  %6972 = vmatmul.mubr.f32.gmra.mrb[98].mxu0 %v8734_v0  ;;  %7234 = vmatmul.mubr.f32.gmra.mrb[70].mxu1 %v8734_v0  ;;  %v3646_v55 = vld [vmem:[#allocation8 + $0x3c0] sm:$0xff] }
 0x289   : > { %10404 = vst [vmem:[#allocation25_spill] sm:$0xff] %v9516_v48  ;;  %6974 = vmatprep.mubr.f32.mxu0 %v8734_v0  ;;  %7236 = vmatprep.mubr.f32.mxu1 %v8734_v0  ;;  %v3217_v48 = vld [vmem:[#allocation8 + $0x368] sm:$0xff] }
 0x28a   : > { %8023 = vmatpush3.bf16.msra.mxu1 %v8020_v5  ;;  %8047 = vmatpush3.bf16.msra.mxu0 %v8044_v26  ;;  %v8032_v26 = vpack.c.bf16 %v3217_v48, %v3216_v54  ;;  %v3650_v54 = vld [vmem:[#allocation8 + $0x3e0] sm:$0xff] }
 0x28b   : > { %v6625_v63 = vpop.f32.mrb[58].mxu0  ;;  %v6759_v30 = vpop.f32.mrb[30].mxu1  ;;  %8025 = vmatprep.subr.bf16.mxu1 %v8024_v37  ;;  %8049 = vmatprep.subr.bf16.mxu0 %v8048_v40 }
 0x28c   : > { %v1112_v7 = vpop.f32.mrb[59].mxu0  ;;  %v1500_v27 = vpop.f32.mrb[31].mxu1  ;;  %6975 = vmatmul.mubr.f32.gmra.mrb[100].mxu0 %v9051_v16  ;;  %7237 = vmatmul.mubr.f32.gmra.mrb[72].mxu1 %v9061_v28  ;;  %v8056_v16 = vpack.c.bf16 %v3647_v45, %v3646_v55  ;;  %v4040_v55 = vld [vmem:[#allocation8 + $0x400] sm:$0xff]  ;;  %v4041_v30 = vld [vmem:[#allocation8 + $0x408] sm:$0xff] }
 0x28d   : > { %v9524_v44 = vadd.f32 %v1481_v38, %v1112_v7  ;;  %6977 = vmatprep.mubr.f32.mxu0 %v9053_v18  ;;  %7239 = vmatprep.mubr.f32.mxu1 %v9067_v32  ;;  %v3219_v38 = vld [vmem:[#allocation8 + $0x378] sm:$0xff]  ;;  %v3651_v7 = vld [vmem:[#allocation8 + $0x3e8] sm:$0xff] }
 0x28e   : > { %8027 = vmatpush3.bf16.msra.mxu1 %v8024_v37  ;;  %8051 = vmatpush3.bf16.msra.mxu0 %v8048_v40  ;;  %v3649_v18 = vld [vmem:[#allocation8 + $0x3d8] sm:$0xff]  ;;  %v8036_v48 = vpack.c.bf16 %v3219_v38, %v3218_v47  ;;  %v8064_v47 = vpack.c.bf16 %v3651_v7, %v3650_v54 }
 0x28f   : > { %v9528_v5 = vpop.f32.mrb[60].mxu0  ;;  %8029 = vmatprep.subr.bf16.mxu1 %v8028_v35  ;;  %8053 = vmatprep.subr.bf16.mxu0 %v8052_v29  ;;  %v8060_v45 = vpack.c.bf16 %v3649_v18, %v3648_v8  ;;  %v3653_v8 = vld [vmem:[#allocation8 + $0x3f8] sm:$0xff] }
 0x290   : > { %v9530_v10 = vpop.f32.mrb[61].mxu0  ;;  %6978 = vmatmul.mubr.f32.gmra.mrb[102].mxu0 %v8734_v0  ;;  %7240 = vmatmul.mubr.f32.gmra.mrb[74].mxu1 %v8734_v0 }
 0x291   : > { %10405 = vst [vmem:[#allocation26_spill] sm:$0xff] %v9530_v10  ;;  %6980 = vmatprep.mubr.f32.mxu0 %v8734_v0  ;;  %7242 = vmatprep.mubr.f32.mxu1 %v8734_v0 }
 0x292   : > { %8031 = vmatpush3.bf16.msra.mxu1 %v8028_v35  ;;  %8055 = vmatpush3.bf16.msra.mxu0 %v8052_v29  ;;  %v9544_v29 = vpack.c.bf16 %v4041_v30, %v4040_v55 }
 0x293   : > { %v6631_v37 = vpop.f32.mrb[62].mxu0  ;;  %v6765_v40 = vpop.f32.mrb[34].mxu1  ;;  %8033 = vmatprep.subr.bf16.mxu1 %v8032_v26  ;;  %8057 = vmatprep.subr.bf16.mxu0 %v8056_v16 }
 0x294   : > { %v1131_v56 = vpop.f32.mrb[63].mxu0  ;;  %v1519_v63 = vpop.f32.mrb[35].mxu1  ;;  %6981 = vmatmul.mubr.f32.gmra.mrb[104].mxu0 %v9061_v28  ;;  %7243 = vmatmul.mubr.f32.gmra.mrb[76].mxu1 %v9075_v42 }
 0x295   : > { %v9538_v10 = vadd.f32 %v1500_v27, %v1131_v56  ;;  %6983 = vmatprep.mubr.f32.mxu0 %v9067_v32  ;;  %7245 = vmatprep.mubr.f32.mxu1 %v9081_v46  ;;  %v3652_v27 = vld [vmem:[#allocation8 + $0x3f0] sm:$0xff] }
 0x296   : > { %8035 = vmatpush3.bf16.msra.mxu1 %v8032_v26  ;;  %8059 = vmatpush3.bf16.msra.mxu0 %v8056_v16  ;;  %v8068_v18 = vpack.c.bf16 %v3653_v8, %v3652_v27 }
 0x297   : > { %v9542_v35 = vpop.f32.mrb[64].mxu0  ;;  %8037 = vmatprep.subr.bf16.mxu1 %v8036_v48  ;;  %8061 = vmatprep.subr.bf16.mxu0 %v8060_v45 }
 0x298   : > { %v9546_v38 = vpop.f32.mrb[65].mxu0  ;;  %6984 = vmatmul.mubr.f32.gmra.mrb[106].mxu0 %v8734_v0  ;;  %7246 = vmatmul.mubr.f32.gmra.mrb[78].mxu1 %v8734_v0 }
 0x299   : > { %6986 = vmatprep.mubr.f32.mxu0 %v8734_v0  ;;  %7248 = vmatprep.mubr.f32.mxu1 %v8734_v0 }
 0x29a   : > { %8039 = vmatpush3.bf16.msra.mxu1 %v8036_v48  ;;  %8063 = vmatpush3.bf16.msra.mxu0 %v8060_v45 }
 0x29b   : > { %v6637_v26 = vpop.f32.mrb[66].mxu0  ;;  %v6771_v16 = vpop.f32.mrb[38].mxu1  ;;  %8073 = vmatprep.subr.bf16.mxu1 %v9544_v29  ;;  %8065 = vmatprep.subr.bf16.mxu0 %v8064_v47 }
 0x29c   : > { %v1150_v37 = vpop.f32.mrb[67].mxu0  ;;  %v1538_v40 = vpop.f32.mrb[39].mxu1  ;;  %6987 = vmatmul.mubr.f32.gmra.mrb[108].mxu0 %v9075_v42  ;;  %7249 = vmatmul.mubr.f32.gmra.mrb[80].mxu1 %v9091_v57 }
 0x29d   : > { %v9555_v55 = vadd.f32 %v1519_v63, %v1150_v37  ;;  %6989 = vmatprep.mubr.f32.mxu0 %v9081_v46  ;;  %7251 = vmatprep.mubr.f32.mxu1 %v9099_v61 }
 0x29e   : > { %8067 = vmatpush3.bf16.msra.mxu0 %v8064_v47 }
 0x29f   : > { %v9559_v48 = vpop.f32.mrb[68].mxu0  ;;  %8069 = vmatprep.subr.bf16.mxu0 %v8068_v18 }
 0x2a0   : > { %v9561_v45 = vpop.f32.mrb[69].mxu0  ;;  %6990 = vmatmul.mubr.f32.gmra.mrb[110].mxu0 %v8734_v0  ;;  %7252 = vmatmul.mubr.f32.gmra.mrb[82].mxu1 %v8734_v0 }
 0x2a1   : > { %6992 = vmatprep.mubr.f32.mxu0 %v8734_v0  ;;  %7254 = vmatprep.mubr.f32.mxu1 %v8734_v0 }
 0x2a2   : > { %8071 = vmatpush3.bf16.msra.mxu0 %v8068_v18 }
 0x2a3   : > { %v6643_v56 = vpop.f32.mrb[70].mxu0  ;;  %v6777_v63 = vpop.f32.mrb[42].mxu1 }
 0x2a4   : > { %v1169_v30 = vpop.f32.mrb[71].mxu0  ;;  %v1557_v54 = vpop.f32.mrb[43].mxu1  ;;  %6993 = vmatmul.mubr.f32.gmra.mrb[112].mxu0 %v9091_v57  ;;  %7255 = vmatmul.mubr.f32.gmra.mrb[84].mxu1 %v9112_v6 }
 0x2a5   : > { %v9569_v7 = vadd.f32 %v1538_v40, %v1169_v30  ;;  %6995 = vmatprep.mubr.f32.mxu0 %v9099_v61  ;;  %7257 = vmatprep.mubr.f32.mxu1 %v9121_v11 }
 0x2a7   : > { %v9573_v47 = vpop.f32.mrb[72].mxu0 }
 0x2a8   : > { %v9575_v27 = vpop.f32.mrb[73].mxu0  ;;  %6996 = vmatmul.mubr.f32.gmra.mrb[114].mxu0 %v8734_v0  ;;  %7258 = vmatmul.mubr.f32.gmra.mrb[86].mxu1 %v8734_v0 }
 0x2a9   : > { %6998 = vmatprep.mubr.f32.mxu0 %v8734_v0  ;;  %7260 = vmatprep.mubr.f32.mxu1 %v8734_v0 }
 0x2ab   : > { %v6649_v8 = vpop.f32.mrb[74].mxu0  ;;  %v6783_v26 = vpop.f32.mrb[46].mxu1 }
 0x2ac   : > { %v1188_v16 = vpop.f32.mrb[75].mxu0  ;;  %v1576_v18 = vpop.f32.mrb[47].mxu1  ;;  %6999 = vmatmul.mubr.f32.gmra.mrb[116].mxu0 %v9112_v6  ;;  %7261 = vmatmul.mubr.f32.gmra.mrb[88].mxu1 %v9138_v22 }
 0x2ad   : > { %v9583_v37 = vadd.f32 %v1557_v54, %v1188_v16  ;;  %7001 = vmatprep.mubr.f32.mxu0 %v9121_v11  ;;  %7263 = vmatprep.mubr.f32.mxu1 %v9147_v25 }
 0x2af   : > { %v9587_v40 = vpop.f32.mrb[76].mxu0 }
 0x2b0   : > { %v9589_v56 = vpop.f32.mrb[77].mxu0  ;;  %7002 = vmatmul.mubr.f32.gmra.mrb[118].mxu0 %v8734_v0  ;;  %7264 = vmatmul.mubr.f32.gmra.mrb[90].mxu1 %v8734_v0 }
 0x2b1   : > { %10406 = vst [vmem:[#allocation27_spill] sm:$0xff] %v9589_v56  ;;  %7004 = vmatprep.mubr.f32.mxu0 %v8734_v0  ;;  %7266 = vmatprep.mubr.f32.mxu1 %v8734_v0 }
 0x2b3   : > { %v6655_v63 = vpop.f32.mrb[78].mxu0  ;;  %v6789_v30 = vpop.f32.mrb[50].mxu1 }
 0x2b4   : > { %v1207_v54 = vpop.f32.mrb[79].mxu0  ;;  %v1595_v8 = vpop.f32.mrb[51].mxu1  ;;  %7005 = vmatmul.mubr.f32.gmra.mrb[120].mxu0 %v9138_v22  ;;  %7267 = vmatmul.mubr.f32.gmra.mrb[92].mxu1 %v9165_v36 }
 0x2b5   : > { %v9597_v26 = vadd.f32 %v1576_v18, %v1207_v54  ;;  %7007 = vmatprep.mubr.f32.mxu0 %v9147_v25  ;;  %7269 = vmatprep.mubr.f32.mxu1 %v9174_v39 }
 0x2b7   : > { %10407 = vst [vmem:[#allocation28_spill] sm:$0xff] %v9597_v26  ;;  %v9601_v16 = vpop.f32.mrb[80].mxu0 }
 0x2b8   : > { %10408 = vst [vmem:[#allocation29_spill] sm:$0xff] %v9601_v16  ;;  %v9603_v56 = vpop.f32.mrb[81].mxu0  ;;  %7008 = vmatmul.mubr.f32.gmra.mrb[122].mxu0 %v8734_v0  ;;  %7270 = vmatmul.mubr.f32.gmra.mrb[94].mxu1 %v8734_v0 }
 0x2b9   : > { %10409 = vst [vmem:[#allocation30_spill] sm:$0xff] %v9603_v56  ;;  %7010 = vmatprep.mubr.f32.mxu0 %v8734_v0  ;;  %7272 = vmatprep.mubr.f32.mxu1 %v8734_v0 }
 0x2bb   : > { %v6661_v63 = vpop.f32.mrb[82].mxu0  ;;  %v6795_v30 = vpop.f32.mrb[54].mxu1 }
 0x2bc   : > { %v1226_v18 = vpop.f32.mrb[83].mxu0  ;;  %v1614_v54 = vpop.f32.mrb[55].mxu1  ;;  %7011 = vmatmul.mubr.f32.gmra.mrb[124].mxu0 %v9165_v36  ;;  %7273 = vmatmul.mubr.f32.gmra.mrb[96].mxu1 %v9193_v50 }
 0x2bd   : > { %v9611_v26 = vadd.f32 %v1595_v8, %v1226_v18  ;;  %7013 = vmatprep.mubr.f32.mxu0 %v9174_v39  ;;  %7275 = vmatprep.mubr.f32.mxu1 %v9202_v53 }
 0x2bf   : > { %10410 = vst [vmem:[#allocation31_spill] sm:$0xff] %v9611_v26  ;;  %v9615_v56 = vpop.f32.mrb[84].mxu0 }
 0x2c0   : > { %10411 = vst [vmem:[#allocation32_spill] sm:$0xff] %v9615_v56  ;;  %v9617_v16 = vpop.f32.mrb[85].mxu0  ;;  %7014 = vmatmul.mubr.f32.gmra.mrb[126].mxu0 %v8734_v0  ;;  %7276 = vmatmul.mubr.f32.gmra.mrb[98].mxu1 %v8734_v0 }
 0x2c1   : > { %10412 = vst [vmem:[#allocation33_spill] sm:$0xff] %v9617_v16  ;;  %7016 = vmatprep.mubr.f32.mxu0 %v8734_v0  ;;  %7278 = vmatprep.mubr.f32.mxu1 %v8734_v0 }
 0x2c3   : > { %v6667_v63 = vpop.f32.mrb[86].mxu0  ;;  %v6801_v30 = vpop.f32.mrb[58].mxu1 }
 0x2c4   : > { %v1245_v8 = vpop.f32.mrb[87].mxu0  ;;  %v1633_v18 = vpop.f32.mrb[59].mxu1  ;;  %7017 = vmatmul.mubr.f32.gmra.mrb[128].mxu0 %v9193_v50  ;;  %7279 = vmatmul.mubr.f32.gmra.mrb[100].mxu1 %v9215_v58 }
 0x2c5   : > { %v9625_v26 = vadd.f32 %v1614_v54, %v1245_v8  ;;  %7019 = vmatprep.mubr.f32.mxu0 %v9202_v53  ;;  %7281 = vmatprep.mubr.f32.mxu1 %v9222_v59 }
 0x2c7   : > { %10413 = vst [vmem:[#allocation34_spill] sm:$0xff] %v9625_v26  ;;  %v9629_v16 = vpop.f32.mrb[88].mxu0 }
 0x2c8   : > { %10414 = vst [vmem:[#allocation35_spill] sm:$0xff] %v9629_v16  ;;  %v9631_v56 = vpop.f32.mrb[89].mxu0  ;;  %7020 = vmatmul.mubr.f32.gmra.mrb[130].mxu0 %v8734_v0  ;;  %7282 = vmatmul.mubr.f32.gmra.mrb[102].mxu1 %v8734_v0 }
 0x2c9   : > { %10415 = vst [vmem:[#allocation36_spill] sm:$0xff] %v9631_v56  ;;  %7022 = vmatprep.mubr.f32.mxu0 %v8734_v0  ;;  %7284 = vmatprep.mubr.f32.mxu1 %v8734_v0 }
 0x2cb   : > { %v6673_v63 = vpop.f32.mrb[90].mxu0  ;;  %v6807_v30 = vpop.f32.mrb[62].mxu1 }
 0x2cc   : > { %v1264_v54 = vpop.f32.mrb[91].mxu0  ;;  %v1652_v8 = vpop.f32.mrb[63].mxu1  ;;  %7023 = vmatmul.mubr.f32.gmra.mrb[132].mxu0 %v9215_v58  ;;  %7285 = vmatmul.mubr.f32.gmra.mrb[104].mxu1 %v9229_v9 }
 0x2cd   : > { %v9639_v26 = vadd.f32 %v1633_v18, %v1264_v54  ;;  %7025 = vmatprep.mubr.f32.mxu0 %v9222_v59  ;;  %7287 = vmatprep.mubr.f32.mxu1 %v9236_v60  ;;  %v4043_v54 = vld [vmem:[#allocation8 + $0x418] sm:$0xff] }
 0x2cf   : > { %10416 = vst [vmem:[#allocation37_spill] sm:$0xff] %v9639_v26  ;;  %v9643_v56 = vpop.f32.mrb[92].mxu0  ;;  %v4049_v26 = vld [vmem:[#allocation8 + $0x448] sm:$0xff] }
 0x2d0   : > { %10417 = vst [vmem:[#allocation38_spill] sm:$0xff] %v9643_v56  ;;  %7026 = vmatmul.mubr.f32.gmra.mrb[134].mxu0 %v8734_v0  ;;  %7288 = vmatmul.mubr.f32.gmra.mrb[106].mxu1 %v8734_v0  ;;  %v9647_v63 = vpop.f32.mrb[93].mxu0  ;;  %v4046_v56 = vld [vmem:[#allocation8 + $0x430] sm:$0xff] }
 0x2d1   : > { %10418 = vst [vmem:[#allocation39_spill] sm:$0xff] %v9647_v63  ;;  %7028 = vmatprep.mubr.f32.mxu0 %v8734_v0  ;;  %7290 = vmatprep.mubr.f32.mxu1 %v8734_v0 }
 0x2d3   : > { %v6679_v30 = vpop.f32.mrb[94].mxu0 }
 0x2d4   : > { %v1283_v16 = vpop.f32.mrb[95].mxu0  ;;  %7029 = vmatmul.mubr.f32.gmra.mrb[136].mxu0 %v9229_v9  ;;  %7291 = vmatmul.mubr.f32.gmra.mrb[108].mxu1 %v9243_v62  ;;  %v4044_v30 = vld [vmem:[#allocation8 + $0x420] sm:$0xff] }
 0x2d5   : > { %v9653_v18 = vadd.f32 %v1652_v8, %v1283_v16  ;;  %7031 = vmatprep.mubr.f32.mxu0 %v9236_v60  ;;  %7293 = vmatprep.mubr.f32.mxu1 %v9252_v1  ;;  %v4042_v16 = vld [vmem:[#allocation8 + $0x410] sm:$0xff] }
 0x2d6   : > { %v8076_v8 = vpack.c.bf16 %v4043_v54, %v4042_v16  ;;  %v4047_v16 = vld [vmem:[#allocation8 + $0x438] sm:$0xff] }
 0x2d7   : > { %10419 = vst [vmem:[#allocation40_spill] sm:$0xff] %v9653_v18  ;;  %v4045_v18 = vld [vmem:[#allocation8 + $0x428] sm:$0xff]  ;;  %v8084_v54 = vpack.c.bf16 %v4047_v16, %v4046_v56 }
 0x2d8   : > { %7032 = vmatmul.mubr.f32.gmra.mrb[138].mxu0 %v8734_v0  ;;  %7294 = vmatmul.mubr.f32.gmra.mrb[110].mxu1 %v8734_v0  ;;  %v8080_v63 = vpack.c.bf16 %v4045_v18, %v4044_v30  ;;  %v4051_v30 = vld [vmem:[#allocation8 + $0x458] sm:$0xff]  ;;  %v4053_v16 = vld [vmem:[#allocation8 + $0x468] sm:$0xff] }
 0x2d9   : > { %7034 = vmatprep.mubr.f32.mxu0 %v8734_v0  ;;  %7296 = vmatprep.mubr.f32.mxu1 %v8734_v0 }
 0x2dc   : > { %7035 = vmatmul.mubr.f32.gmra.mrb[140].mxu0 %v9243_v62  ;;  %7297 = vmatmul.mubr.f32.gmra.mrb[112].mxu1 %v9259_v2 }
 0x2dd   : > { %7037 = vmatprep.mubr.f32.mxu0 %v9252_v1  ;;  %7299 = vmatprep.mubr.f32.mxu1 %v9266_v3 }
 0x2e0   : > { %7038 = vmatmul.mubr.f32.gmra.mrb[142].mxu0 %v8734_v0  ;;  %7300 = vmatmul.mubr.f32.gmra.mrb[114].mxu1 %v8734_v0 }
 0x2e1   : > { %7040 = vmatprep.mubr.f32.mxu0 %v8734_v0  ;;  %7302 = vmatprep.mubr.f32.mxu1 %v8734_v0 }
 0x2e4   : > { %7041 = vmatmul.mubr.f32.gmra.mrb[144].mxu0 %v9259_v2  ;;  %7303 = vmatmul.mubr.f32.gmra.mrb[116].mxu1 %v9273_v4 }
 0x2e5   : > { %7043 = vmatprep.mubr.f32.mxu0 %v9266_v3  ;;  %7305 = vmatprep.mubr.f32.mxu1 %v9282_v12 }
 0x2e8   : > { %7044 = vmatmul.mubr.f32.gmra.mrb[146].mxu0 %v8734_v0  ;;  %7306 = vmatmul.mubr.f32.gmra.mrb[118].mxu1 %v8734_v0 }
 0x2e9   : > { %7046 = vmatprep.mubr.f32.mxu0 %v8734_v0  ;;  %7308 = vmatprep.mubr.f32.mxu1 %v8734_v0 }
 0x2ec   : > { %7047 = vmatmul.mubr.f32.gmra.mrb[148].mxu0 %v9273_v4  ;;  %7309 = vmatmul.mubr.f32.gmra.mrb[120].mxu1 %v9290_v13 }
 0x2ed   : > { %7049 = vmatprep.mubr.f32.mxu0 %v9282_v12  ;;  %7311 = vmatprep.mubr.f32.mxu1 %v9297_v14 }
 0x2f0   : > { %7050 = vmatmul.mubr.f32.gmra.mrb[150].mxu0 %v8734_v0  ;;  %7312 = vmatmul.mubr.f32.gmra.mrb[122].mxu1 %v8734_v0 }
 0x2f1   : > { %7052 = vmatprep.mubr.f32.mxu0 %v8734_v0  ;;  %7314 = vmatprep.mubr.f32.mxu1 %v8734_v0 }
 0x2f4   : > { %7053 = vmatmul.mubr.f32.gmra.mrb[152].mxu0 %v9290_v13  ;;  %7315 = vmatmul.mubr.f32.gmra.mrb[124].mxu1 %v9304_v15 }
 0x2f5   : > { %7055 = vmatprep.mubr.f32.mxu0 %v9297_v14  ;;  %7317 = vmatprep.mubr.f32.mxu1 %v9311_v17 }
 0x2f8   : > { %7056 = vmatmul.mubr.f32.gmra.mrb[154].mxu0 %v8734_v0  ;;  %7318 = vmatmul.mubr.f32.gmra.mrb[126].mxu1 %v8734_v0 }
 0x2f9   : > { %7058 = vmatprep.mubr.f32.mxu0 %v8734_v0  ;;  %7352 = vmatprep.mubr.f32.mxu1 %v8734_v0 }
 0x2fc   : > { %7059 = vmatmul.mubr.f32.gmra.mrb[156].mxu0 %v9304_v15  ;;  %7353 = vmatmul.mubr.f32.vlgmr.msra.gmra.mrb[0].mxu1 %v9061_v28 }
 0x2fd   : > { %8075 = vmatpush3.bf16.msra.mxu1 %v9544_v29  ;;  %7061 = vmatprep.mubr.f32.mxu0 %v9311_v17  ;;  %v4048_v29 = vld [vmem:[#allocation8 + $0x440] sm:$0xff] }
 0x2fe   : > { %7355 = vmatprep.mubr.f32.mxu1 %v9067_v32  ;;  %8077 = vmatprep.subr.bf16.mxu1 %v8076_v8  ;;  %v8088_v18 = vpack.c.bf16 %v4049_v26, %v4048_v29  ;;  %v4055_v29 = vld [vmem:[#allocation8 + $0x478] sm:$0xff] }
 0x300   : > { %7062 = vmatmul.mubr.f32.gmra.mrb[158].mxu0 %v8734_v0  ;;  %7356 = vmatmul.mubr.f32.gmra.mrb[128].mxu1 %v8734_v0 }
 0x301   : > { %7358 = vmatprep.mubr.f32.mxu1 %v8734_v0  ;;  %7480 = vmatprep.mubr.f32.mxu0 %v8734_v0 }
 0x302   : > { %8079 = vmatpush3.bf16.msra.mxu1 %v8076_v8  ;;  %v4050_v8 = vld [vmem:[#allocation8 + $0x450] sm:$0xff] }
 0x303   : > { %8081 = vmatprep.subr.bf16.mxu1 %v8080_v63  ;;  %v8092_v56 = vpack.c.bf16 %v4051_v30, %v4050_v8 }
 0x304   : > { %7359 = vmatmul.mubr.f32.gmra.mrb[4].mxu1 %v9075_v42  ;;  %7481 = vmatmul.mubr.f32.vlgmr.msra.gmra.mrb[96].mxu0 %v9061_v28 }
 0x305   : > { %7361 = vmatprep.mubr.f32.mxu1 %v9081_v46  ;;  %7483 = vmatprep.mubr.f32.mxu0 %v9067_v32 }
 0x306   : > { %8083 = vmatpush3.bf16.msra.mxu1 %v8080_v63  ;;  %v4052_v63 = vld [vmem:[#allocation8 + $0x460] sm:$0xff] }
 0x307   : > { %8085 = vmatprep.subr.bf16.mxu1 %v8084_v54  ;;  %v8096_v26 = vpack.c.bf16 %v4053_v16, %v4052_v63 }
 0x308   : > { %7362 = vmatmul.mubr.f32.gmra.mrb[130].mxu1 %v8734_v0  ;;  %7484 = vmatmul.mubr.f32.gmra.mrb[98].mxu0 %v8734_v0 }
 0x309   : > { %7364 = vmatprep.mubr.f32.mxu1 %v8734_v0  ;;  %7486 = vmatprep.mubr.f32.mxu0 %v8734_v0 }
 0x30a   : > { %8087 = vmatpush3.bf16.msra.mxu1 %v8084_v54  ;;  %v4054_v54 = vld [vmem:[#allocation8 + $0x470] sm:$0xff] }
 0x30b   : > { %8089 = vmatprep.subr.bf16.mxu1 %v8088_v18  ;;  %v8100_v8 = vpack.c.bf16 %v4055_v29, %v4054_v54  ;;  %v5152_v29 = vld [vmem:[#allocation9 + $0x68] sm:$0xff] }
 0x30c   : > { %7365 = vmatmul.mubr.f32.gmra.mrb[8].mxu1 %v9091_v57  ;;  %7487 = vmatmul.mubr.f32.gmra.mrb[100].mxu0 %v9075_v42 }
 0x30d   : > { %7367 = vmatprep.mubr.f32.mxu1 %v9099_v61  ;;  %7489 = vmatprep.mubr.f32.mxu0 %v9081_v46 }
 0x30e   : > { %8091 = vmatpush3.bf16.msra.mxu1 %v8088_v18  ;;  %v5150_v18 = vld [vmem:[#allocation9 + $0x58] sm:$0xff] }
 0x30f   : > { %8093 = vmatprep.subr.bf16.mxu1 %v8092_v56 }
 0x310   : > { %7368 = vmatmul.mubr.f32.gmra.mrb[132].mxu1 %v8734_v0  ;;  %7490 = vmatmul.mubr.f32.gmra.mrb[102].mxu0 %v8734_v0 }
 0x311   : > { %7370 = vmatprep.mubr.f32.mxu1 %v8734_v0  ;;  %7492 = vmatprep.mubr.f32.mxu0 %v8734_v0 }
 0x312   : > { %8095 = vmatpush3.bf16.msra.mxu1 %v8092_v56 }
 0x313   : > { %8097 = vmatprep.subr.bf16.mxu1 %v8096_v26 }
 0x314   : > { %7371 = vmatmul.mubr.f32.gmra.mrb[12].mxu1 %v9112_v6  ;;  %7493 = vmatmul.mubr.f32.gmra.mrb[104].mxu0 %v9091_v57 }
 0x315   : > { %7373 = vmatprep.mubr.f32.mxu1 %v9121_v11  ;;  %7495 = vmatprep.mubr.f32.mxu0 %v9099_v61 }
 0x316   : > { %8099 = vmatpush3.bf16.msra.mxu1 %v8096_v26 }
 0x317   : > { %8101 = vmatprep.subr.bf16.mxu1 %v8100_v8 }
 0x318   : > { %7374 = vmatmul.mubr.f32.gmra.mrb[134].mxu1 %v8734_v0  ;;  %7496 = vmatmul.mubr.f32.gmra.mrb[106].mxu0 %v8734_v0 }
 0x319   : > { %7376 = vmatprep.mubr.f32.mxu1 %v8734_v0  ;;  %7498 = vmatprep.mubr.f32.mxu0 %v8734_v0 }
 0x31a   : > { %8103 = vmatpush3.bf16.msra.mxu1 %v8100_v8 }
 0x31c   : > { %7377 = vmatmul.mubr.f32.gmra.mrb[16].mxu1 %v9138_v22  ;;  %7499 = vmatmul.mubr.f32.gmra.mrb[108].mxu0 %v9112_v6 }
 0x31d   : > { %7379 = vmatprep.mubr.f32.mxu1 %v9147_v25  ;;  %7501 = vmatprep.mubr.f32.mxu0 %v9121_v11 }
 0x320   : > { %7380 = vmatmul.mubr.f32.gmra.mrb[136].mxu1 %v8734_v0  ;;  %7502 = vmatmul.mubr.f32.gmra.mrb[110].mxu0 %v8734_v0 }
 0x321   : > { %7382 = vmatprep.mubr.f32.mxu1 %v8734_v0  ;;  %7504 = vmatprep.mubr.f32.mxu0 %v8734_v0 }
 0x324   : > { %7383 = vmatmul.mubr.f32.gmra.mrb[20].mxu1 %v9165_v36  ;;  %7505 = vmatmul.mubr.f32.gmra.mrb[112].mxu0 %v9138_v22 }
 0x325   : > { %7385 = vmatprep.mubr.f32.mxu1 %v9174_v39  ;;  %7507 = vmatprep.mubr.f32.mxu0 %v9147_v25 }
 0x328   : > { %7386 = vmatmul.mubr.f32.gmra.mrb[138].mxu1 %v8734_v0  ;;  %7508 = vmatmul.mubr.f32.gmra.mrb[114].mxu0 %v8734_v0 }
 0x329   : > { %7388 = vmatprep.mubr.f32.mxu1 %v8734_v0  ;;  %7510 = vmatprep.mubr.f32.mxu0 %v8734_v0 }
 0x32c   : > { %7389 = vmatmul.mubr.f32.gmra.mrb[24].mxu1 %v9193_v50  ;;  %7511 = vmatmul.mubr.f32.gmra.mrb[116].mxu0 %v9165_v36 }
 0x32d   : > { %7391 = vmatprep.mubr.f32.mxu1 %v9202_v53  ;;  %7513 = vmatprep.mubr.f32.mxu0 %v9174_v39 }
 0x330   : > { %7392 = vmatmul.mubr.f32.gmra.mrb[140].mxu1 %v8734_v0  ;;  %7514 = vmatmul.mubr.f32.gmra.mrb[118].mxu0 %v8734_v0 }
 0x331   : > { %7394 = vmatprep.mubr.f32.mxu1 %v8734_v0  ;;  %7516 = vmatprep.mubr.f32.mxu0 %v8734_v0 }
 0x334   : > { %7395 = vmatmul.mubr.f32.gmra.mrb[28].mxu1 %v9215_v58  ;;  %7517 = vmatmul.mubr.f32.gmra.mrb[120].mxu0 %v9193_v50 }
 0x335   : > { %7397 = vmatprep.mubr.f32.mxu1 %v9222_v59  ;;  %7519 = vmatprep.mubr.f32.mxu0 %v9202_v53 }
 0x338   : > { %7398 = vmatmul.mubr.f32.gmra.mrb[142].mxu1 %v8734_v0  ;;  %7520 = vmatmul.mubr.f32.gmra.mrb[122].mxu0 %v8734_v0 }
 0x339   : > { %7400 = vmatprep.mubr.f32.mxu1 %v8734_v0  ;;  %7522 = vmatprep.mubr.f32.mxu0 %v8734_v0 }
 0x33c   : > { %7401 = vmatmul.mubr.f32.gmra.mrb[32].mxu1 %v9229_v9  ;;  %7523 = vmatmul.mubr.f32.gmra.mrb[124].mxu0 %v9215_v58 }
 0x33d   : > { %7403 = vmatprep.mubr.f32.mxu1 %v9236_v60  ;;  %7525 = vmatprep.mubr.f32.mxu0 %v9222_v59 }
 0x340   : > { %7404 = vmatmul.mubr.f32.gmra.mrb[144].mxu1 %v8734_v0  ;;  %7526 = vmatmul.mubr.f32.gmra.mrb[126].mxu0 %v8734_v0 }
 0x341   : > { %7406 = vmatprep.mubr.f32.mxu1 %v8734_v0  ;;  %7528 = vmatprep.mubr.f32.mxu0 %v8734_v0 }
 0x344   : > { %7407 = vmatmul.mubr.f32.gmra.mrb[36].mxu1 %v9243_v62  ;;  %7529 = vmatmul.mubr.f32.gmra.mrb[128].mxu0 %v9229_v9 }
 0x345   : > { %7409 = vmatprep.mubr.f32.mxu1 %v9252_v1  ;;  %7531 = vmatprep.mubr.f32.mxu0 %v9236_v60 }
 0x348   : > { %7410 = vmatmul.mubr.f32.gmra.mrb[146].mxu1 %v8734_v0  ;;  %7532 = vmatmul.mubr.f32.gmra.mrb[130].mxu0 %v8734_v0 }
 0x349   : > { %7412 = vmatprep.mubr.f32.mxu1 %v8734_v0  ;;  %7534 = vmatprep.mubr.f32.mxu0 %v8734_v0 }
 0x34c   : > { %7413 = vmatmul.mubr.f32.gmra.mrb[40].mxu1 %v9259_v2  ;;  %7535 = vmatmul.mubr.f32.gmra.mrb[132].mxu0 %v9243_v62 }
 0x34d   : > { %7415 = vmatprep.mubr.f32.mxu1 %v9266_v3  ;;  %7537 = vmatprep.mubr.f32.mxu0 %v9252_v1 }
 0x350   : > { %7416 = vmatmul.mubr.f32.gmra.mrb[148].mxu1 %v8734_v0  ;;  %7538 = vmatmul.mubr.f32.gmra.mrb[134].mxu0 %v8734_v0 }
 0x351   : > { %7418 = vmatprep.mubr.f32.mxu1 %v8734_v0  ;;  %7540 = vmatprep.mubr.f32.mxu0 %v8734_v0 }
 0x354   : > { %7419 = vmatmul.mubr.f32.gmra.mrb[44].mxu1 %v9273_v4  ;;  %7541 = vmatmul.mubr.f32.gmra.mrb[136].mxu0 %v9259_v2 }
 0x355   : > { %7421 = vmatprep.mubr.f32.mxu1 %v9282_v12  ;;  %7543 = vmatprep.mubr.f32.mxu0 %v9266_v3 }
 0x358   : > { %7422 = vmatmul.mubr.f32.gmra.mrb[150].mxu1 %v8734_v0  ;;  %7544 = vmatmul.mubr.f32.gmra.mrb[138].mxu0 %v8734_v0 }
 0x359   : > { %7424 = vmatprep.mubr.f32.mxu1 %v8734_v0  ;;  %7546 = vmatprep.mubr.f32.mxu0 %v8734_v0 }
 0x35c   : > { %7425 = vmatmul.mubr.f32.gmra.mrb[48].mxu1 %v9290_v13  ;;  %7547 = vmatmul.mubr.f32.gmra.mrb[140].mxu0 %v9273_v4 }
 0x35d   : > { %7427 = vmatprep.mubr.f32.mxu1 %v9297_v14  ;;  %7549 = vmatprep.mubr.f32.mxu0 %v9282_v12 }
 0x360   : > { %7428 = vmatmul.mubr.f32.gmra.mrb[152].mxu1 %v8734_v0  ;;  %7550 = vmatmul.mubr.f32.gmra.mrb[142].mxu0 %v8734_v0 }
 0x361   : > { %7430 = vmatprep.mubr.f32.mxu1 %v8734_v0  ;;  %7552 = vmatprep.mubr.f32.mxu0 %v8734_v0 }
 0x364   : > { %7431 = vmatmul.mubr.f32.gmra.mrb[52].mxu1 %v9304_v15  ;;  %7553 = vmatmul.mubr.f32.gmra.mrb[144].mxu0 %v9290_v13 }
 0x365   : > { %7433 = vmatprep.mubr.f32.mxu1 %v9311_v17  ;;  %7555 = vmatprep.mubr.f32.mxu0 %v9297_v14 }
 0x368   : > { %7434 = vmatmul.mubr.f32.gmra.mrb[154].mxu1 %v8734_v0  ;;  %7556 = vmatmul.mubr.f32.gmra.mrb[146].mxu0 %v8734_v0 }
 0x369   : > { %7436 = vmatprep.mubr.f32.mxu1 %v8734_v0  ;;  %7558 = vmatprep.mubr.f32.mxu0 %v8734_v0 }
 0x36c   : > { %7437 = vmatmul.mubr.f32.gmra.mrb[56].mxu1 %v9318_v21  ;;  %7559 = vmatmul.mubr.f32.gmra.mrb[148].mxu0 %v9304_v15 }
 0x36d   : > { %7439 = vmatprep.mubr.f32.mxu1 %v9325_v23  ;;  %7561 = vmatprep.mubr.f32.mxu0 %v9311_v17 }
 0x370   : > { %7440 = vmatmul.mubr.f32.gmra.mrb[156].mxu1 %v8734_v0  ;;  %7562 = vmatmul.mubr.f32.gmra.mrb[150].mxu0 %v8734_v0 }
 0x371   : > { %7442 = vmatprep.mubr.f32.mxu1 %v8734_v0  ;;  %7564 = vmatprep.mubr.f32.mxu0 %v8734_v0 }
 0x374   : > { %7443 = vmatmul.mubr.f32.gmra.mrb[60].mxu1 %v8734_v0  ;;  %7565 = vmatmul.mubr.f32.gmra.mrb[152].mxu0 %v9318_v21 }
 0x375   : > { %7567 = vmatprep.mubr.f32.mxu0 %v9325_v23  ;;  %7445 = vmatprep.mubr.f32.mxu1 %v8734_v0 }
 0x378   : > { %7446 = vmatmul.mubr.f32.gmra.mrb[158].mxu1 %v8734_v0  ;;  %7568 = vmatmul.mubr.f32.gmra.mrb[154].mxu0 %v8734_v0 }
 0x379   : > { %7570 = vmatprep.mubr.f32.mxu0 %v8734_v0  ;;  %7608 = vmatprep.mubr.f32.mxu1 %v8734_v0 }
 0x37c   : > { %7571 = vmatmul.mubr.f32.gmra.mrb[156].mxu0 %v8734_v0  ;;  %7609 = vmatmul.mubr.f32.vlgmr.msra.gmra.mrb[64].mxu1 %v9061_v28  ;;  %v5139_v28 = vld [vmem:[#allocation9] sm:$0xff] }
 0x37d   : > { %7611 = vmatprep.mubr.f32.mxu1 %v9067_v32  ;;  %7573 = vmatprep.mubr.f32.mxu0 %v8734_v0  ;;  %v5140_v32 = vld [vmem:[#allocation9 + $0x8] sm:$0xff] }
 0x380   : > { %7574 = vmatmul.mubr.f32.gmra.mrb[158].mxu0 %v8734_v0  ;;  %7612 = vmatmul.mubr.f32.gmra.mrb[66].mxu1 %v8734_v0 }
 0x381   : > { %7614 = vmatprep.mubr.f32.mxu1 %v8734_v0 }
 0x384   : > { %7615 = vmatmul.mubr.f32.gmra.mrb[68].mxu1 %v9075_v42  ;;  %v8104_v42 = vpack.c.bf16 %v5140_v32, %v5139_v28 }
 0x385   : > { %7617 = vmatprep.mubr.f32.mxu1 %v9081_v46  ;;  %v5141_v46 = vld [vmem:[#allocation9 + $0x10] sm:$0xff] }
 0x386   : > { %8105 = vmatprep.subr.bf16.mxu0 %v8104_v42 }
 0x387   : > { %8107 = vmatpush3.bf16.msra.mxu0 %v8104_v42 }
 0x388   : > { %7618 = vmatmul.mubr.f32.gmra.mrb[70].mxu1 %v8734_v0 }
 0x389   : > { %7620 = vmatprep.mubr.f32.mxu1 %v8734_v0 }
 0x38c   : > { %7621 = vmatmul.mubr.f32.gmra.mrb[72].mxu1 %v9091_v57  ;;  %v5142_v57 = vld [vmem:[#allocation9 + $0x18] sm:$0xff] }
 0x38d   : > { %7623 = vmatprep.mubr.f32.mxu1 %v9099_v61  ;;  %v8108_v61 = vpack.c.bf16 %v5142_v57, %v5141_v46  ;;  %v5153_v46 = vld [vmem:[#allocation9 + $0x70] sm:$0xff]  ;;  %v5154_v57 = vld [vmem:[#allocation9 + $0x78] sm:$0xff] }
 0x38f   : > { %8109 = vmatprep.subr.bf16.mxu0 %v8108_v61 }
 0x390   : > { %7624 = vmatmul.mubr.f32.gmra.mrb[74].mxu1 %v8734_v0  ;;  %8111 = vmatpush3.bf16.msra.mxu0 %v8108_v61 }
 0x391   : > { %7626 = vmatprep.mubr.f32.mxu1 %v8734_v0 }
 0x394   : > { %7627 = vmatmul.mubr.f32.gmra.mrb[76].mxu1 %v9112_v6  ;;  %v5143_v6 = vld [vmem:[#allocation9 + $0x20] sm:$0xff] }
 0x395   : > { %7629 = vmatprep.mubr.f32.mxu1 %v9121_v11  ;;  %v5144_v11 = vld [vmem:[#allocation9 + $0x28] sm:$0xff] }
 0x398   : > { %7630 = vmatmul.mubr.f32.gmra.mrb[78].mxu1 %v8734_v0 }
 0x399   : > { %7632 = vmatprep.mubr.f32.mxu1 %v8734_v0 }
 0x39c   : > { %7633 = vmatmul.mubr.f32.gmra.mrb[80].mxu1 %v9138_v22  ;;  %v8112_v22 = vpack.c.bf16 %v5144_v11, %v5143_v6 }
 0x39d   : > { %7635 = vmatprep.mubr.f32.mxu1 %v9147_v25  ;;  %v5145_v25 = vld [vmem:[#allocation9 + $0x30] sm:$0xff] }
 0x39e   : > { %8113 = vmatprep.subr.bf16.mxu0 %v8112_v22 }
 0x39f   : > { %8115 = vmatpush3.bf16.msra.mxu0 %v8112_v22 }
 0x3a0   : > { %7636 = vmatmul.mubr.f32.gmra.mrb[82].mxu1 %v8734_v0 }
 0x3a1   : > { %7638 = vmatprep.mubr.f32.mxu1 %v8734_v0 }
 0x3a4   : > { %7639 = vmatmul.mubr.f32.gmra.mrb[84].mxu1 %v9165_v36  ;;  %v5146_v36 = vld [vmem:[#allocation9 + $0x38] sm:$0xff] }
 0x3a5   : > { %7641 = vmatprep.mubr.f32.mxu1 %v9174_v39  ;;  %v8116_v39 = vpack.c.bf16 %v5146_v36, %v5145_v25 }
 0x3a7   : > { %8117 = vmatprep.subr.bf16.mxu0 %v8116_v39 }
 0x3a8   : > { %7642 = vmatmul.mubr.f32.gmra.mrb[86].mxu1 %v8734_v0  ;;  %8119 = vmatpush3.bf16.msra.mxu0 %v8116_v39 }
 0x3a9   : > { %7644 = vmatprep.mubr.f32.mxu1 %v8734_v0 }
 0x3ac   : > { %7645 = vmatmul.mubr.f32.gmra.mrb[88].mxu1 %v9193_v50 }
 0x3ad   : > { %7647 = vmatprep.mubr.f32.mxu1 %v9202_v53 }
 0x3b0   : > { %7648 = vmatmul.mubr.f32.gmra.mrb[90].mxu1 %v8734_v0 }
 0x3b1   : > { %7650 = vmatprep.mubr.f32.mxu1 %v8734_v0 }
 0x3b4   : > { %7651 = vmatmul.mubr.f32.gmra.mrb[92].mxu1 %v9215_v58 }
 0x3b5   : > { %7653 = vmatprep.mubr.f32.mxu1 %v9222_v59  ;;  %v5147_v59 = vld [vmem:[#allocation9 + $0x40] sm:$0xff] }
 0x3b8   : > { %7654 = vmatmul.mubr.f32.gmra.mrb[94].mxu1 %v8734_v0 }
 0x3b9   : > { %7656 = vmatprep.mubr.f32.mxu1 %v8734_v0 }
 0x3bc   : > { %7657 = vmatmul.mubr.f32.gmra.mrb[96].mxu1 %v9229_v9  ;;  %v5148_v9 = vld [vmem:[#allocation9 + $0x48] sm:$0xff] }
 0x3bd   : > { %7659 = vmatprep.mubr.f32.mxu1 %v9236_v60 }
 0x3c0   : > { %7660 = vmatmul.mubr.f32.gmra.mrb[98].mxu1 %v8734_v0 }
 0x3c1   : > { %7662 = vmatprep.mubr.f32.mxu1 %v8734_v0 }
 0x3c4   : > { %7663 = vmatmul.mubr.f32.gmra.mrb[100].mxu1 %v9243_v62  ;;  %v8120_v62 = vpack.c.bf16 %v5148_v9, %v5147_v59 }
 0x3c5   : > { %7665 = vmatprep.mubr.f32.mxu1 %v9252_v1 }
 0x3c6   : > { %8121 = vmatprep.subr.bf16.mxu0 %v8120_v62 }
 0x3c7   : > { %8123 = vmatpush3.bf16.msra.mxu0 %v8120_v62 }
 0x3c8   : > { %7666 = vmatmul.mubr.f32.gmra.mrb[102].mxu1 %v8734_v0 }
 0x3c9   : > { %7668 = vmatprep.mubr.f32.mxu1 %v8734_v0 }
 0x3cc   : > { %7669 = vmatmul.mubr.f32.gmra.mrb[104].mxu1 %v9259_v2 }
 0x3cd   : > { %7671 = vmatprep.mubr.f32.mxu1 %v9266_v3  ;;  %v5149_v3 = vld [vmem:[#allocation9 + $0x50] sm:$0xff] }
 0x3ce   : > { %v8124_v30 = vpack.c.bf16 %v5150_v18, %v5149_v3 }
 0x3cf   : > { %v7354_v50 = vpop.f32.mrb[0].mxu1 }
 0x3d0   : > { %v8136_v53 = vadd.f32 %v7354_v50, %v9424_v41  ;;  %v3286_v58 = vpop.f32.mrb[1].mxu1  ;;  %7672 = vmatmul.mubr.f32.gmra.mrb[106].mxu1 %v8734_v0  ;;  %8125 = vmatprep.subr.bf16.mxu0 %v8124_v30 }
 0x3d1   : > { %v8137_v60 = vadd.f32 %v3286_v58, %v9426_v43  ;;  %7674 = vmatprep.mubr.f32.mxu1 %v8734_v0  ;;  %8127 = vmatpush3.bf16.msra.mxu0 %v8124_v30 }
 0x3d3   : > { %v7357_v1 = vpop.f32.mrb[128].mxu1 }
 0x3d4   : > { %v3296_v2 = vpop.f32.mrb[129].mxu1  ;;  %7675 = vmatmul.mubr.f32.gmra.mrb[108].mxu1 %v9273_v4  ;;  %v5151_v4 = vld [vmem:[#allocation9 + $0x60] sm:$0xff] }
 0x3d5   : > { %v3591_v41 = vadd.f32 %v3296_v2, %v9435_v49  ;;  %7677 = vmatprep.mubr.f32.mxu1 %v9282_v12  ;;  %v8128_v49 = vpack.c.bf16 %v5152_v29, %v5151_v4 }
 0x3d7   : > { %v7360_v56 = vpop.f32.mrb[4].mxu1  ;;  %v7482_v63 = vpop.f32.mrb[96].mxu0  ;;  %8129 = vmatprep.subr.bf16.mxu0 %v8128_v49 }
 0x3d8   : > { %v8138_v43 = vadd.f32 %v7360_v56, %v9439_v51  ;;  %v4506_v16 = vrot.slane %v7482_v63, 1  ;;  %v3305_v26 = vpop.f32.mrb[5].mxu1  ;;  %v3720_v54 = vpop.f32.mrb[97].mxu0  ;;  %7678 = vmatmul.mubr.f32.gmra.mrb[110].mxu1 %v8734_v0  ;;  %8131 = vmatpush3.bf16.msra.mxu0 %v8128_v49 }
 0x3d9   : > { %v8139_v8 = vadd.f32 %v3305_v26, %v9441_v52  ;;  %7680 = vmatprep.mubr.f32.mxu1 %v8734_v0  ;;  %v8132_v52 = vpack.c.bf16 %v5154_v57, %v5153_v46 }
 0x3da   : > { %v9878_v12 = vadd.f32 %v8137_v60, %v4506_v16 }
 0x3db   : > { %v7363_v28 = vpop.f32.mrb[130].mxu1  ;;  %v7485_v32 = vpop.f32.mrb[98].mxu0  ;;  %8133 = vmatprep.subr.bf16.mxu0 %v8132_v52 }
 0x3dc   : > { %v3315_v42 = vpop.f32.mrb[131].mxu1  ;;  %v3729_v51 = vpop.f32.mrb[99].mxu0  ;;  %7681 = vmatmul.mubr.f32.gmra.mrb[112].mxu1 %v9290_v13  ;;  %8135 = vmatpush3.bf16.msra.mxu0 %v8132_v52 }
 0x3dd   : > { %v3594_v61 = vadd.f32 %v3315_v42, %v9451_v19  ;;  %v4507_v6 = vrot.slane %v3729_v51, 1  ;;  %7683 = vmatprep.mubr.f32.mxu1 %v9297_v14  ;;  %v10421_v42 = vld [vmem:[#allocation18_spill] sm:$0xff] }
 0x3df   : > { %v4508_v11 = vsel %vm4505_vm0, %v4506_v16, %v4507_v6  ;;  %v9884_v22 = vadd.f32 %v4507_v6, %v3591_v41  ;;  %v7366_v25 = vpop.f32.mrb[8].mxu1  ;;  %v7488_v36 = vpop.f32.mrb[100].mxu0 }
 0x3e0   : > { %v9886_v39 = vadd.f32 %v8136_v53, %v4508_v11  ;;  %v8140_v13 = vadd.f32 %v7366_v25, %v9456_v20  ;;  %v4509_v50 = vrot.slane %v7488_v36, 1  ;;  %v3324_v58 = vpop.f32.mrb[9].mxu1  ;;  %v3738_v59 = vpop.f32.mrb[101].mxu0  ;;  %7684 = vmatmul.mubr.f32.gmra.mrb[114].mxu1 %v8734_v0 }
 0x3e1   : > { %v8141_v14 = vadd.f32 %v3324_v58, %v9458_v24  ;;  %7686 = vmatprep.mubr.f32.mxu1 %v8734_v0 }
 0x3e2   : > { %v9892_v19 = vadd.f32 %v8139_v8, %v4509_v50 }
 0x3e3   : > { %v7369_v9 = vpop.f32.mrb[132].mxu1  ;;  %v7491_v60 = vpop.f32.mrb[102].mxu0 }
 0x3e4   : > { %v3334_v62 = vpop.f32.mrb[133].mxu1  ;;  %v3747_v1 = vpop.f32.mrb[103].mxu0  ;;  %7687 = vmatmul.mubr.f32.gmra.mrb[116].mxu1 %v9304_v15 }
 0x3e5   : > { %v3597_v20 = vadd.f32 %v3334_v62, %v9466_v31  ;;  %v4510_v53 = vrot.slane %v3747_v1, 1  ;;  %7689 = vmatprep.mubr.f32.mxu1 %v9311_v17  ;;  %v10424_v1 = vld [vmem:[#allocation21_spill] sm:$0xff] }
 0x3e7   : > { %v4511_v2 = vsel %vm4505_vm0, %v4509_v50, %v4510_v53  ;;  %v9898_v3 = vadd.f32 %v4510_v53, %v3594_v61  ;;  %v7372_v24 = vpop.f32.mrb[12].mxu1  ;;  %v7494_v18 = vpop.f32.mrb[104].mxu0 }
 0x3e8   : > { %v9900_v41 = vadd.f32 %v8138_v43, %v4511_v2  ;;  %v8142_v30 = vadd.f32 %v7372_v24, %v9470_v33  ;;  %v4512_v56 = vrot.slane %v7494_v18, 1  ;;  %v3343_v63 = vpop.f32.mrb[13].mxu1  ;;  %v3756_v16 = vpop.f32.mrb[105].mxu0  ;;  %7690 = vmatmul.mubr.f32.gmra.mrb[118].mxu1 %v8734_v0  ;;  %v10420_v43 = vld [vmem:[#allocation17_spill] sm:$0xff]  ;;  %v10425_v18 = vld [vmem:[#allocation22_spill] sm:$0xff] }
 0x3e9   : > { %v8143_v15 = vadd.f32 %v3343_v63, %v9472_v34  ;;  %7692 = vmatprep.mubr.f32.mxu1 %v8734_v0 }
 0x3ea   : > { %v9906_v17 = vadd.f32 %v8141_v14, %v4512_v56 }
 0x3eb   : > { %v7375_v31 = vpop.f32.mrb[134].mxu1  ;;  %v7497_v26 = vpop.f32.mrb[106].mxu0 }
 0x3ec   : > { %v3353_v54 = vpop.f32.mrb[135].mxu1  ;;  %v3765_v4 = vpop.f32.mrb[107].mxu0  ;;  %7693 = vmatmul.mubr.f32.gmra.mrb[120].mxu1 %v9318_v21  ;;  %v10422_v21 = vld [vmem:[#allocation19_spill] sm:$0xff] }
 0x3ed   : > { %v3600_v29 = vadd.f32 %v3353_v54, %v10420_v43  ;;  %v4513_v33 = vrot.slane %v3765_v4, 1  ;;  %7695 = vmatprep.mubr.f32.mxu1 %v9325_v23  ;;  %v10426_v54 = vld [vmem:[#allocation23_spill] sm:$0xff] }
 0x3ef   : > { %v4514_v8 = vsel %vm4505_vm0, %v4512_v56, %v4513_v33  ;;  %v9912_v49 = vadd.f32 %v4513_v33, %v3597_v20  ;;  %v7378_v34 = vpop.f32.mrb[16].mxu1  ;;  %v7500_v28 = vpop.f32.mrb[108].mxu0 }
 0x3f0   : > { %v9914_v32 = vadd.f32 %v8140_v13, %v4514_v8  ;;  %v8144_v51 = vadd.f32 %v7378_v34, %v10421_v42  ;;  %v4515_v46 = vrot.slane %v7500_v28, 1  ;;  %v3362_v57 = vpop.f32.mrb[17].mxu1  ;;  %v3774_v61 = vpop.f32.mrb[109].mxu0  ;;  %7696 = vmatmul.mubr.f32.gmra.mrb[122].mxu1 %v8734_v0  ;;  %v10423_v13 = vld [vmem:[#allocation20_spill] sm:$0xff] }
 0x3f1   : > { %v8145_v6 = vadd.f32 %v3362_v57, %v10422_v21  ;;  %7698 = vmatprep.mubr.f32.mxu1 %v8734_v0  ;;  %v10428_v61 = vld [vmem:[#allocation25_spill] sm:$0xff] }
 0x3f2   : > { %v9920_v23 = vadd.f32 %v8143_v15, %v4515_v46 }
 0x3f3   : > { %v7381_v52 = vpop.f32.mrb[136].mxu1  ;;  %v7503_v11 = vpop.f32.mrb[110].mxu0 }
 0x3f4   : > { %v3372_v25 = vpop.f32.mrb[137].mxu1  ;;  %v3783_v36 = vpop.f32.mrb[111].mxu0  ;;  %7699 = vmatmul.mubr.f32.gmra.mrb[124].mxu1 %v8734_v0 }
 0x3f5   : > { %v3603_v50 = vadd.f32 %v3372_v25, %v10423_v13  ;;  %v4516_v58 = vrot.slane %v3783_v36, 1  ;;  %7701 = vmatprep.mubr.f32.mxu1 %v8734_v0 }
 0x3f7   : > { %v4517_v59 = vsel %vm4505_vm0, %v4515_v46, %v4516_v58  ;;  %v9926_v14 = vadd.f32 %v4516_v58, %v3600_v29  ;;  %v7384_v9 = vpop.f32.mrb[20].mxu1  ;;  %v7506_v60 = vpop.f32.mrb[112].mxu0 }
 0x3f8   : > { %v9928_v62 = vadd.f32 %v8142_v30, %v4517_v59  ;;  %v8146_v20 = vadd.f32 %v7384_v9, %v10424_v1  ;;  %v4518_v53 = vrot.slane %v7506_v60, 1  ;;  %v3381_v2 = vpop.f32.mrb[21].mxu1  ;;  %v3792_v24 = vpop.f32.mrb[113].mxu0  ;;  %7702 = vmatmul.mubr.f32.gmra.mrb[126].mxu1 %v8734_v0  ;;  %v10427_v0 = vld [vmem:[#allocation24_spill] sm:$0xff] }
 0x3f9   : > { %v8147_v56 = vadd.f32 %v3381_v2, %v10425_v18  ;;  %v10429_v18 = vld [vmem:[#allocation26_spill] sm:$0xff] }
 0x3fa   : > { %v9933_v63 = vadd.f32 %v8145_v6, %v4518_v53 }
 0x3fb   : > { %v7387_v16 = vpop.f32.mrb[138].mxu1  ;;  %v7509_v15 = vpop.f32.mrb[114].mxu0 }
 0x3fc   : > { %v3391_v31 = vpop.f32.mrb[139].mxu1  ;;  %v3801_v26 = vpop.f32.mrb[115].mxu0 }
 0x3fd   : > { %v3606_v4 = vadd.f32 %v3391_v31, %v10426_v54  ;;  %v4519_v43 = vrot.slane %v3801_v26, 1 }
 0x3ff   : > { %v4520_v30 = vsel %vm4505_vm0, %v4518_v53, %v4519_v43  ;;  %v9937_v29 = vadd.f32 %v4519_v43, %v3603_v50  ;;  %v7390_v33 = vpop.f32.mrb[24].mxu1  ;;  %v7512_v8 = vpop.f32.mrb[116].mxu0 }
 0x400   : > { %v9939_v34 = vadd.f32 %v8144_v51, %v4520_v30  ;;  %v8148_v28 = vadd.f32 %v7390_v33, %v10427_v0  ;;  %v4521_v42 = vrot.slane %v7512_v8, 1  ;;  %v3400_v46 = vpop.f32.mrb[25].mxu1  ;;  %v3810_v57 = vpop.f32.mrb[117].mxu0 }
 0x401   : > { %v8149_v21 = vadd.f32 %v3400_v46, %v10428_v61 }
 0x402   : > { %v9943_v6 = vadd.f32 %v8147_v56, %v4521_v42 }
 0x403   : > { %v7393_v52 = vpop.f32.mrb[140].mxu1  ;;  %v7515_v11 = vpop.f32.mrb[118].mxu0 }
 0x404   : > { %v3410_v25 = vpop.f32.mrb[141].mxu1  ;;  %v3819_v36 = vpop.f32.mrb[119].mxu0 }
 0x405   : > { %v3609_v13 = vadd.f32 %v3410_v25, %v9524_v44  ;;  %v4522_v50 = vrot.slane %v3819_v36, 1 }
 0x407   : > { %v4523_v58 = vsel %vm4505_vm0, %v4521_v42, %v4522_v50  ;;  %v9947_v51 = vadd.f32 %v4522_v50, %v3606_v4  ;;  %v7396_v59 = vpop.f32.mrb[28].mxu1  ;;  %v7518_v9 = vpop.f32.mrb[120].mxu0 }
 0x408   : > { %v9949_v60 = vadd.f32 %v8146_v20, %v4523_v58  ;;  %v8150_v1 = vadd.f32 %v7396_v59, %v9528_v5  ;;  %v4524_v53 = vrot.slane %v7518_v9, 1  ;;  %v3419_v2 = vpop.f32.mrb[29].mxu1  ;;  %v3828_v24 = vpop.f32.mrb[121].mxu0 }
 0x409   : > { %v8151_v56 = vadd.f32 %v3419_v2, %v10429_v18 }
 0x40a   : > { %v9953_v16 = vadd.f32 %v8149_v21, %v4524_v53 }
 0x40b   : > { %v7399_v15 = vpop.f32.mrb[142].mxu1  ;;  %v7521_v44 = vpop.f32.mrb[122].mxu0 }
 0x40c   : > { %v3429_v31 = vpop.f32.mrb[143].mxu1  ;;  %v3837_v26 = vpop.f32.mrb[123].mxu0 }
 0x40d   : > { %v3612_v54 = vadd.f32 %v3429_v31, %v9538_v10  ;;  %v4525_v4 = vrot.slane %v3837_v26, 1 }
 0x40f   : > { %v4526_v43 = vsel %vm4505_vm0, %v4524_v53, %v4525_v4  ;;  %v9957_v20 = vadd.f32 %v4525_v4, %v3609_v13  ;;  %v7402_v30 = vpop.f32.mrb[32].mxu1  ;;  %v7524_v5 = vpop.f32.mrb[124].mxu0 }
 0x410   : > { %v9959_v33 = vadd.f32 %v8148_v28, %v4526_v43  ;;  %v8152_v8 = vadd.f32 %v7402_v30, %v9542_v35  ;;  %v4527_v0 = vrot.slane %v7524_v5, 1  ;;  %v3438_v42 = vpop.f32.mrb[33].mxu1  ;;  %v3846_v46 = vpop.f32.mrb[125].mxu0 }
 0x411   : > { %v8153_v57 = vadd.f32 %v3438_v42, %v9546_v38 }
 0x412   : > { %v9963_v61 = vadd.f32 %v8151_v56, %v4527_v0 }
 0x413   : > { %v7405_v21 = vpop.f32.mrb[144].mxu1  ;;  %v7527_v10 = vpop.f32.mrb[126].mxu0 }
 0x414   : > { %v3448_v52 = vpop.f32.mrb[145].mxu1  ;;  %v3855_v11 = vpop.f32.mrb[127].mxu0 }
 0x415   : > { %v3615_v25 = vadd.f32 %v3448_v52, %v9555_v55  ;;  %v4528_v36 = vrot.slane %v3855_v11, 1 }
 0x417   : > { %v4529_v13 = vsel %vm4505_vm0, %v4527_v0, %v4528_v36  ;;  %v9967_v28 = vadd.f32 %v4528_v36, %v3612_v54  ;;  %v7408_v50 = vpop.f32.mrb[36].mxu1  ;;  %v7530_v35 = vpop.f32.mrb[128].mxu0 }
 0x418   : > { %v9969_v58 = vadd.f32 %v8150_v1, %v4529_v13  ;;  %v8154_v59 = vadd.f32 %v7408_v50, %v9559_v48  ;;  %v4530_v38 = vrot.slane %v7530_v35, 1  ;;  %v3457_v9 = vpop.f32.mrb[37].mxu1  ;;  %v3864_v53 = vpop.f32.mrb[129].mxu0 }
 0x419   : > { %v8155_v2 = vadd.f32 %v3457_v9, %v9561_v45 }
 0x41a   : > { %v9973_v24 = vadd.f32 %v8153_v57, %v4530_v38 }
 0x41b   : > { %v7411_v18 = vpop.f32.mrb[146].mxu1  ;;  %v7533_v55 = vpop.f32.mrb[130].mxu0 }
 0x41c   : > { %v3467_v56 = vpop.f32.mrb[147].mxu1  ;;  %v3873_v15 = vpop.f32.mrb[131].mxu0 }
 0x41d   : > { %v3618_v44 = vadd.f32 %v3467_v56, %v9569_v7  ;;  %v4531_v31 = vrot.slane %v3873_v15, 1  ;;  %v10431_v56 = vld [vmem:[#allocation28_spill] sm:$0xff] }
 0x41f   : > { %v4532_v26 = vsel %vm4505_vm0, %v4530_v38, %v4531_v31  ;;  %v9977_v1 = vadd.f32 %v4531_v31, %v3615_v25  ;;  %v7414_v54 = vpop.f32.mrb[40].mxu1  ;;  %v7536_v48 = vpop.f32.mrb[132].mxu0  ;;  %v10430_v38 = vld [vmem:[#allocation27_spill] sm:$0xff] }
 0x420   : > { %v9979_v4 = vadd.f32 %v8152_v8, %v4532_v26  ;;  %v8156_v43 = vadd.f32 %v7414_v54, %v9573_v47  ;;  %v4533_v45 = vrot.slane %v7536_v48, 1  ;;  %v3476_v30 = vpop.f32.mrb[41].mxu1  ;;  %v3882_v5 = vpop.f32.mrb[133].mxu0  ;;  %v10432_v48 = vld [vmem:[#allocation29_spill] sm:$0xff] }
 0x421   : > { %v8157_v0 = vadd.f32 %v3476_v30, %v9575_v27 }
 0x422   : > { %v9983_v42 = vadd.f32 %v8155_v2, %v4533_v45 }
 0x423   : > { %v7417_v46 = vpop.f32.mrb[148].mxu1  ;;  %v7539_v7 = vpop.f32.mrb[134].mxu0 }
 0x424   : > { %v3486_v57 = vpop.f32.mrb[149].mxu1  ;;  %v3891_v21 = vpop.f32.mrb[135].mxu0  ;;  %v10433_v46 = vld [vmem:[#allocation30_spill] sm:$0xff] }
 0x425   : > { %v3621_v10 = vadd.f32 %v3486_v57, %v9583_v37  ;;  %v4534_v52 = vrot.slane %v3891_v21, 1 }
 0x427   : > { %v4535_v11 = vsel %vm4505_vm0, %v4533_v45, %v4534_v52  ;;  %v9987_v8 = vadd.f32 %v4534_v52, %v3618_v44  ;;  %v7420_v25 = vpop.f32.mrb[44].mxu1  ;;  %v7542_v47 = vpop.f32.mrb[136].mxu0 }
 0x428   : > { %v9989_v36 = vadd.f32 %v8154_v59, %v4535_v11  ;;  %v8158_v13 = vadd.f32 %v7420_v25, %v9587_v40  ;;  %v4536_v27 = vrot.slane %v7542_v47, 1  ;;  %v3495_v50 = vpop.f32.mrb[45].mxu1  ;;  %v3900_v35 = vpop.f32.mrb[137].mxu0  ;;  %v10434_v47 = vld [vmem:[#allocation31_spill] sm:$0xff] }
 0x429   : > { %v8159_v9 = vadd.f32 %v3495_v50, %v10430_v38 }
 0x42a   : > { %v9993_v53 = vadd.f32 %v8157_v0, %v4536_v27 }
 0x42b   : > { %v7423_v2 = vpop.f32.mrb[150].mxu1  ;;  %v7545_v37 = vpop.f32.mrb[138].mxu0 }
 0x42c   : > { %v3505_v18 = vpop.f32.mrb[151].mxu1  ;;  %v3909_v55 = vpop.f32.mrb[139].mxu0  ;;  %v10435_v37 = vld [vmem:[#allocation32_spill] sm:$0xff] }
 0x42d   : > { %v3624_v15 = vadd.f32 %v3505_v18, %v10431_v56  ;;  %v4537_v44 = vrot.slane %v3909_v55, 1 }
 0x42f   : > { %v4538_v31 = vsel %vm4505_vm0, %v4536_v27, %v4537_v44  ;;  %v9997_v59 = vadd.f32 %v4537_v44, %v3621_v10  ;;  %v7426_v26 = vpop.f32.mrb[48].mxu1  ;;  %v7548_v40 = vpop.f32.mrb[140].mxu0  ;;  %v10436_v44 = vld [vmem:[#allocation33_spill] sm:$0xff] }
 0x430   : > { %v9999_v54 = vadd.f32 %v8156_v43, %v4538_v31  ;;  %v8160_v45 = vadd.f32 %v7426_v26, %v10432_v48  ;;  %v4539_v30 = vrot.slane %v7548_v40, 1  ;;  %v3514_v5 = vpop.f32.mrb[49].mxu1  ;;  %v3918_v0 = vpop.f32.mrb[141].mxu0 }
 0x431   : > { %v8161_v7 = vadd.f32 %v3514_v5, %v10433_v46 }
 0x432   : > { %v10003_v57 = vadd.f32 %v8159_v9, %v4539_v30 }
 0x433   : > { %v7429_v21 = vpop.f32.mrb[152].mxu1  ;;  %v7551_v52 = vpop.f32.mrb[142].mxu0 }
 0x434   : > { %v3524_v11 = vpop.f32.mrb[153].mxu1  ;;  %v3927_v25 = vpop.f32.mrb[143].mxu0 }
 0x435   : > { %v3627_v10 = vadd.f32 %v3524_v11, %v10434_v47  ;;  %v4540_v27 = vrot.slane %v3927_v25, 1  ;;  %v10438_v47 = vld [vmem:[#allocation35_spill] sm:$0xff] }
 0x437   : > { %v4541_v50 = vsel %vm4505_vm0, %v4539_v30, %v4540_v27  ;;  %v10007_v43 = vadd.f32 %v4540_v27, %v3624_v15  ;;  %v7432_v35 = vpop.f32.mrb[52].mxu1  ;;  %v7554_v38 = vpop.f32.mrb[144].mxu0  ;;  %v10437_v30 = vld [vmem:[#allocation34_spill] sm:$0xff] }
 0x438   : > { %v10009_v2 = vadd.f32 %v8158_v13, %v4541_v50  ;;  %v8162_v18 = vadd.f32 %v7432_v35, %v10435_v37  ;;  %v4542_v55 = vrot.slane %v7554_v38, 1  ;;  %v3533_v9 = vpop.f32.mrb[53].mxu1  ;;  %v3936_v56 = vpop.f32.mrb[145].mxu0  ;;  %v10439_v38 = vld [vmem:[#allocation36_spill] sm:$0xff] }
 0x439   : > { %v8163_v31 = vadd.f32 %v3533_v9, %v10436_v44 }
 0x43a   : > { %v10013_v26 = vadd.f32 %v8161_v7, %v4542_v55 }
 0x43b   : > { %v7435_v40 = vpop.f32.mrb[154].mxu1  ;;  %v7557_v48 = vpop.f32.mrb[146].mxu0 }
 0x43c   : > { %v3543_v5 = vpop.f32.mrb[155].mxu1  ;;  %v3945_v0 = vpop.f32.mrb[147].mxu0 }
 0x43d   : > { %v3630_v15 = vadd.f32 %v3543_v5, %v10437_v30  ;;  %v4543_v46 = vrot.slane %v3945_v0, 1 }
 0x43f   : > { %v4544_v21 = vsel %vm4505_vm0, %v4542_v55, %v4543_v46  ;;  %v10017_v13 = vadd.f32 %v4543_v46, %v3627_v10  ;;  %v7438_v52 = vpop.f32.mrb[56].mxu1  ;;  %v7560_v11 = vpop.f32.mrb[148].mxu0  ;;  %v10440_v55 = vld [vmem:[#allocation37_spill] sm:$0xff] }
 0x440   : > { %v10019_v25 = vadd.f32 %v8160_v45, %v4544_v21  ;;  %v8164_v27 = vadd.f32 %v7438_v52, %v10438_v47  ;;  %v4545_v50 = vrot.slane %v7560_v11, 1  ;;  %v3552_v7 = vpop.f32.mrb[57].mxu1  ;;  %v3954_v35 = vpop.f32.mrb[149].mxu0  ;;  %v10442_v52 = vld [vmem:[#allocation38_spill] sm:$0xff] }
 0x441   : > { %v8165_v37 = vadd.f32 %v3552_v7, %v10439_v38  ;;  %v10443_v35 = vld [vmem:[#allocation39_spill] sm:$0xff] }
 0x442   : > { %v10023_v9 = vadd.f32 %v8163_v31, %v4545_v50 }
 0x443   : > { %v7441_v56 = vpop.f32.mrb[156].mxu1  ;;  %v7563_v44 = vpop.f32.mrb[150].mxu0 }
 0x444   : > { %v3562_v40 = vpop.f32.mrb[157].mxu1  ;;  %v3963_v48 = vpop.f32.mrb[151].mxu0 }
 0x445   : > { %v3633_v10 = vadd.f32 %v3562_v40, %v10440_v55  ;;  %v4546_v5 = vrot.slane %v3963_v48, 1 }
 0x447   : > { %v4547_v0 = vsel %vm4505_vm0, %v4545_v50, %v4546_v5  ;;  %v10027_v45 = vadd.f32 %v4546_v5, %v3630_v15  ;;  %v7444_v30 = vpop.f32.mrb[60].mxu1  ;;  %v7566_v46 = vpop.f32.mrb[152].mxu0  ;;  %v10444_v50 = vld [vmem:[#allocation40_spill] sm:$0xff] }
 0x448   : > { %v10029_v21 = vadd.f32 %v8162_v18, %v4547_v0  ;;  %v8166_v11 = vadd.f32 %v7444_v30, %v10442_v52  ;;  %v4548_v47 = vrot.slane %v7566_v46, 1  ;;  %v3571_v31 = vpop.f32.mrb[61].mxu1  ;;  %v3972_v7 = vpop.f32.mrb[153].mxu0 }
 0x449   : > { %10441 = vst [vmem:[#allocation17_spill] sm:$0xff] %v10027_v45  ;;  %v8167_v38 = vadd.f32 %v3571_v31, %v10443_v35 }
 0x44a   : > { %v10033_v56 = vadd.f32 %v8165_v37, %v4548_v47 }
 0x44b   : > { %v7447_v44 = vpop.f32.mrb[158].mxu1  ;;  %v7569_v40 = vpop.f32.mrb[154].mxu0 }
 0x44c   : > { %v3581_v48 = vpop.f32.mrb[159].mxu1  ;;  %v3981_v55 = vpop.f32.mrb[155].mxu0  ;;  %v10047_v40 = vld [vmem:[%s10373_s4] ss:$0 sm:$0xff] }
 0x44d   : > { %v3636_v15 = vadd.f32 %v3581_v48, %v10444_v50  ;;  %v4549_v5 = vrot.slane %v3981_v55, 1 }
 0x44f   : > { %v4550_v45 = vsel %vm4505_vm0, %v4548_v47, %v4549_v5  ;;  %v10037_v18 = vadd.f32 %v4549_v5, %v3633_v10  ;;  %v7572_v0 = vpop.f32.mrb[156].mxu0  ;;  %v7610_v30 = vpop.f32.mrb[64].mxu1 }
 0x450   : > { %v10039_v46 = vadd.f32 %v8164_v27, %v4550_v45  ;;  %v4551_v52 = vrot.slane %v7572_v0, 1  ;;  %v4699_v7 = vrot.slane %v7610_v30, 2  ;;  %v3990_v31 = vpop.f32.mrb[157].mxu0  ;;  %v4122_v37 = vpop.f32.mrb[65].mxu1 }
 0x452   : > { %v10041_v35 = vadd.f32 %v8167_v38, %v4551_v52  ;;  %v4827_v44 = vadd.f32 %v4699_v7, %v9878_v12 }
 0x453   : > { %v7575_v47 = vpop.f32.mrb[158].mxu0  ;;  %v7613_v10 = vpop.f32.mrb[66].mxu1 }
 0x454   : > { %10445 = vst [vmem:[#allocation18_spill] sm:$0xff] %v10041_v35  ;;  %v4702_v48 = vrot.slane %v7613_v10, 2  ;;  %v3999_v55 = vpop.f32.mrb[159].mxu0  ;;  %v4131_v50 = vpop.f32.mrb[67].mxu1  ;;  %v4882_v5 = vadd.f32 %v10047_v40, %v4827_v44 }
 0x455   : > { %v4552_v27 = vrot.slane %v3999_v55, 1  ;;  %v4700_v45 = vrot.slane %v4131_v50, 2 }
 0x456   : > { %v4930_v50 = vmax.f32 %v4882_v5, 0.0 }
 0x457   : > { %v4553_v38 = vsel %vm4505_vm0, %v4551_v52, %v4552_v27  ;;  %v10051_v0 = vadd.f32 %v4552_v27, %v3636_v15  ;;  %v4701_v12 = vsel %vm4698_vm1, %v4699_v7, %v4700_v45  ;;  %v4703_v30 = vsel %vm4698_vm1, %v4700_v45, %v4702_v48  ;;  %v7616_v31 = vpop.f32.mrb[68].mxu1 }
 0x458   : > { %v10055_v37 = vadd.f32 %v8166_v11, %v4553_v38  ;;  %v4828_v47 = vadd.f32 %v4701_v12, %v9886_v39  ;;  %v4829_v10 = vadd.f32 %v4703_v30, %v9884_v22  ;;  %v4141_v35 = vpop.f32.mrb[69].mxu1  ;;  %v4704_v55 = vrot.slane %v7616_v31, 2 }
 0x459   : > { %10446 = vst [vmem:[#allocation19_spill] sm:$0xff] %v10051_v0  ;;  %v5027_v38 = vrot.slane %v4930_v50, 7 }
 0x45a   : > { %v4884_v44 = vadd.f32 %v10047_v40, %v4829_v10  ;;  %v4883_v52 = vadd.f32 %v10047_v40, %v4828_v47  ;;  %v4830_v15 = vadd.f32 %v4704_v55, %v9892_v19 }
 0x45b   : > { %v7619_v27 = vpop.f32.mrb[70].mxu1 }
 0x45c   : > { %v4932_v7 = vmax.f32 %v4884_v44, 0.0  ;;  %v4707_v0 = vrot.slane %v7619_v27, 2  ;;  %v4150_v48 = vpop.f32.mrb[71].mxu1  ;;  %v4931_v45 = vmax.f32 %v4883_v52, 0.0  ;;  %v4885_v22 = vadd.f32 %v10047_v40, %v4830_v15 }
 0x45d   : > { %v4705_v11 = vrot.slane %v4150_v48, 2 }
 0x45e   : > { %v5030_v39 = vrot.slane %v4932_v7, 7  ;;  %v5028_v12 = vrot.slane %v4931_v45, 7 }
 0x45f   : > { %v4706_v35 = vsel %vm4698_vm1, %v4704_v55, %v4705_v11  ;;  %v4708_v5 = vsel %vm4698_vm1, %v4705_v11, %v4707_v0  ;;  %v7622_v30 = vpop.f32.mrb[72].mxu1  ;;  %v4933_v0 = vmax.f32 %v4885_v22, 0.0 }
 0x460   : > { %v4831_v31 = vadd.f32 %v4706_v35, %v9900_v41  ;;  %v4832_v19 = vadd.f32 %v4708_v5, %v9898_v3  ;;  %v4709_v47 = vrot.slane %v7622_v30, 2  ;;  %v4160_v10 = vpop.f32.mrb[73].mxu1  ;;  %v5029_v44 = vsel %vm5026_vm2, %v5027_v38, %v5028_v12 }
 0x461   : > { %7736 = vmatprep.mubr.f32.mxu0 %v5029_v44  ;;  %v5031_v50 = vsel %vm5026_vm2, %v5028_v12, %v5030_v39  ;;  %v5032_v38 = vrot.slane %v4933_v0, 7 }
 0x462   : > { %v4833_v52 = vadd.f32 %v4709_v47, %v9906_v17  ;;  %7737 = vmatmul.mubr.f32.vlgmr.msra.gmra.mrb[160].mxu0 %v5031_v50  ;;  %v4886_v15 = vadd.f32 %v10047_v40, %v4831_v31  ;;  %v4887_v55 = vadd.f32 %v10047_v40, %v4832_v19 }
 0x463   : > { %v7625_v27 = vpop.f32.mrb[74].mxu1 }
 0x464   : > { %v4712_v7 = vrot.slane %v7625_v27, 2  ;;  %v4169_v41 = vpop.f32.mrb[75].mxu1  ;;  %v4934_v48 = vmax.f32 %v4886_v15, 0.0  ;;  %v4935_v3 = vmax.f32 %v4887_v55, 0.0  ;;  %v4888_v5 = vadd.f32 %v10047_v40, %v4833_v52 }
 0x465   : > { %v4710_v45 = vrot.slane %v4169_v41, 2 }
 0x466   : > { %v5033_v11 = vrot.slane %v4934_v48, 7  ;;  %v5035_v35 = vrot.slane %v4935_v3, 7  ;;  %v4936_v15 = vmax.f32 %v4888_v5, 0.0 }
 0x467   : > { %v4711_v39 = vsel %vm4698_vm1, %v4709_v47, %v4710_v45  ;;  %v4713_v17 = vsel %vm4698_vm1, %v4710_v45, %v4712_v7  ;;  %v7628_v12 = vpop.f32.mrb[76].mxu1 }
 0x468   : > { %v4834_v30 = vadd.f32 %v4711_v39, %v9914_v32  ;;  %v4835_v22 = vadd.f32 %v4713_v17, %v9912_v49  ;;  %v4714_v31 = vrot.slane %v7628_v12, 2  ;;  %v4179_v19 = vpop.f32.mrb[77].mxu1  ;;  %v5034_v10 = vsel %vm5026_vm2, %v5032_v38, %v5033_v11 }
 0x469   : > { %v5036_v44 = vsel %vm5026_vm2, %v5033_v11, %v5035_v35  ;;  %7739 = vmatprep.mubr.f32.mxu0 %v5034_v10  ;;  %v5037_v3 = vrot.slane %v4936_v15, 7 }
 0x46a   : > { %v4836_v50 = vadd.f32 %v4714_v31, %v9920_v23  ;;  %v4889_v52 = vadd.f32 %v10047_v40, %v4834_v30  ;;  %v4890_v47 = vadd.f32 %v10047_v40, %v4835_v22  ;;  %7740 = vmatmul.mubr.f32.gmra.mrb[162].mxu0 %v5036_v44 }
 0x46b   : > { %v7631_v55 = vpop.f32.mrb[78].mxu1 }
 0x46c   : > { %v4717_v0 = vrot.slane %v7631_v55, 2  ;;  %v4188_v32 = vpop.f32.mrb[79].mxu1  ;;  %v4937_v27 = vmax.f32 %v4889_v52, 0.0  ;;  %v4938_v49 = vmax.f32 %v4890_v47, 0.0  ;;  %v4891_v45 = vadd.f32 %v10047_v40, %v4836_v50 }
 0x46d   : > { %v4715_v7 = vrot.slane %v4188_v32, 2 }
 0x46e   : > { %v5038_v41 = vrot.slane %v4937_v27, 7  ;;  %v5040_v48 = vrot.slane %v4938_v49, 7  ;;  %v4939_v10 = vmax.f32 %v4891_v45, 0.0 }
 0x46f   : > { %v4716_v23 = vsel %vm4698_vm1, %v4714_v31, %v4715_v7  ;;  %v4718_v11 = vsel %vm4698_vm1, %v4715_v7, %v4717_v0  ;;  %v7634_v35 = vpop.f32.mrb[80].mxu1 }
 0x470   : > { %v4837_v38 = vadd.f32 %v4716_v23, %v9928_v62  ;;  %v4838_v5 = vadd.f32 %v4718_v11, %v9926_v14  ;;  %v4719_v39 = vrot.slane %v7634_v35, 2  ;;  %v4198_v17 = vpop.f32.mrb[81].mxu1  ;;  %v5039_v12 = vsel %vm5026_vm2, %v5037_v3, %v5038_v41 }
 0x471   : > { %v5041_v30 = vsel %vm5026_vm2, %v5038_v41, %v5040_v48  ;;  %7742 = vmatprep.mubr.f32.mxu0 %v5039_v12  ;;  %v5042_v0 = vrot.slane %v4939_v10, 7 }
 0x472   : > { %v4839_v22 = vadd.f32 %v4719_v39, %v9933_v63  ;;  %v4892_v19 = vadd.f32 %v10047_v40, %v4837_v38  ;;  %v4893_v31 = vadd.f32 %v10047_v40, %v4838_v5  ;;  %7743 = vmatmul.mubr.f32.gmra.mrb[164].mxu0 %v5041_v30 }
 0x473   : > { %v7637_v44 = vpop.f32.mrb[82].mxu1 }
 0x474   : > { %v4722_v50 = vrot.slane %v7637_v44, 2  ;;  %v4207_v62 = vpop.f32.mrb[83].mxu1  ;;  %v4940_v52 = vmax.f32 %v4892_v19, 0.0  ;;  %v4941_v14 = vmax.f32 %v4893_v31, 0.0  ;;  %v4894_v32 = vadd.f32 %v10047_v40, %v4839_v22 }
 0x475   : > { %v4720_v47 = vrot.slane %v4207_v62, 2 }
 0x476   : > { %v5043_v15 = vrot.slane %v4940_v52, 7  ;;  %v5045_v55 = vrot.slane %v4941_v14, 7  ;;  %v4942_v5 = vmax.f32 %v4894_v32, 0.0 }
 0x477   : > { %v4721_v63 = vsel %vm4698_vm1, %v4719_v39, %v4720_v47  ;;  %v4723_v27 = vsel %vm4698_vm1, %v4720_v47, %v4722_v50  ;;  %v7640_v49 = vpop.f32.mrb[84].mxu1 }
 0x478   : > { %v4840_v7 = vadd.f32 %v4721_v63, %v9939_v34  ;;  %v4841_v41 = vadd.f32 %v4723_v27, %v9937_v29  ;;  %v4724_v48 = vrot.slane %v7640_v49, 2  ;;  %v4217_v3 = vpop.f32.mrb[85].mxu1  ;;  %v5044_v45 = vsel %vm5026_vm2, %v5042_v0, %v5043_v15 }
 0x479   : > { %v5046_v23 = vsel %vm5026_vm2, %v5043_v15, %v5045_v55  ;;  %7745 = vmatprep.mubr.f32.mxu0 %v5044_v45  ;;  %v5047_v31 = vrot.slane %v4942_v5, 7 }
 0x47a   : > { %v4842_v11 = vadd.f32 %v4724_v48, %v9943_v6  ;;  %v4895_v35 = vadd.f32 %v10047_v40, %v4840_v7  ;;  %v4896_v38 = vadd.f32 %v10047_v40, %v4841_v41  ;;  %7746 = vmatmul.mubr.f32.gmra.mrb[166].mxu0 %v5046_v23 }
 0x47b   : > { %v7643_v39 = vpop.f32.mrb[86].mxu1 }
 0x47c   : > { %v4727_v17 = vrot.slane %v7643_v39, 2  ;;  %v4226_v34 = vpop.f32.mrb[87].mxu1  ;;  %v4943_v12 = vmax.f32 %v4895_v35, 0.0  ;;  %v4944_v29 = vmax.f32 %v4896_v38, 0.0  ;;  %v4897_v10 = vadd.f32 %v10047_v40, %v4842_v11 }
 0x47d   : > { %v4725_v30 = vrot.slane %v4226_v34, 2 }
 0x47e   : > { %v5048_v22 = vrot.slane %v4943_v12, 7  ;;  %v5050_v19 = vrot.slane %v4944_v29, 7  ;;  %v4945_v27 = vmax.f32 %v4897_v10, 0.0 }
 0x47f   : > { %v4726_v6 = vsel %vm4698_vm1, %v4724_v48, %v4725_v30  ;;  %v4728_v44 = vsel %vm4698_vm1, %v4725_v30, %v4727_v17  ;;  %v7646_v50 = vpop.f32.mrb[88].mxu1 }
 0x480   : > { %v4843_v62 = vadd.f32 %v4726_v6, %v9949_v60  ;;  %v4844_v52 = vadd.f32 %v4728_v44, %v9947_v51  ;;  %v4729_v14 = vrot.slane %v7646_v50, 2  ;;  %v4236_v47 = vpop.f32.mrb[89].mxu1  ;;  %v5049_v15 = vsel %vm5026_vm2, %v5047_v31, %v5048_v22 }
 0x481   : > { %v5051_v55 = vsel %vm5026_vm2, %v5048_v22, %v5050_v19  ;;  %7748 = vmatprep.mubr.f32.mxu0 %v5049_v15  ;;  %v5052_v23 = vrot.slane %v4945_v27, 7 }
 0x482   : > { %v4845_v0 = vadd.f32 %v4729_v14, %v9953_v16  ;;  %v4898_v32 = vadd.f32 %v10047_v40, %v4843_v62  ;;  %v4899_v63 = vadd.f32 %v10047_v40, %v4844_v52  ;;  %7749 = vmatmul.mubr.f32.gmra.mrb[168].mxu0 %v5051_v55 }
 0x483   : > { %v7649_v49 = vpop.f32.mrb[90].mxu1 }
 0x484   : > { %v4732_v7 = vrot.slane %v7649_v49, 2  ;;  %v4245_v60 = vpop.f32.mrb[91].mxu1  ;;  %v4946_v41 = vmax.f32 %v4898_v32, 0.0  ;;  %v4947_v51 = vmax.f32 %v4899_v63, 0.0  ;;  %v4900_v11 = vadd.f32 %v10047_v40, %v4845_v0 }
 0x485   : > { %v4730_v48 = vrot.slane %v4245_v60, 2 }
 0x486   : > { %v5053_v3 = vrot.slane %v4946_v41, 7  ;;  %v5055_v45 = vrot.slane %v4947_v51, 7  ;;  %v4948_v31 = vmax.f32 %v4900_v11, 0.0 }
 0x487   : > { %v4731_v16 = vsel %vm4698_vm1, %v4729_v14, %v4730_v48  ;;  %v4733_v35 = vsel %vm4698_vm1, %v4730_v48, %v4732_v7  ;;  %v7652_v38 = vpop.f32.mrb[92].mxu1 }
 0x488   : > { %v4846_v5 = vadd.f32 %v4731_v16, %v9959_v33  ;;  %v4847_v39 = vadd.f32 %v4733_v35, %v9957_v20  ;;  %v4734_v17 = vrot.slane %v7652_v38, 2  ;;  %v4255_v34 = vpop.f32.mrb[93].mxu1  ;;  %v5054_v12 = vsel %vm5026_vm2, %v5052_v23, %v5053_v3 }
 0x489   : > { %v5056_v29 = vsel %vm5026_vm2, %v5053_v3, %v5055_v45  ;;  %7751 = vmatprep.mubr.f32.mxu0 %v5054_v12  ;;  %v5057_v14 = vrot.slane %v4948_v31, 7 }
 0x48a   : > { %v4848_v30 = vadd.f32 %v4734_v17, %v9963_v61  ;;  %v4901_v22 = vadd.f32 %v10047_v40, %v4846_v5  ;;  %v4902_v19 = vadd.f32 %v10047_v40, %v4847_v39  ;;  %7752 = vmatmul.mubr.f32.gmra.mrb[170].mxu0 %v5056_v29 }
 0x48b   : > { %v7655_v10 = vpop.f32.mrb[94].mxu1 }
 0x48c   : > { %v4737_v6 = vrot.slane %v7655_v10, 2  ;;  %v4264_v33 = vpop.f32.mrb[95].mxu1  ;;  %v4949_v44 = vmax.f32 %v4901_v22, 0.0  ;;  %v4950_v20 = vmax.f32 %v4902_v19, 0.0  ;;  %v4903_v47 = vadd.f32 %v10047_v40, %v4848_v30 }
 0x48d   : > { %v4735_v50 = vrot.slane %v4264_v33, 2 }
 0x48e   : > { %v5058_v62 = vrot.slane %v4949_v44, 7  ;;  %v5060_v52 = vrot.slane %v4950_v20, 7  ;;  %v4951_v48 = vmax.f32 %v4903_v47, 0.0 }
 0x48f   : > { %v4736_v61 = vsel %vm4698_vm1, %v4734_v17, %v4735_v50  ;;  %v4738_v15 = vsel %vm4698_vm1, %v4735_v50, %v4737_v6  ;;  %v7658_v55 = vpop.f32.mrb[96].mxu1 }
 0x490   : > { %v4849_v0 = vadd.f32 %v4736_v61, %v9969_v58  ;;  %v4850_v32 = vadd.f32 %v4738_v15, %v9967_v28  ;;  %v4739_v63 = vrot.slane %v7658_v55, 2  ;;  %v4274_v27 = vpop.f32.mrb[97].mxu1  ;;  %v5059_v49 = vsel %vm5026_vm2, %v5057_v14, %v5058_v62 }
 0x491   : > { %v5061_v7 = vsel %vm5026_vm2, %v5058_v62, %v5060_v52  ;;  %7754 = vmatprep.mubr.f32.mxu0 %v5059_v49  ;;  %v5062_v38 = vrot.slane %v4951_v48, 7 }
 0x492   : > { %v4851_v60 = vadd.f32 %v4739_v63, %v9973_v24  ;;  %v4904_v41 = vadd.f32 %v10047_v40, %v4849_v0  ;;  %v4905_v51 = vadd.f32 %v10047_v40, %v4850_v32  ;;  %7755 = vmatmul.mubr.f32.gmra.mrb[172].mxu0 %v5061_v7 }
 0x493   : > { %v7661_v3 = vpop.f32.mrb[98].mxu1 }
 0x494   : > { %v4742_v45 = vrot.slane %v7661_v3, 2  ;;  %v4283_v58 = vpop.f32.mrb[99].mxu1  ;;  %v4952_v23 = vmax.f32 %v4904_v41, 0.0  ;;  %v4953_v28 = vmax.f32 %v4905_v51, 0.0  ;;  %v4906_v5 = vadd.f32 %v10047_v40, %v4851_v60 }
 0x495   : > { %v4740_v11 = vrot.slane %v4283_v58, 2 }
 0x496   : > { %v5063_v16 = vrot.slane %v4952_v23, 7  ;;  %v5065_v35 = vrot.slane %v4953_v28, 7  ;;  %v4954_v33 = vmax.f32 %v4906_v5, 0.0 }
 0x497   : > { %v4741_v24 = vsel %vm4698_vm1, %v4739_v63, %v4740_v11  ;;  %v4743_v39 = vsel %vm4698_vm1, %v4740_v11, %v4742_v45  ;;  %v7664_v17 = vpop.f32.mrb[100].mxu1 }
 0x498   : > { %v4852_v34 = vadd.f32 %v4741_v24, %v9979_v4  ;;  %v4853_v12 = vadd.f32 %v4743_v39, %v9977_v1  ;;  %v4744_v29 = vrot.slane %v7664_v17, 2  ;;  %v4293_v30 = vpop.f32.mrb[101].mxu1  ;;  %v5064_v22 = vsel %vm5026_vm2, %v5062_v38, %v5063_v16 }
 0x499   : > { %v5066_v19 = vsel %vm5026_vm2, %v5063_v16, %v5065_v35  ;;  %7757 = vmatprep.mubr.f32.mxu0 %v5064_v22  ;;  %v5067_v47 = vrot.slane %v4954_v33, 7 }
 0x49a   : > { %v4854_v31 = vadd.f32 %v4744_v29, %v9983_v42  ;;  %v4907_v10 = vadd.f32 %v10047_v40, %v4852_v34  ;;  %v4908_v6 = vadd.f32 %v10047_v40, %v4853_v12  ;;  %7758 = vmatmul.mubr.f32.gmra.mrb[174].mxu0 %v5066_v19 }
 0x49b   : > { %v7667_v44 = vpop.f32.mrb[102].mxu1 }
 0x49c   : > { %v4747_v20 = vrot.slane %v7667_v44, 2  ;;  %v4302_v4 = vpop.f32.mrb[103].mxu1  ;;  %v4955_v50 = vmax.f32 %v4907_v10, 0.0  ;;  %v4956_v1 = vmax.f32 %v4908_v6, 0.0  ;;  %v4909_v61 = vadd.f32 %v10047_v40, %v4854_v31 }
 0x49d   : > { %v4745_v62 = vrot.slane %v4302_v4, 2 }
 0x49e   : > { %v5068_v52 = vrot.slane %v4955_v50, 7  ;;  %v5070_v14 = vrot.slane %v4956_v1, 7  ;;  %v4957_v48 = vmax.f32 %v4909_v61, 0.0 }
 0x49f   : > { %v4746_v42 = vsel %vm4698_vm1, %v4744_v29, %v4745_v62  ;;  %v4748_v15 = vsel %vm4698_vm1, %v4745_v62, %v4747_v20  ;;  %v7670_v55 = vpop.f32.mrb[104].mxu1 }
 0x4a0   : > { %v4855_v0 = vadd.f32 %v4746_v42, %v9989_v36  ;;  %v4856_v32 = vadd.f32 %v4748_v15, %v9987_v8  ;;  %v4749_v63 = vrot.slane %v7670_v55, 2  ;;  %v4312_v27 = vpop.f32.mrb[105].mxu1  ;;  %v5069_v49 = vsel %vm5026_vm2, %v5067_v47, %v5068_v52 }
 0x4a1   : > { %v5071_v7 = vsel %vm5026_vm2, %v5068_v52, %v5070_v14  ;;  %7760 = vmatprep.mubr.f32.mxu0 %v5069_v49  ;;  %v5072_v16 = vrot.slane %v4957_v48, 7 }
 0x4a2   : > { %v4857_v60 = vadd.f32 %v4749_v63, %v9993_v53  ;;  %v4910_v41 = vadd.f32 %v10047_v40, %v4855_v0  ;;  %v4911_v51 = vadd.f32 %v10047_v40, %v4856_v32  ;;  %7761 = vmatmul.mubr.f32.gmra.mrb[176].mxu0 %v5071_v7 }
 0x4a3   : > { %v7673_v3 = vpop.f32.mrb[106].mxu1 }
 0x4a4   : > { %v4752_v45 = vrot.slane %v7673_v3, 2  ;;  %v4321_v36 = vpop.f32.mrb[107].mxu1  ;;  %v4958_v58 = vmax.f32 %v4910_v41, 0.0  ;;  %v4959_v8 = vmax.f32 %v4911_v51, 0.0  ;;  %v4912_v35 = vadd.f32 %v10047_v40, %v4857_v60 }
 0x4a5   : > { %v4750_v23 = vrot.slane %v4321_v36, 2 }
 0x4a6   : > { %v5073_v28 = vrot.slane %v4958_v58, 7  ;;  %v5075_v11 = vrot.slane %v4959_v8, 7  ;;  %v4960_v31 = vmax.f32 %v4912_v35, 0.0 }
 0x4a7   : > { %v4751_v53 = vsel %vm4698_vm1, %v4749_v63, %v4750_v23  ;;  %v4753_v38 = vsel %vm4698_vm1, %v4750_v23, %v4752_v45  ;;  %v7676_v5 = vpop.f32.mrb[108].mxu1 }
 0x4a8   : > { %v4858_v24 = vadd.f32 %v4751_v53, %v9999_v54  ;;  %v4859_v39 = vadd.f32 %v4753_v38, %v9997_v59  ;;  %v4754_v17 = vrot.slane %v7676_v5, 2  ;;  %v4331_v34 = vpop.f32.mrb[109].mxu1  ;;  %v5074_v12 = vsel %vm5026_vm2, %v5072_v16, %v5073_v28 }
 0x4a9   : > { %v5076_v29 = vsel %vm5026_vm2, %v5073_v28, %v5075_v11  ;;  %7763 = vmatprep.mubr.f32.mxu0 %v5074_v12  ;;  %v5077_v50 = vrot.slane %v4960_v31, 7 }
 0x4aa   : > { %v4860_v30 = vadd.f32 %v4754_v17, %v10003_v57  ;;  %v4913_v22 = vadd.f32 %v10047_v40, %v4858_v24  ;;  %v4914_v19 = vadd.f32 %v10047_v40, %v4859_v39  ;;  %7764 = vmatmul.mubr.f32.gmra.mrb[178].mxu0 %v5076_v29 }
 0x4ab   : > { %v7679_v10 = vpop.f32.mrb[110].mxu1 }
 0x4ac   : > { %v4757_v6 = vrot.slane %v7679_v10, 2  ;;  %v4340_v54 = vpop.f32.mrb[111].mxu1  ;;  %v4961_v33 = vmax.f32 %v4913_v22, 0.0  ;;  %v4962_v59 = vmax.f32 %v4914_v19, 0.0  ;;  %v4915_v1 = vadd.f32 %v10047_v40, %v4860_v30 }
 0x4ad   : > { %v4755_v44 = vrot.slane %v4340_v54, 2  ;;  %v10447_v54 = vld [vmem:[#allocation17_spill] sm:$0xff] }
 0x4ae   : > { %v5078_v20 = vrot.slane %v4961_v33, 7  ;;  %v5080_v4 = vrot.slane %v4962_v59, 7  ;;  %v4963_v27 = vmax.f32 %v4915_v1, 0.0 }
 0x4af   : > { %v4756_v57 = vsel %vm4698_vm1, %v4754_v17, %v4755_v44  ;;  %v4758_v62 = vsel %vm4698_vm1, %v4755_v44, %v4757_v6  ;;  %v7682_v52 = vpop.f32.mrb[112].mxu1 }
 0x4b0   : > { %v4861_v14 = vadd.f32 %v4756_v57, %v10009_v2  ;;  %v4862_v47 = vadd.f32 %v4758_v62, %v10007_v43  ;;  %v4759_v61 = vrot.slane %v7682_v52, 2  ;;  %v4350_v42 = vpop.f32.mrb[113].mxu1  ;;  %v5079_v15 = vsel %vm5026_vm2, %v5077_v50, %v5078_v20 }
 0x4b1   : > { %v5081_v55 = vsel %vm5026_vm2, %v5078_v20, %v5080_v4  ;;  %7766 = vmatprep.mubr.f32.mxu0 %v5079_v15  ;;  %v5082_v3 = vrot.slane %v4963_v27, 7 }
 0x4b2   : > { %v4863_v0 = vadd.f32 %v4759_v61, %v10013_v26  ;;  %v4916_v32 = vadd.f32 %v10047_v40, %v4861_v14  ;;  %v4917_v63 = vadd.f32 %v10047_v40, %v4862_v47  ;;  %7767 = vmatmul.mubr.f32.gmra.mrb[180].mxu0 %v5081_v55 }
 0x4b3   : > { %v7685_v49 = vpop.f32.mrb[114].mxu1 }
 0x4b4   : > { %v4762_v7 = vrot.slane %v7685_v49, 2  ;;  %v4359_v2 = vpop.f32.mrb[115].mxu1  ;;  %v4964_v60 = vmax.f32 %v4916_v32, 0.0  ;;  %v4965_v43 = vmax.f32 %v4917_v63, 0.0  ;;  %v4918_v45 = vadd.f32 %v10047_v40, %v4863_v0 }
 0x4b5   : > { %v4760_v41 = vrot.slane %v4359_v2, 2 }
 0x4b6   : > { %v5083_v51 = vrot.slane %v4964_v60, 7  ;;  %v5085_v48 = vrot.slane %v4965_v43, 7  ;;  %v4966_v24 = vmax.f32 %v4918_v45, 0.0 }
 0x4b7   : > { %v4761_v26 = vsel %vm4698_vm1, %v4759_v61, %v4760_v41  ;;  %v4763_v36 = vsel %vm4698_vm1, %v4760_v41, %v4762_v7  ;;  %v7688_v58 = vpop.f32.mrb[116].mxu1 }
 0x4b8   : > { %v4864_v8 = vadd.f32 %v4761_v26, %v10019_v25  ;;  %v4865_v23 = vadd.f32 %v4763_v36, %v10017_v13  ;;  %v4764_v28 = vrot.slane %v7688_v58, 2  ;;  %v4369_v11 = vpop.f32.mrb[117].mxu1  ;;  %v5084_v16 = vsel %vm5026_vm2, %v5082_v3, %v5083_v51 }
 0x4b9   : > { %v5086_v35 = vsel %vm5026_vm2, %v5083_v51, %v5085_v48  ;;  %7769 = vmatprep.mubr.f32.mxu0 %v5084_v16  ;;  %v5087_v22 = vrot.slane %v4966_v24, 7  ;;  %v10448_v48 = vld [vmem:[#allocation18_spill] sm:$0xff]  ;;  %v10449_v24 = vld [vmem:[#allocation19_spill] sm:$0xff] }
 0x4ba   : > { %v4866_v53 = vadd.f32 %v4764_v28, %v10023_v9  ;;  %v4919_v38 = vadd.f32 %v10047_v40, %v4864_v8  ;;  %v4920_v5 = vadd.f32 %v10047_v40, %v4865_v23  ;;  %7770 = vmatmul.mubr.f32.gmra.mrb[182].mxu0 %v5086_v35 }
 0x4bb   : > { %v7691_v39 = vpop.f32.mrb[118].mxu1 }
 0x4bc   : > { %v4767_v17 = vrot.slane %v7691_v39, 2  ;;  %v4378_v25 = vpop.f32.mrb[119].mxu1  ;;  %v4967_v34 = vmax.f32 %v4919_v38, 0.0  ;;  %v4968_v13 = vmax.f32 %v4920_v5, 0.0  ;;  %v4921_v19 = vadd.f32 %v10047_v40, %v4866_v53 }
 0x4bd   : > { %v4765_v12 = vrot.slane %v4378_v25, 2 }
 0x4be   : > { %v5088_v29 = vrot.slane %v4967_v34, 7  ;;  %v5090_v30 = vrot.slane %v4968_v13, 7  ;;  %v4969_v62 = vmax.f32 %v4921_v19, 0.0 }
 0x4bf   : > { %v4766_v9 = vsel %vm4698_vm1, %v4764_v28, %v4765_v12  ;;  %v4768_v31 = vsel %vm4698_vm1, %v4765_v12, %v4767_v17  ;;  %v7694_v10 = vpop.f32.mrb[120].mxu1 }
 0x4c0   : > { %v4867_v6 = vadd.f32 %v4766_v9, %v10029_v21  ;;  %v4868_v33 = vadd.f32 %v4768_v31, %v10447_v54  ;;  %v4769_v59 = vrot.slane %v7694_v10, 2  ;;  %v4388_v44 = vpop.f32.mrb[121].mxu1  ;;  %v5089_v20 = vsel %vm5026_vm2, %v5087_v22, %v5088_v29  ;;  %v10216_v10 = vld [vmem:[%s10375_s6] ss:$0 sm:$0xff] }
 0x4c1   : > { %v5091_v4 = vsel %vm5026_vm2, %v5088_v29, %v5090_v30  ;;  %7772 = vmatprep.mubr.f32.mxu0 %v5089_v20  ;;  %v5092_v32 = vrot.slane %v4969_v62, 7 }
 0x4c2   : > { %v4869_v50 = vadd.f32 %v4769_v59, %v10033_v56  ;;  %v4922_v1 = vadd.f32 %v10047_v40, %v4867_v6  ;;  %v4923_v57 = vadd.f32 %v10047_v40, %v4868_v33  ;;  %7773 = vmatmul.mubr.f32.gmra.mrb[184].mxu0 %v5091_v4  ;;  %v5156_v6 = vld [vmem:[%s8989_s8 + $0x8] sm:$0xff]  ;;  %v5155_v33 = vld [vmem:[%s8989_s8] sm:$0xff] }
 0x4c3   : > { %v7697_v52 = vpop.f32.mrb[122].mxu1 }
 0x4c4   : > { %v4772_v14 = vrot.slane %v7697_v52, 2  ;;  %v4397_v21 = vpop.f32.mrb[123].mxu1  ;;  %v4970_v47 = vmax.f32 %v4922_v1, 0.0  ;;  %v4971_v61 = vmax.f32 %v4923_v57, 0.0  ;;  %v4924_v15 = vadd.f32 %v10047_v40, %v4869_v50  ;;  %v5158_v57 = vld [vmem:[%s8989_s8 + $0x18] sm:$0xff] }
 0x4c5   : > { %v4770_v42 = vrot.slane %v4397_v21, 2 }
 0x4c6   : > { %v5093_v55 = vrot.slane %v4970_v47, 7  ;;  %v5095_v0 = vrot.slane %v4971_v61, 7  ;;  %v4972_v51 = vmax.f32 %v4924_v15, 0.0 }
 0x4c7   : > { %v4771_v56 = vsel %vm4698_vm1, %v4769_v59, %v4770_v42  ;;  %v4773_v63 = vsel %vm4698_vm1, %v4770_v42, %v4772_v14  ;;  %v7700_v27 = vpop.f32.mrb[124].mxu1  ;;  %v5157_v14 = vld [vmem:[%s8989_s8 + $0x10] sm:$0xff] }
 0x4c8   : > { %v4870_v49 = vadd.f32 %v4771_v56, %v10039_v46  ;;  %v4871_v7 = vadd.f32 %v4773_v63, %v10037_v18  ;;  %v4774_v2 = vrot.slane %v7700_v27, 2  ;;  %v4407_v60 = vpop.f32.mrb[125].mxu1  ;;  %v5094_v43 = vsel %vm5026_vm2, %v5092_v32, %v5093_v55  ;;  %v5159_v63 = vld [vmem:[%s8989_s8 + $0x20] sm:$0xff] }
 0x4c9   : > { %v5096_v41 = vsel %vm5026_vm2, %v5093_v55, %v5095_v0  ;;  %7775 = vmatprep.mubr.f32.mxu0 %v5094_v43  ;;  %v5097_v28 = vrot.slane %v4972_v51, 7  ;;  %v5160_v0 = vld [vmem:[%s8989_s8 + $0x28] sm:$0xff] }
 0x4ca   : > { %v4872_v3 = vadd.f32 %v4774_v2, %v10448_v48  ;;  %v4925_v45 = vadd.f32 %v10047_v40, %v4870_v49  ;;  %v4926_v26 = vadd.f32 %v10047_v40, %v4871_v7  ;;  %7776 = vmatmul.mubr.f32.gmra.mrb[186].mxu0 %v5096_v41  ;;  %v5162_v41 = vld [vmem:[%s8989_s8 + $0x38] sm:$0xff] }
 0x4cb   : > { %v7703_v36 = vpop.f32.mrb[126].mxu1 }
 0x4cc   : > { %v4777_v58 = vrot.slane %v7703_v36, 2  ;;  %v4416_v46 = vpop.f32.mrb[127].mxu1  ;;  %v4973_v8 = vmax.f32 %v4925_v45, 0.0  ;;  %v4974_v18 = vmax.f32 %v4926_v26, 0.0  ;;  %v4927_v11 = vadd.f32 %v10047_v40, %v4872_v3  ;;  %v5161_v3 = vld [vmem:[%s8989_s8 + $0x30] sm:$0xff] }
 0x4cd   : > { %v4775_v23 = vrot.slane %v4416_v46, 2 }
 0x4ce   : > { %v5098_v16 = vrot.slane %v4973_v8, 7  ;;  %v5100_v35 = vrot.slane %v4974_v18, 7  ;;  %v4975_v34 = vmax.f32 %v4927_v11, 0.0  ;;  %v5164_v18 = vld [vmem:[%s8989_s8 + $0x48] sm:$0xff]  ;;  %v5163_v11 = vld [vmem:[%s8989_s8 + $0x40] sm:$0xff] }
 0x4cf   : > { %v4776_v53 = vsel %vm4698_vm1, %v4774_v2, %v4775_v23  ;;  %v4778_v38 = vsel %vm4698_vm1, %v4775_v23, %v4777_v58 }
 0x4d0   : > { %v4873_v5 = vadd.f32 %v4776_v53, %v10055_v37  ;;  %v4874_v39 = vadd.f32 %v4778_v38, %v10449_v24  ;;  %v5099_v17 = vsel %vm5026_vm2, %v5097_v28, %v5098_v16  ;;  %v5101_v25 = vsel %vm5026_vm2, %v5098_v16, %v5100_v35 }
 0x4d1   : > { %7778 = vmatprep.mubr.f32.mxu0 %v5099_v17  ;;  %v5102_v22 = vrot.slane %v4975_v34, 7  ;;  %v5165_v34 = vld [vmem:[%s8989_s8 + $0x50] sm:$0xff] }
 0x4d2   : > { %7779 = vmatmul.mubr.f32.gmra.mrb[188].mxu0 %v5101_v25  ;;  %v4928_v13 = vadd.f32 %v10047_v40, %v4873_v5  ;;  %v4929_v12 = vadd.f32 %v10047_v40, %v4874_v39  ;;  %v5166_v39 = vld [vmem:[%s8989_s8 + $0x58] sm:$0xff] }
 0x4d4   : > { %v4976_v29 = vmax.f32 %v4928_v13, 0.0  ;;  %v4977_v30 = vmax.f32 %v4929_v12, 0.0 }
 0x4d6   : > { %v5103_v19 = vrot.slane %v4976_v29, 7  ;;  %v5105_v37 = vrot.slane %v4977_v30, 7 }
 0x4d8   : > { %v5104_v9 = vsel %vm5026_vm2, %v5102_v22, %v5103_v19  ;;  %v5106_v31 = vsel %vm5026_vm2, %v5103_v19, %v5105_v37  ;;  %v5168_v37 = vld [vmem:[%s8989_s8 + $0x68] sm:$0xff] }
 0x4d9   : > { %7781 = vmatprep.mubr.f32.mxu0 %v5104_v9 }
 0x4da   : > { %7782 = vmatmul.mubr.f32.gmra.mrb[190].mxu0 %v5106_v31 }
 0x535   : > { %v7738_v40 = vpop.f32.mrb[160].mxu0 }
 0x536   : > { %v5266_v54 = vadd.f32 %v7738_v40, %v10216_v10  ;;  %v5260_v59 = vpop.f32.mrb[161].mxu0 }
 0x537   : > { %v5261_v44 = vadd.f32 %v10216_v10, %v5260_v59 }
 0x538   : > { %v5420_v20 = vadd.f32 %v5266_v54, %v5156_v6  ;;  %v5167_v6 = vld [vmem:[%s8989_s8 + $0x60] sm:$0xff] }
 0x539   : > { %v5419_v4 = vadd.f32 %v5261_v44, %v5155_v33 }
 0x53a   : > { %v5452_v50 = vmax.f32 %v5420_v20, 0.0 }
 0x53b   : > { %v5451_v1 = vmax.f32 %v5419_v4, 0.0  ;;  %v5170_v4 = vld [vmem:[%s8989_s8 + $0x78] sm:$0xff] }
 0x53c   : > { %5484 = vst [vmem:[%s10224_s12 + $0x8] sm:$0xff] %v5452_v50 }
 0x53d   : > { %5483 = vst [vmem:[%s10224_s12] sm:$0xff] %v5451_v1  ;;  %v7741_v62 = vpop.f32.mrb[162].mxu0 }
 0x53e   : > { %v5276_v52 = vadd.f32 %v7741_v62, %v10216_v10  ;;  %v5270_v21 = vpop.f32.mrb[163].mxu0 }
 0x53f   : > { %v5271_v47 = vadd.f32 %v10216_v10, %v5270_v21 }
 0x540   : > { %v5422_v61 = vadd.f32 %v5276_v52, %v5158_v57  ;;  %v5169_v57 = vld [vmem:[%s8989_s8 + $0x70] sm:$0xff] }
 0x541   : > { %v5421_v42 = vadd.f32 %v5271_v47, %v5157_v14 }
 0x542   : > { %v5454_v15 = vmax.f32 %v5422_v61, 0.0 }
 0x543   : > { %v5453_v55 = vmax.f32 %v5421_v42, 0.0  ;;  %v5172_v42 = vld [vmem:[%s8989_s8 + $0x88] sm:$0xff] }
 0x544   : > { %5486 = vst [vmem:[%s10224_s12 + $0x18] sm:$0xff] %v5454_v15 }
 0x545   : > { %5485 = vst [vmem:[%s10224_s12 + $0x10] sm:$0xff] %v5453_v55  ;;  %v7744_v32 = vpop.f32.mrb[164].mxu0 }
 0x546   : > { %v5286_v56 = vadd.f32 %v7744_v32, %v10216_v10  ;;  %v5280_v27 = vpop.f32.mrb[165].mxu0 }
 0x547   : > { %v5281_v49 = vadd.f32 %v10216_v10, %v5280_v27 }
 0x548   : > { %v5424_v7 = vadd.f32 %v5286_v56, %v5160_v0  ;;  %v5171_v0 = vld [vmem:[%s8989_s8 + $0x80] sm:$0xff] }
 0x549   : > { %v5423_v2 = vadd.f32 %v5281_v49, %v5159_v63 }
 0x54a   : > { %v5456_v60 = vmax.f32 %v5424_v7, 0.0 }
 0x54b   : > { %v5455_v43 = vmax.f32 %v5423_v2, 0.0  ;;  %v5174_v2 = vld [vmem:[%s8989_s8 + $0x98] sm:$0xff] }
 0x54c   : > { %5488 = vst [vmem:[%s10224_s12 + $0x28] sm:$0xff] %v5456_v60 }
 0x54d   : > { %5487 = vst [vmem:[%s10224_s12 + $0x20] sm:$0xff] %v5455_v43  ;;  %v7747_v51 = vpop.f32.mrb[166].mxu0 }
 0x54e   : > { %v5296_v48 = vadd.f32 %v7747_v51, %v10216_v10  ;;  %v5290_v45 = vpop.f32.mrb[167].mxu0 }
 0x54f   : > { %v5291_v26 = vadd.f32 %v10216_v10, %v5290_v45 }
 0x550   : > { %v5426_v36 = vadd.f32 %v5296_v48, %v5162_v41  ;;  %v5173_v41 = vld [vmem:[%s8989_s8 + $0x90] sm:$0xff] }
 0x551   : > { %v5425_v58 = vadd.f32 %v5291_v26, %v5161_v3 }
 0x552   : > { %v5458_v46 = vmax.f32 %v5426_v36, 0.0 }
 0x553   : > { %v5457_v8 = vmax.f32 %v5425_v58, 0.0  ;;  %v5176_v58 = vld [vmem:[%s8989_s8 + $0xa8] sm:$0xff] }
 0x554   : > { %5490 = vst [vmem:[%s10224_s12 + $0x38] sm:$0xff] %v5458_v46 }
 0x555   : > { %5489 = vst [vmem:[%s10224_s12 + $0x30] sm:$0xff] %v5457_v8  ;;  %v7750_v23 = vpop.f32.mrb[168].mxu0 }
 0x556   : > { %v5306_v28 = vadd.f32 %v7750_v23, %v10216_v10  ;;  %v5300_v16 = vpop.f32.mrb[169].mxu0 }
 0x557   : > { %v5301_v35 = vadd.f32 %v10216_v10, %v5300_v16 }
 0x558   : > { %v5428_v53 = vadd.f32 %v5306_v28, %v5164_v18  ;;  %v5175_v18 = vld [vmem:[%s8989_s8 + $0xa0] sm:$0xff] }
 0x559   : > { %v5427_v38 = vadd.f32 %v5301_v35, %v5163_v11 }
 0x55a   : > { %v5460_v5 = vmax.f32 %v5428_v53, 0.0 }
 0x55b   : > { %v5459_v24 = vmax.f32 %v5427_v38, 0.0  ;;  %v5178_v38 = vld [vmem:[%s8989_s8 + $0xb8] sm:$0xff] }
 0x55c   : > { %5492 = vst [vmem:[%s10224_s12 + $0x48] sm:$0xff] %v5460_v5 }
 0x55d   : > { %5491 = vst [vmem:[%s10224_s12 + $0x40] sm:$0xff] %v5459_v24  ;;  %v7753_v17 = vpop.f32.mrb[170].mxu0 }
 0x55e   : > { %v5316_v25 = vadd.f32 %v7753_v17, %v10216_v10  ;;  %v5310_v13 = vpop.f32.mrb[171].mxu0 }
 0x55f   : > { %v5311_v12 = vadd.f32 %v10216_v10, %v5310_v13 }
 0x560   : > { %v5430_v29 = vadd.f32 %v5316_v25, %v5166_v39  ;;  %v5177_v39 = vld [vmem:[%s8989_s8 + $0xb0] sm:$0xff] }
 0x561   : > { %v5429_v30 = vadd.f32 %v5311_v12, %v5165_v34 }
 0x562   : > { %v5462_v22 = vmax.f32 %v5430_v29, 0.0 }
 0x563   : > { %v5461_v19 = vmax.f32 %v5429_v30, 0.0  ;;  %v5180_v30 = vld [vmem:[%s8989_s8 + $0xc8] sm:$0xff] }
 0x564   : > { %5494 = vst [vmem:[%s10224_s12 + $0x58] sm:$0xff] %v5462_v22 }
 0x565   : > { %5493 = vst [vmem:[%s10224_s12 + $0x50] sm:$0xff] %v5461_v19  ;;  %v7756_v9 = vpop.f32.mrb[172].mxu0 }
 0x566   : > { %v5326_v31 = vadd.f32 %v7756_v9, %v10216_v10  ;;  %v5320_v40 = vpop.f32.mrb[173].mxu0 }
 0x567   : > { %v5321_v54 = vadd.f32 %v10216_v10, %v5320_v40 }
 0x568   : > { %v5432_v33 = vadd.f32 %v5326_v31, %v5168_v37  ;;  %v5179_v37 = vld [vmem:[%s8989_s8 + $0xc0] sm:$0xff] }
 0x569   : > { %v5431_v59 = vadd.f32 %v5321_v54, %v5167_v6 }
 0x56a   : > { %v5464_v44 = vmax.f32 %v5432_v33, 0.0 }
 0x56b   : > { %v5463_v20 = vmax.f32 %v5431_v59, 0.0  ;;  %v5182_v59 = vld [vmem:[%s8989_s8 + $0xd8] sm:$0xff] }
 0x56c   : > { %5496 = vst [vmem:[%s10224_s12 + $0x68] sm:$0xff] %v5464_v44 }
 0x56d   : > { %5495 = vst [vmem:[%s10224_s12 + $0x60] sm:$0xff] %v5463_v20  ;;  %v7759_v50 = vpop.f32.mrb[174].mxu0 }
 0x56e   : > { %v5336_v1 = vadd.f32 %v7759_v50, %v10216_v10  ;;  %v5330_v62 = vpop.f32.mrb[175].mxu0 }
 0x56f   : > { %v5331_v52 = vadd.f32 %v10216_v10, %v5330_v62 }
 0x570   : > { %v5434_v14 = vadd.f32 %v5336_v1, %v5170_v4  ;;  %v5181_v4 = vld [vmem:[%s8989_s8 + $0xd0] sm:$0xff] }
 0x571   : > { %v5433_v21 = vadd.f32 %v5331_v52, %v5169_v57 }
 0x572   : > { %v5466_v47 = vmax.f32 %v5434_v14, 0.0 }
 0x573   : > { %v5465_v61 = vmax.f32 %v5433_v21, 0.0  ;;  %v5184_v21 = vld [vmem:[%s8989_s8 + $0xe8] sm:$0xff] }
 0x574   : > { %5498 = vst [vmem:[%s10224_s12 + $0x78] sm:$0xff] %v5466_v47 }
 0x575   : > { %5497 = vst [vmem:[%s10224_s12 + $0x70] sm:$0xff] %v5465_v61  ;;  %v7762_v15 = vpop.f32.mrb[176].mxu0 }
 0x576   : > { %v5346_v55 = vadd.f32 %v7762_v15, %v10216_v10  ;;  %v5340_v32 = vpop.f32.mrb[177].mxu0 }
 0x577   : > { %v5341_v56 = vadd.f32 %v10216_v10, %v5340_v32 }
 0x578   : > { %v5436_v63 = vadd.f32 %v5346_v55, %v5172_v42  ;;  %v5183_v42 = vld [vmem:[%s8989_s8 + $0xe0] sm:$0xff] }
 0x579   : > { %v5435_v27 = vadd.f32 %v5341_v56, %v5171_v0 }
 0x57a   : > { %v5468_v49 = vmax.f32 %v5436_v63, 0.0 }
 0x57b   : > { %v5467_v7 = vmax.f32 %v5435_v27, 0.0  ;;  %v5186_v27 = vld [vmem:[%s8989_s8 + $0xf8] sm:$0xff] }
 0x57c   : > { %5500 = vst [vmem:[%s10224_s12 + $0x88] sm:$0xff] %v5468_v49 }
 0x57d   : > { %5499 = vst [vmem:[%s10224_s12 + $0x80] sm:$0xff] %v5467_v7  ;;  %v7765_v60 = vpop.f32.mrb[178].mxu0 }
 0x57e   : > { %v5356_v43 = vadd.f32 %v7765_v60, %v10216_v10  ;;  %v5350_v51 = vpop.f32.mrb[179].mxu0 }
 0x57f   : > { %v5351_v48 = vadd.f32 %v10216_v10, %v5350_v51 }
 0x580   : > { %v5438_v3 = vadd.f32 %v5356_v43, %v5174_v2  ;;  %v5185_v2 = vld [vmem:[%s8989_s8 + $0xf0] sm:$0xff]  ;;  %s8652_s8 = scalar_lea.vmem %s10323_s21, 4096 }
 0x581   : > { %v5437_v45 = vadd.f32 %v5351_v48, %v5173_v41  ;;  %p8653_p10 = scmp.ne.s32.totalorder %s10323_s21, %s8652_s8  ;;  %p8660_p1 = scmp.lt.s32.totalorder %s8658_s9, %s8652_s8 }
 0x582   : > { %v5470_v26 = vmax.f32 %v5438_v3, 0.0 }
 0x583   : > { %v5469_v36 = vmax.f32 %v5437_v45, 0.0  ;;  %p8654_p3 = pnand %p8653_p10, %p8932_p5  ;;  %p8661_p2 = por %p8660_p1, %p8659_p12 }
 0x584   : > { %5502 = vst [vmem:[%s10224_s12 + $0x98] sm:$0xff] %v5470_v26 }
 0x585   : > { %5501 = vst [vmem:[%s10224_s12 + $0x90] sm:$0xff] %v5469_v36  ;;  %v7768_v46 = vpop.f32.mrb[180].mxu0  ;;  %p8655_p7 = pneg %p8654_p3 }
 0x586   : > { %v5366_v8 = vadd.f32 %v7768_v46, %v10216_v10  ;;  %v5360_v23 = vpop.f32.mrb[181].mxu0 }
 0x587   : > { %v5361_v28 = vadd.f32 %v10216_v10, %v5360_v23  ;;  %p8662_p4 = pnand %p8661_p2, %p8655_p7 }
 0x588   : > { %v5440_v11 = vadd.f32 %v5366_v8, %v5176_v58 }
 0x589   : > { %v5439_v16 = vadd.f32 %v5361_v28, %v5175_v18 }
 0x58a   : > { %v5472_v35 = vmax.f32 %v5440_v11, 0.0 }
 0x58b   : > { %v5471_v53 = vmax.f32 %v5439_v16, 0.0 }
 0x58c   : > { %5504 = vst [vmem:[%s10224_s12 + $0xa8] sm:$0xff] %v5472_v35 }
 0x58d   : > { %5503 = vst [vmem:[%s10224_s12 + $0xa0] sm:$0xff] %v5471_v53  ;;  %v7771_v5 = vpop.f32.mrb[182].mxu0 }
 0x58e   : > { %v5376_v24 = vadd.f32 %v7771_v5, %v10216_v10  ;;  %v5370_v17 = vpop.f32.mrb[183].mxu0 }
 0x58f   : > { %v5371_v25 = vadd.f32 %v10216_v10, %v5370_v17 }
 0x590   : > { %v5442_v34 = vadd.f32 %v5376_v24, %v5178_v38 }
 0x591   : > { %v5441_v13 = vadd.f32 %v5371_v25, %v5177_v39 }
 0x592   : > { %v5474_v12 = vmax.f32 %v5442_v34, 0.0 }
 0x593   : > { %v5473_v29 = vmax.f32 %v5441_v13, 0.0 }
 0x594   : > { %5506 = vst [vmem:[%s10224_s12 + $0xb8] sm:$0xff] %v5474_v12 }
 0x595   : > { %5505 = vst [vmem:[%s10224_s12 + $0xb0] sm:$0xff] %v5473_v29  ;;  %v7774_v22 = vpop.f32.mrb[184].mxu0 }
 0x596   : > { %v5386_v19 = vadd.f32 %v7774_v22, %v10216_v10  ;;  %v5380_v9 = vpop.f32.mrb[185].mxu0 }
 0x597   : > { %v5381_v31 = vadd.f32 %v10216_v10, %v5380_v9 }
 0x598   : > { %v5444_v6 = vadd.f32 %v5386_v19, %v5180_v30 }
 0x599   : > { %v5443_v40 = vadd.f32 %v5381_v31, %v5179_v37 }
 0x59a   : > { %v5476_v54 = vmax.f32 %v5444_v6, 0.0 }
 0x59b   : > { %v5475_v33 = vmax.f32 %v5443_v40, 0.0 }
 0x59c   : > { %5508 = vst [vmem:[%s10224_s12 + $0xc8] sm:$0xff] %v5476_v54 }
 0x59d   : > { %5507 = vst [vmem:[%s10224_s12 + $0xc0] sm:$0xff] %v5475_v33  ;;  %v7777_v44 = vpop.f32.mrb[186].mxu0 }
 0x59e   : > { %v5396_v20 = vadd.f32 %v7777_v44, %v10216_v10  ;;  %v5390_v50 = vpop.f32.mrb[187].mxu0 }
 0x59f   : > { %v5391_v1 = vadd.f32 %v10216_v10, %v5390_v50 }
 0x5a0   : > { %v5446_v57 = vadd.f32 %v5396_v20, %v5182_v59 }
 0x5a1   : > { %v5445_v62 = vadd.f32 %v5391_v1, %v5181_v4 }
 0x5a2   : > { %v5478_v52 = vmax.f32 %v5446_v57, 0.0 }
 0x5a3   : > { %v5477_v14 = vmax.f32 %v5445_v62, 0.0 }
 0x5a4   : > { %5510 = vst [vmem:[%s10224_s12 + $0xd8] sm:$0xff] %v5478_v52 }
 0x5a5   : > { %v7780_v47 = vpop.f32.mrb[188].mxu0  ;;  %5509 = vst [vmem:[%s10224_s12 + $0xd0] sm:$0xff] %v5477_v14 }
 0x5a6   : > { %v5406_v61 = vadd.f32 %v7780_v47, %v10216_v10  ;;  %v5400_v15 = vpop.f32.mrb[189].mxu0 }
 0x5a7   : > { %v5401_v55 = vadd.f32 %v10216_v10, %v5400_v15 }
 0x5a8   : > { %v5448_v0 = vadd.f32 %v5406_v61, %v5184_v21 }
 0x5a9   : > { %v5447_v32 = vadd.f32 %v5401_v55, %v5183_v42 }
 0x5aa   : > { %v5480_v56 = vmax.f32 %v5448_v0, 0.0 }
 0x5ab   : > { %v5479_v63 = vmax.f32 %v5447_v32, 0.0 }
 0x5ac   : > { %5512 = vst [vmem:[%s10224_s12 + $0xe8] sm:$0xff] %v5480_v56 }
 0x5ad   : > { %5511 = vst [vmem:[%s10224_s12 + $0xe0] sm:$0xff] %v5479_v63  ;;  %v7783_v49 = vpop.f32.mrb[190].mxu0 }
 0x5ae   : > { %v5416_v7 = vadd.f32 %v7783_v49, %v10216_v10  ;;  %v5410_v60 = vpop.f32.mrb[191].mxu0 }
 0x5af   : > { %v5411_v43 = vadd.f32 %v10216_v10, %v5410_v60 }
 0x5b0   : > { %v5450_v41 = vadd.f32 %v5416_v7, %v5186_v27 }
 0x5b1   : > { %v5449_v51 = vadd.f32 %v5411_v43, %v5185_v2 }
 0x5b2   : > { %v5482_v48 = vmax.f32 %v5450_v41, 0.0 }
 0x5b3   : > { %v5481_v3 = vmax.f32 %v5449_v51, 0.0 }
 0x5b4   : > { %5514 = vst [vmem:[%s10224_s12 + $0xf8] sm:$0xff] %v5482_v48 }
 0x5b5   : > { %5513 = vst [vmem:[%s10224_s12 + $0xf0] sm:$0xff] %v5481_v3 }
 0x5b6   : > { %8665 = shalt.err (!%p8662_p4)
}
 0x5b7   : > { %s8666_s13 = scalar_lea.hbm %s10321_s23, 4096  ;;  %s8670_s14 = scalar_lea.hbm %s10376_s7, 8192 }
 0x5b8   : > { %p8667_p9 = scmp.ne.s32.totalorder %s10321_s23, %s8666_s13  ;;  %p8671_p8 = scmp.lt.u32.totalorder %s10321_s23, %s10376_s7 }
 0x5b9   : > { %p8672_p13 = scmp.lt.u32.totalorder %s8670_s14, %s8666_s13  ;;  %p8674_p10 = scmp.lt.u32.totalorder %s8666_s13, %s10321_s23 }
 0x5ba   : > { %p8668_p0 = pnand %p8667_p9, %p8932_p5 }
 0x5bb   : > { %p8673_p6 = por %p8672_p13, %p8671_p8 }
 0x5bc   : > { %p8669_p11 = pneg %p8668_p0 }
 0x5bd   : > { %p8675_p3 = por %p8674_p10, %p8673_p6 }
 0x5bf   : > { %p8676_p7 = pnand %p8675_p3, %p8669_p11 }
 0x5c1   : > { %8679 = shalt.err (!%p8676_p7)
}
 0x5c2   : > { %s8736_s16 = smov 128   ;;  %s8737_s29 = smov 8  }
 0x5c3   : > { %8470 = dma.vmem_to_hbm [thread:$0]  (%p8932_p5), %s10323_s21, 4096, %s10321_s23, %s5516_s11, %s8736_s16, %s8736_s16, %s8737_s29  }
 0x5c4 PF: > { %s10450_s8 = sld [smem:[#allocation16_spill]]  ;;  %s5544_s28 = sand.u32 1, %s8714_s24  }
 0x5c5   : > { %p10452_p1 = scmp.ge.s32.totalorder %s8726_s27, 2  ;;  %s5545_s30 = scalar_lea.sflag [#allocation5], %s5544_s28 }
 0x5ca   : > { %p10451_p12 = scmp.ne.s32.totalorder %s10450_s8, 0 }
 0x5cc   : > { %p8487_p2 = pnand %p10452_p1, %p10451_p12 }
 0x5ce   : > { %8709 = dma.done.wait (!%p8487_p2), %s5545_s30, 4096  }
 0x5cf   : > { %8711 = vsyncadd (!%p8487_p2), %s5545_s30, 4294963200  ;;  %p22_p4 = scmp.ge.s32.totalorder %s8918_s22, 4   ;;  %s10453_s24 = smov %s8718_s25 }
 0x5d0   : > { %s10454_s25 = smov %s8722_s26  ;;  %s10455_s26 = smov %s8928_s18 }
 0x5d1   : > { %s10456_s27 = smov %s8918_s22  ;;  %24 = sbr.rel (!%p22_p4) target bundleno = 7 (0x7), region = 116 }
 0x5d8   :  { %5550 = vsyncpa [#allocation4], 1 }
 0x5d9   :  { %5552 = vsyncpa [#allocation4 + $0x1], 1 }
 0x5da   :  { %5553 = vsyncpa [#allocation7], 1 }
 0x5db   :  { %5554 = vsyncpa [#allocation10], 1 }
 0x5dc   :  { %5555 = vsyncpa [#allocation5], 1 }
 0x5dd   :  { %5557 = vsyncpa [#allocation5 + $0x1], 1 }

</bundles_post_ra>
